<compile_context>
chip_gen: v5e
topology: v5e:2x2
jax: 0.10.0
libtpu: 0.0.40
codegen_flags: <defaults>
</compile_context>

<pallas_src>
import numpy as np
import jax
import jax.numpy as jnp
from jax.experimental import pallas as pl
from jax.experimental.pallas import tpu as pltpu


def _round_up(v, m):
    return (v + m - 1) // m * m


# ----------------------------------------------------------------------------- kernel

def _build_kernel(L, T, BB, Hp):
    """Fused LSTM+FC kernel for static (num_layers, seq_len, batch_block, hidden_pad)."""

    def kernel(*refs):
        # refs layout (L > 1):
        #   x_ref      (T*BB, D)        bf16, time-major flattened (row = t*BB + b)
        #   wih0_ref   (D, 4Hp)         bf16
        #   wihr_ref   (L-1, Hp, 4Hp)   bf16
        #   whh_ref    (L, Hp, 4Hp)     bf16
        #   b_ref      (L, 1, 4Hp)      f32  (b_ih + b_hh, gate-block padded)
        #   wfc_ref    (Hp, Cp)         bf16
        #   bfc_ref    (1, Cp)          f32
        #   out_ref    (BB, Cp)         f32
        #   xp_ref     (T*BB, 4Hp)      f32 scratch: hoisted input projection
        #   seq_ref    (T*BB, Hp)       f32 scratch: current layer's hidden sequence
        if L > 1:
            (x_ref, wih0_ref, wihr_ref, whh_ref, b_ref, wfc_ref, bfc_ref,
             out_ref, xp_ref, seq_ref) = refs
        else:
            (x_ref, wih0_ref, whh_ref, b_ref, wfc_ref, bfc_ref,
             out_ref, xp_ref) = refs
            wihr_ref = None
            seq_ref = None

        h_last = None
        for layer in range(L):                      # static, small
            bias = b_ref[layer]                     # (1, 4Hp) f32

            # ---- hoisted input projection: one big MXU matmul per layer ----
            if layer == 0:
                src = x_ref[...]                                    # (T*BB, D) bf16
                w_ih = wih0_ref[...]                                # (D, 4Hp) bf16
            else:
                src = seq_ref[...].astype(jnp.bfloat16)             # (T*BB, Hp)
                w_ih = wihr_ref[layer - 1]                          # (Hp, 4Hp)
            xp_ref[...] = (jnp.dot(src, w_ih,
                                   preferred_element_type=jnp.float32)
                           + bias)                                  # (T*BB, 4Hp) f32

            write_seq = layer < L - 1   # last layer's sequence is never consumed

            def step(t, carry, layer=layer, write_seq=write_seq):
                h, c = carry                                        # (BB, Hp) f32
                row = pl.multiple_of(t * BB, BB)
                # W_hh read from the VMEM ref each step (loop-invariant load):
                # Mosaic can reuse the MXU weight push instead of pinning vregs.
                gates = xp_ref[pl.ds(row, BB), :] + jnp.dot(
                    h.astype(jnp.bfloat16), whh_ref[layer],
                    preferred_element_type=jnp.float32)             # (BB, 4Hp) f32
                i = jax.nn.sigmoid(gates[:, 0 * Hp:1 * Hp])
                f = jax.nn.sigmoid(gates[:, 1 * Hp:2 * Hp])
                g = jnp.tanh(gates[:, 2 * Hp:3 * Hp])
                o = jax.nn.sigmoid(gates[:, 3 * Hp:4 * Hp])
                c_new = f * c + i * g
                h_new = o * jnp.tanh(c_new)
                if write_seq:
                    seq_ref[pl.ds(row, BB), :] = h_new
                return (h_new, c_new)

            h0 = jnp.zeros((BB, Hp), jnp.float32)
            c0 = jnp.zeros((BB, Hp), jnp.float32)
            h_last, _ = jax.lax.fori_loop(0, T, step, (h0, c0),
                                          unroll=min(T, 8))

        # Dropout(p=0.5) at inference time is the identity.
        out_ref[...] = (jnp.dot(h_last.astype(jnp.bfloat16), wfc_ref[...],
                                preferred_element_type=jnp.float32)
                        + bfc_ref[...])

    return kernel


# ----------------------------------------------------------------------------- packing

def _pad_gate_cols(w, H, Hp):
    """Pad each of the 4 gate column blocks from H to Hp with zeros."""
    if Hp == H:
        return w
    blocks = jnp.split(w, 4, axis=-1)
    pads = [(0, 0)] * (w.ndim - 1) + [(0, Hp - H)]
    return jnp.concatenate([jnp.pad(b, pads) for b in blocks], axis=-1)


def _pad_rows(w, axis, H, Hp):
    if Hp == H:
        return w
    pads = [(0, 0)] * w.ndim
    pads[axis] = (0, Hp - H)
    return jnp.pad(w, pads)


def pack_params(params, Hp, Cp):
    """Pad hidden dim to Hp and classes to Cp (lane-dense); cast weights to bf16."""
    H = params["w_hh"].shape[1]
    C = params["w_fc"].shape[1]
    bf = jnp.bfloat16
    w_fc = _pad_rows(params["w_fc"], 0, H, Hp)
    w_fc = jnp.pad(w_fc, ((0, 0), (0, Cp - C)))
    b_fc = jnp.pad(params["b_fc"], ((0, 0), (0, Cp - C)))
    packed = {
        "w_ih0": _pad_gate_cols(params["w_ih0"], H, Hp).astype(bf),
        "w_hh": _pad_gate_cols(_pad_rows(params["w_hh"], 1, H, Hp), H, Hp).astype(bf),
        "bias": _pad_gate_cols(params["bias"], H, Hp).astype(jnp.float32),
        "w_fc": w_fc.astype(bf),
        "b_fc": b_fc.astype(jnp.float32),
    }
    if params.get("w_ih_rest") is not None:
        packed["w_ih_rest"] = _pad_gate_cols(
            _pad_rows(params["w_ih_rest"], 1, H, Hp), H, Hp).astype(bf)
    return packed


# ----------------------------------------------------------------------------- wrapper

def lstm_model_forward(x, params):
    """x: (B, T, input_size) batch-first float32. Returns (B, num_classes) float32."""
    x = jnp.asarray(x, jnp.float32)
    B, T, D = x.shape
    L, H, _ = params["w_hh"].shape
    C = params["w_fc"].shape[1]
    Hp = _round_up(H, 128)      # lane-dense gates / hidden state
    Cp = _round_up(C, 128)      # lane-dense classifier output (unmasked stores)
    G = 4 * Hp

    # Batch blocking: >= 2 blocks when the batch is big enough so the "parallel"
    # grid axis can shard sequences across v7x's two TensorCores; otherwise a
    # single block (grid of size 1, no overhead on v5e/v6e).
    nb = 2 if B >= 16 else 1
    Bp = _round_up(B, 8 * nb)   # sublane-dense batch, divisible into nb blocks
    BB = Bp // nb

    packed = pack_params(params, Hp, Cp)

    # (B,T,D) -> pad batch -> per-batch-block, time-major flattened (row = t*BB + b):
    # the kernel then only needs contiguous, 8-aligned dynamic sublane slices.
    x_p = jnp.pad(x, ((0, Bp - B), (0, 0), (0, 0)))
    x4 = (x_p.reshape(nb, BB, T, D)
              .transpose(0, 2, 1, 3)
              .reshape(nb, T * BB, D)
              .astype(jnp.bfloat16))

    kernel = _build_kernel(L, T, BB, Hp)

    inputs = [x4, packed["w_ih0"]]
    in_specs = [
        pl.BlockSpec((pl.Squeezed(), T * BB, D), lambda b: (b, 0, 0)),
        pl.BlockSpec((D, G), lambda b: (0, 0)),
    ]
    if L > 1:
        inputs.append(packed["w_ih_rest"])           # skipped entirely when L == 1
        in_specs.append(pl.BlockSpec((L - 1, Hp, G), lambda b: (0, 0, 0)))
    inputs += [packed["w_hh"], packed["bias"], packed["w_fc"], packed["b_fc"]]
    in_specs += [
        pl.BlockSpec((L, Hp, G), lambda b: (0, 0, 0)),
        pl.BlockSpec((L, 1, G), lambda b: (0, 0, 0)),
        pl.BlockSpec((Hp, Cp), lambda b: (0, 0)),
        pl.BlockSpec((1, Cp), lambda b: (0, 0)),
    ]

    scratch = [pltpu.VMEM((T * BB, G), jnp.float32)]          # hoisted input projection
    if L > 1:
        scratch.append(pltpu.VMEM((T * BB, Hp), jnp.float32))  # inter-layer hidden seq

    # Explicit scoped-VMEM budget (v5e default is only 16 MiB; leave headroom).
    nbytes = lambda a: int(a.size) * a.dtype.itemsize
    weight_bytes = sum(nbytes(a) for a in inputs)
    scratch_bytes = T * BB * G * 4 + (T * BB * Hp * 4 if L > 1 else 0)
    out_bytes = Bp * Cp * 4
    need = 2 * (weight_bytes + out_bytes) + scratch_bytes     # 2x: double-buffered blocks
    vmem_limit = int(min(128 * 1024 * 1024, max(2 * need, 32 * 1024 * 1024)))

    out = pl.pallas_call(
        kernel,
        grid=(nb,),
        out_shape=jax.ShapeDtypeStruct((Bp, Cp), jnp.float32),
        in_specs=in_specs,
        out_specs=pl.BlockSpec((BB, Cp), lambda b: (b, 0)),
        scratch_shapes=scratch,
        compiler_params=pltpu.CompilerParams(
            dimension_semantics=("parallel",),
            vmem_limit_bytes=vmem_limit),
    )(*inputs)
    return out[:B, :C]


# ----------------------------------------------------------------------------- init + reference

def init_params(key, input_size, hidden_size, num_layers, num_classes):
    """Deterministic init matching PyTorch shapes (uniform(-1/sqrt(H), 1/sqrt(H)))."""
    H, L, D, C = hidden_size, num_layers, input_size, num_classes
    bound = 1.0 / np.sqrt(H)
    keys = jax.random.split(key, 4 * L + 2)

    def u(k, shape):
        return jax.random.uniform(k, shape, jnp.float32, -bound, bound)

    w_ih0 = u(keys[0], (D, 4 * H))                                   # pre-transposed
    w_ih_rest = (jnp.stack([u(keys[1 + l], (H, 4 * H)) for l in range(L - 1)], axis=0)
                 if L > 1 else None)
    w_hh = jnp.stack([u(keys[L + l], (H, 4 * H)) for l in range(L)], axis=0)
    bias = jnp.stack([u(keys[2 * L + l], (1, 4 * H)) + u(keys[3 * L + l], (1, 4 * H))
                      for l in range(L)], axis=0)                    # b_ih + b_hh
    w_fc = u(keys[4 * L], (H, C))
    b_fc = u(keys[4 * L + 1], (1, C))
    return dict(w_ih0=w_ih0, w_ih_rest=w_ih_rest, w_hh=w_hh, bias=bias,
                w_fc=w_fc, b_fc=b_fc)


def ref_forward(x, params):
    """Pure-JAX reference of the PyTorch forward (eval mode), with the kernel's
    precision policy: bf16 matmul inputs, f32 accumulation/elementwise."""
    B, T, D = x.shape
    L, H, _ = params["w_hh"].shape
    bf = lambda a: a.astype(jnp.bfloat16)
    f32 = lambda a: a.astype(jnp.float32)
    seq = bf(x)                     # layer input fed to the MXU in bf16
    h = None
    for l in range(L):
        w_ih = params["w_ih0"] if l == 0 else params["w_ih_rest"][l - 1]
        w_hh = params["w_hh"][l]
        b = params["bias"][l]
        # hoisted input projection (matches kernel: bf16 inputs, f32 accum + bias)
        xp = jnp.einsum("btd,dg->btg", seq, bf(w_ih),
                        preferred_element_type=jnp.float32) + b
        h = jnp.zeros((B, H), jnp.float32)
        c = jnp.zeros((B, H), jnp.float32)
        outs = []
        for t in range(T):
            gates = xp[:, t, :] + jnp.dot(bf(h), bf(w_hh),
                                          preferred_element_type=jnp.float32)
            i = jax.nn.sigmoid(gates[:, 0 * H:1 * H])
            f = jax.nn.sigmoid(gates[:, 1 * H:2 * H])
            g = jnp.tanh(gates[:, 2 * H:3 * H])
            o = jax.nn.sigmoid(gates[:, 3 * H:4 * H])
            c = f * c + i * g
            h = o * jnp.tanh(c)
            outs.append(h)
        seq = bf(jnp.stack(outs, axis=1))
    return (jnp.dot(bf(h), bf(params["w_fc"]), preferred_element_type=jnp.float32)
            + params["b_fc"])


# ----------------------------------------------------------------------------- main

if __name__ == "__main__":
    B, T, D, H, L, C = 4, 8, 16, 32, 2, 10

    key = jax.random.PRNGKey(0)
    kx, kp = jax.random.split(key)
    x = jax.random.normal(kx, (B, T, D), jnp.float32)
    params = init_params(kp, D, H, L, C)

    fwd = jax.jit(lstm_model_forward)
    out = jax.block_until_ready(fwd(x, params))
    ref = jax.block_until_ready(ref_forward(x, params))

    assert out.shape == (B, C), out.shape
    np.testing.assert_allclose(np.asarray(out), np.asarray(ref),
                               rtol=2e-3, atol=2e-3)
    print("KERNEL_OK")
</pallas_src>

<mosaic_0001>
module attributes {stable_mosaic.version = 11 : i64} {
  func.func @kernel(%arg0: i32, %arg1: memref<1x64x16xbf16, #tpu.memory_space<vmem>>, %arg2: memref<16x512xbf16, #tpu.memory_space<vmem>>, %arg3: memref<1x128x512xbf16, #tpu.memory_space<vmem>>, %arg4: memref<2x128x512xbf16, #tpu.memory_space<vmem>>, %arg5: memref<2x1x512xf32, #tpu.memory_space<vmem>>, %arg6: memref<128x128xbf16, #tpu.memory_space<vmem>>, %arg7: memref<1x128xf32, #tpu.memory_space<vmem>>, %arg8: memref<8x128xf32, #tpu.memory_space<vmem>>, %arg9: memref<64x512xf32, #tpu.memory_space<vmem>>, %arg10: memref<64x128xf32, #tpu.memory_space<vmem>>) attributes {dimension_semantics = [#tpu.dimension_semantics<parallel>], iteration_bounds = array<i64: 1>, scalar_prefetch = 0 : i64, scratch_operands = 2 : i64, tpu.core_type = #tpu.core_type<tc>, window_params = [{transform_indices = @transform_0, window_bounds = array<i64: 1, 64, 16>}, {pipeline_mode = #tpu.pipeline_mode<synchronous>, transform_indices = @transform_1, window_bounds = array<i64: 16, 512>}, {pipeline_mode = #tpu.pipeline_mode<synchronous>, transform_indices = @transform_2, window_bounds = array<i64: 1, 128, 512>}, {pipeline_mode = #tpu.pipeline_mode<synchronous>, transform_indices = @transform_3, window_bounds = array<i64: 2, 128, 512>}, {pipeline_mode = #tpu.pipeline_mode<synchronous>, transform_indices = @transform_4, window_bounds = array<i64: 2, 1, 512>}, {pipeline_mode = #tpu.pipeline_mode<synchronous>, transform_indices = @transform_5, window_bounds = array<i64: 128, 128>}, {pipeline_mode = #tpu.pipeline_mode<synchronous>, transform_indices = @transform_6, window_bounds = array<i64: 1, 128>}, {transform_indices = @transform_7, window_bounds = array<i64: 8, 128>}]} {
    %c0 = arith.constant 0 : index
    %c0_0 = arith.constant 0 : index
    %c0_1 = arith.constant 0 : index
    %0 = vector.load %arg5[%c0, %c0_0, %c0_1] : memref<2x1x512xf32, #tpu.memory_space<vmem>>, vector<1x1x512xf32>
    %1 = vector.shape_cast %0 : vector<1x1x512xf32> to vector<1x512xf32>
    %c0_2 = arith.constant 0 : index
    %c0_3 = arith.constant 0 : index
    %c0_4 = arith.constant 0 : index
    %2 = vector.load %arg1[%c0_2, %c0_3, %c0_4] : memref<1x64x16xbf16, #tpu.memory_space<vmem>>, vector<1x64x16xbf16>
    %3 = vector.shape_cast %2 : vector<1x64x16xbf16> to vector<64x16xbf16>
    %c0_5 = arith.constant 0 : index
    %c0_6 = arith.constant 0 : index
    %4 = vector.load %arg2[%c0_5, %c0_6] : memref<16x512xbf16, #tpu.memory_space<vmem>>, vector<16x512xbf16>
    %cst = arith.constant dense<0.000000e+00> : vector<64x512xf32>
    %5 = tpu.matmul %3, %4, %cst {dimension_numbers = #tpu.dot_dimension_numbers<[1], [0], [0], [1], [0, 0, 1, 1], [], []>} : vector<64x16xbf16>, vector<16x512xbf16>, vector<64x512xf32> -> vector<64x512xf32>
    %6 = vector.broadcast %1 : vector<1x512xf32> to vector<64x512xf32>
    %7 = arith.addf %5, %6 : vector<64x512xf32>
    %c0_7 = arith.constant 0 : index
    %c0_8 = arith.constant 0 : index
    %8 = vector.load %arg9[%c0_7, %c0_8] : memref<64x512xf32, #tpu.memory_space<vmem>>, vector<64x512xf32>
    tpu.vector_store %arg9[%c0_7, %c0_8], %7 {strides = array<i32>} : memref<64x512xf32, #tpu.memory_space<vmem>>, vector<64x512xf32>,
    %cst_9 = arith.constant 0.000000e+00 : f32
    %9 = vector.broadcast %cst_9 : f32 to vector<8x128xf32>
    %cst_10 = arith.constant 0.000000e+00 : f32
    %10 = vector.broadcast %cst_10 : f32 to vector<8x128xf32>
    %c0_i32 = arith.constant 0 : i32
    %c8_i32 = arith.constant 8 : i32
    %11 = arith.muli %c0_i32, %c8_i32 : i32
    %12 = tpu.assume_multiple %11, 8 : i32
    %13 = arith.index_cast %12 : i32 to index
    %c0_11 = arith.constant 0 : index
    %14 = vector.load %arg9[%13, %c0_11] : memref<64x512xf32, #tpu.memory_space<vmem>>, vector<8x512xf32>
    %15 = arith.truncf %9 : vector<8x128xf32> to vector<8x128xbf16>
    %c0_12 = arith.constant 0 : index
    %c0_13 = arith.constant 0 : index
    %c0_14 = arith.constant 0 : index
    %16 = vector.load %arg4[%c0_12, %c0_13, %c0_14] : memref<2x128x512xbf16, #tpu.memory_space<vmem>>, vector<1x128x512xbf16>
    %17 = vector.shape_cast %16 : vector<1x128x512xbf16> to vector<128x512xbf16>
    %cst_15 = arith.constant dense<0.000000e+00> : vector<8x512xf32>
    %18 = tpu.matmul %15, %17, %cst_15 {dimension_numbers = #tpu.dot_dimension_numbers<[1], [0], [0], [1], [0, 0, 1, 1], [], []>} : vector<8x128xbf16>, vector<128x512xbf16>, vector<8x512xf32> -> vector<8x512xf32>
    %19 = arith.addf %14, %18 : vector<8x512xf32>
    %20 = vector.extract_strided_slice %19 {offsets = [0, 0], sizes = [8, 128], strides = [1, 1]} : vector<8x512xf32> to vector<8x128xf32>
    %21 = arith.negf %20 : vector<8x128xf32>
    %22 = math.exp %21 : vector<8x128xf32>
    %cst_16 = arith.constant 1.000000e+00 : f32
    %23 = vector.broadcast %cst_16 : f32 to vector<8x128xf32>
    %24 = arith.addf %23, %22 : vector<8x128xf32>
    %25 = arith.divf %23, %24 : vector<8x128xf32>
    %26 = vector.extract_strided_slice %19 {offsets = [0, 128], sizes = [8, 128], strides = [1, 1]} : vector<8x512xf32> to vector<8x128xf32>
    %27 = arith.negf %26 : vector<8x128xf32>
    %28 = math.exp %27 : vector<8x128xf32>
    %cst_17 = arith.constant 1.000000e+00 : f32
    %29 = vector.broadcast %cst_17 : f32 to vector<8x128xf32>
    %30 = arith.addf %29, %28 : vector<8x128xf32>
    %31 = arith.divf %29, %30 : vector<8x128xf32>
    %32 = vector.extract_strided_slice %19 {offsets = [0, 256], sizes = [8, 128], strides = [1, 1]} : vector<8x512xf32> to vector<8x128xf32>
    %33 = math.tanh %32 : vector<8x128xf32>
    %34 = vector.extract_strided_slice %19 {offsets = [0, 384], sizes = [8, 128], strides = [1, 1]} : vector<8x512xf32> to vector<8x128xf32>
    %35 = arith.negf %34 : vector<8x128xf32>
    %36 = math.exp %35 : vector<8x128xf32>
    %cst_18 = arith.constant 1.000000e+00 : f32
    %37 = vector.broadcast %cst_18 : f32 to vector<8x128xf32>
    %38 = arith.addf %37, %36 : vector<8x128xf32>
    %39 = arith.divf %37, %38 : vector<8x128xf32>
    %40 = arith.mulf %31, %10 : vector<8x128xf32>
    %41 = arith.mulf %25, %33 : vector<8x128xf32>
    %42 = arith.addf %40, %41 : vector<8x128xf32>
    %43 = math.tanh %42 : vector<8x128xf32>
    %44 = arith.mulf %39, %43 : vector<8x128xf32>
    %45 = arith.index_cast %12 : i32 to index
    %c0_19 = arith.constant 0 : index
    %46 = vector.load %arg10[%45, %c0_19] : memref<64x128xf32, #tpu.memory_space<vmem>>, vector<8x128xf32>
    tpu.vector_store %arg10[%45, %c0_19], %44 {strides = array<i32>} : memref<64x128xf32, #tpu.memory_space<vmem>>, vector<8x128xf32>,
    %c1_i32 = arith.constant 1 : i32
    %c8_i32_20 = arith.constant 8 : i32
    %47 = arith.muli %c1_i32, %c8_i32_20 : i32
    %48 = tpu.assume_multiple %47, 8 : i32
    %49 = arith.index_cast %48 : i32 to index
    %c0_21 = arith.constant 0 : index
    %50 = vector.load %arg9[%49, %c0_21] : memref<64x512xf32, #tpu.memory_space<vmem>>, vector<8x512xf32>
    %51 = arith.truncf %44 : vector<8x128xf32> to vector<8x128xbf16>
    %c0_22 = arith.constant 0 : index
    %c0_23 = arith.constant 0 : index
    %c0_24 = arith.constant 0 : index
    %52 = vector.load %arg4[%c0_22, %c0_23, %c0_24] : memref<2x128x512xbf16, #tpu.memory_space<vmem>>, vector<1x128x512xbf16>
    %53 = vector.shape_cast %52 : vector<1x128x512xbf16> to vector<128x512xbf16>
    %cst_25 = arith.constant dense<0.000000e+00> : vector<8x512xf32>
    %54 = tpu.matmul %51, %53, %cst_25 {dimension_numbers = #tpu.dot_dimension_numbers<[1], [0], [0], [1], [0, 0, 1, 1], [], []>} : vector<8x128xbf16>, vector<128x512xbf16>, vector<8x512xf32> -> vector<8x512xf32>
    %55 = arith.addf %50, %54 : vector<8x512xf32>
    %56 = vector.extract_strided_slice %55 {offsets = [0, 0], sizes = [8, 128], strides = [1, 1]} : vector<8x512xf32> to vector<8x128xf32>
    %57 = arith.negf %56 : vector<8x128xf32>
    %58 = math.exp %57 : vector<8x128xf32>
    %cst_26 = arith.constant 1.000000e+00 : f32
    %59 = vector.broadcast %cst_26 : f32 to vector<8x128xf32>
    %60 = arith.addf %59, %58 : vector<8x128xf32>
    %61 = arith.divf %59, %60 : vector<8x128xf32>
    %62 = vector.extract_strided_slice %55 {offsets = [0, 128], sizes = [8, 128], strides = [1, 1]} : vector<8x512xf32> to vector<8x128xf32>
    %63 = arith.negf %62 : vector<8x128xf32>
    %64 = math.exp %63 : vector<8x128xf32>
    %cst_27 = arith.constant 1.000000e+00 : f32
    %65 = vector.broadcast %cst_27 : f32 to vector<8x128xf32>
    %66 = arith.addf %65, %64 : vector<8x128xf32>
    %67 = arith.divf %65, %66 : vector<8x128xf32>
    %68 = vector.extract_strided_slice %55 {offsets = [0, 256], sizes = [8, 128], strides = [1, 1]} : vector<8x512xf32> to vector<8x128xf32>
    %69 = math.tanh %68 : vector<8x128xf32>
    %70 = vector.extract_strided_slice %55 {offsets = [0, 384], sizes = [8, 128], strides = [1, 1]} : vector<8x512xf32> to vector<8x128xf32>
    %71 = arith.negf %70 : vector<8x128xf32>
    %72 = math.exp %71 : vector<8x128xf32>
    %cst_28 = arith.constant 1.000000e+00 : f32
    %73 = vector.broadcast %cst_28 : f32 to vector<8x128xf32>
    %74 = arith.addf %73, %72 : vector<8x128xf32>
    %75 = arith.divf %73, %74 : vector<8x128xf32>
    %76 = arith.mulf %67, %42 : vector<8x128xf32>
    %77 = arith.mulf %61, %69 : vector<8x128xf32>
    %78 = arith.addf %76, %77 : vector<8x128xf32>
    %79 = math.tanh %78 : vector<8x128xf32>
    %80 = arith.mulf %75, %79 : vector<8x128xf32>
    %81 = arith.index_cast %48 : i32 to index
    %c0_29 = arith.constant 0 : index
    %82 = vector.load %arg10[%81, %c0_29] : memref<64x128xf32, #tpu.memory_space<vmem>>, vector<8x128xf32>
    tpu.vector_store %arg10[%81, %c0_29], %80 {strides = array<i32>} : memref<64x128xf32, #tpu.memory_space<vmem>>, vector<8x128xf32>,
    %c2_i32 = arith.constant 2 : i32
    %c8_i32_30 = arith.constant 8 : i32
    %83 = arith.muli %c2_i32, %c8_i32_30 : i32
    %84 = tpu.assume_multiple %83, 8 : i32
    %85 = arith.index_cast %84 : i32 to index
    %c0_31 = arith.constant 0 : index
    %86 = vector.load %arg9[%85, %c0_31] : memref<64x512xf32, #tpu.memory_space<vmem>>, vector<8x512xf32>
    %87 = arith.truncf %80 : vector<8x128xf32> to vector<8x128xbf16>
    %c0_32 = arith.constant 0 : index
    %c0_33 = arith.constant 0 : index
    %c0_34 = arith.constant 0 : index
    %88 = vector.load %arg4[%c0_32, %c0_33, %c0_34] : memref<2x128x512xbf16, #tpu.memory_space<vmem>>, vector<1x128x512xbf16>
    %89 = vector.shape_cast %88 : vector<1x128x512xbf16> to vector<128x512xbf16>
    %cst_35 = arith.constant dense<0.000000e+00> : vector<8x512xf32>
    %90 = tpu.matmul %87, %89, %cst_35 {dimension_numbers = #tpu.dot_dimension_numbers<[1], [0], [0], [1], [0, 0, 1, 1], [], []>} : vector<8x128xbf16>, vector<128x512xbf16>, vector<8x512xf32> -> vector<8x512xf32>
    %91 = arith.addf %86, %90 : vector<8x512xf32>
    %92 = vector.extract_strided_slice %91 {offsets = [0, 0], sizes = [8, 128], strides = [1, 1]} : vector<8x512xf32> to vector<8x128xf32>
    %93 = arith.negf %92 : vector<8x128xf32>
    %94 = math.exp %93 : vector<8x128xf32>
    %cst_36 = arith.constant 1.000000e+00 : f32
    %95 = vector.broadcast %cst_36 : f32 to vector<8x128xf32>
    %96 = arith.addf %95, %94 : vector<8x128xf32>
    %97 = arith.divf %95, %96 : vector<8x128xf32>
    %98 = vector.extract_strided_slice %91 {offsets = [0, 128], sizes = [8, 128], strides = [1, 1]} : vector<8x512xf32> to vector<8x128xf32>
    %99 = arith.negf %98 : vector<8x128xf32>
    %100 = math.exp %99 : vector<8x128xf32>
    %cst_37 = arith.constant 1.000000e+00 : f32
    %101 = vector.broadcast %cst_37 : f32 to vector<8x128xf32>
    %102 = arith.addf %101, %100 : vector<8x128xf32>
    %103 = arith.divf %101, %102 : vector<8x128xf32>
    %104 = vector.extract_strided_slice %91 {offsets = [0, 256], sizes = [8, 128], strides = [1, 1]} : vector<8x512xf32> to vector<8x128xf32>
    %105 = math.tanh %104 : vector<8x128xf32>
    %106 = vector.extract_strided_slice %91 {offsets = [0, 384], sizes = [8, 128], strides = [1, 1]} : vector<8x512xf32> to vector<8x128xf32>
    %107 = arith.negf %106 : vector<8x128xf32>
    %108 = math.exp %107 : vector<8x128xf32>
    %cst_38 = arith.constant 1.000000e+00 : f32
    %109 = vector.broadcast %cst_38 : f32 to vector<8x128xf32>
    %110 = arith.addf %109, %108 : vector<8x128xf32>
    %111 = arith.divf %109, %110 : vector<8x128xf32>
    %112 = arith.mulf %103, %78 : vector<8x128xf32>
    %113 = arith.mulf %97, %105 : vector<8x128xf32>
    %114 = arith.addf %112, %113 : vector<8x128xf32>
    %115 = math.tanh %114 : vector<8x128xf32>
    %116 = arith.mulf %111, %115 : vector<8x128xf32>
    %117 = arith.index_cast %84 : i32 to index
    %c0_39 = arith.constant 0 : index
    %118 = vector.load %arg10[%117, %c0_39] : memref<64x128xf32, #tpu.memory_space<vmem>>, vector<8x128xf32>
    tpu.vector_store %arg10[%117, %c0_39], %116 {strides = array<i32>} : memref<64x128xf32, #tpu.memory_space<vmem>>, vector<8x128xf32>,
    %c3_i32 = arith.constant 3 : i32
    %c8_i32_40 = arith.constant 8 : i32
    %119 = arith.muli %c3_i32, %c8_i32_40 : i32
    %120 = tpu.assume_multiple %119, 8 : i32
    %121 = arith.index_cast %120 : i32 to index
    %c0_41 = arith.constant 0 : index
    %122 = vector.load %arg9[%121, %c0_41] : memref<64x512xf32, #tpu.memory_space<vmem>>, vector<8x512xf32>
    %123 = arith.truncf %116 : vector<8x128xf32> to vector<8x128xbf16>
    %c0_42 = arith.constant 0 : index
    %c0_43 = arith.constant 0 : index
    %c0_44 = arith.constant 0 : index
    %124 = vector.load %arg4[%c0_42, %c0_43, %c0_44] : memref<2x128x512xbf16, #tpu.memory_space<vmem>>, vector<1x128x512xbf16>
    %125 = vector.shape_cast %124 : vector<1x128x512xbf16> to vector<128x512xbf16>
    %cst_45 = arith.constant dense<0.000000e+00> : vector<8x512xf32>
    %126 = tpu.matmul %123, %125, %cst_45 {dimension_numbers = #tpu.dot_dimension_numbers<[1], [0], [0], [1], [0, 0, 1, 1], [], []>} : vector<8x128xbf16>, vector<128x512xbf16>, vector<8x512xf32> -> vector<8x512xf32>
    %127 = arith.addf %122, %126 : vector<8x512xf32>
    %128 = vector.extract_strided_slice %127 {offsets = [0, 0], sizes = [8, 128], strides = [1, 1]} : vector<8x512xf32> to vector<8x128xf32>
    %129 = arith.negf %128 : vector<8x128xf32>
    %130 = math.exp %129 : vector<8x128xf32>
    %cst_46 = arith.constant 1.000000e+00 : f32
    %131 = vector.broadcast %cst_46 : f32 to vector<8x128xf32>
    %132 = arith.addf %131, %130 : vector<8x128xf32>
    %133 = arith.divf %131, %132 : vector<8x128xf32>
    %134 = vector.extract_strided_slice %127 {offsets = [0, 128], sizes = [8, 128], strides = [1, 1]} : vector<8x512xf32> to vector<8x128xf32>
    %135 = arith.negf %134 : vector<8x128xf32>
    %136 = math.exp %135 : vector<8x128xf32>
    %cst_47 = arith.constant 1.000000e+00 : f32
    %137 = vector.broadcast %cst_47 : f32 to vector<8x128xf32>
    %138 = arith.addf %137, %136 : vector<8x128xf32>
    %139 = arith.divf %137, %138 : vector<8x128xf32>
    %140 = vector.extract_strided_slice %127 {offsets = [0, 256], sizes = [8, 128], strides = [1, 1]} : vector<8x512xf32> to vector<8x128xf32>
    %141 = math.tanh %140 : vector<8x128xf32>
    %142 = vector.extract_strided_slice %127 {offsets = [0, 384], sizes = [8, 128], strides = [1, 1]} : vector<8x512xf32> to vector<8x128xf32>
    %143 = arith.negf %142 : vector<8x128xf32>
    %144 = math.exp %143 : vector<8x128xf32>
    %cst_48 = arith.constant 1.000000e+00 : f32
    %145 = vector.broadcast %cst_48 : f32 to vector<8x128xf32>
    %146 = arith.addf %145, %144 : vector<8x128xf32>
    %147 = arith.divf %145, %146 : vector<8x128xf32>
    %148 = arith.mulf %139, %114 : vector<8x128xf32>
    %149 = arith.mulf %133, %141 : vector<8x128xf32>
    %150 = arith.addf %148, %149 : vector<8x128xf32>
    %151 = math.tanh %150 : vector<8x128xf32>
    %152 = arith.mulf %147, %151 : vector<8x128xf32>
    %153 = arith.index_cast %120 : i32 to index
    %c0_49 = arith.constant 0 : index
    %154 = vector.load %arg10[%153, %c0_49] : memref<64x128xf32, #tpu.memory_space<vmem>>, vector<8x128xf32>
    tpu.vector_store %arg10[%153, %c0_49], %152 {strides = array<i32>} : memref<64x128xf32, #tpu.memory_space<vmem>>, vector<8x128xf32>,
    %c4_i32 = arith.constant 4 : i32
    %c8_i32_50 = arith.constant 8 : i32
    %155 = arith.muli %c4_i32, %c8_i32_50 : i32
    %156 = tpu.assume_multiple %155, 8 : i32
    %157 = arith.index_cast %156 : i32 to index
    %c0_51 = arith.constant 0 : index
    %158 = vector.load %arg9[%157, %c0_51] : memref<64x512xf32, #tpu.memory_space<vmem>>, vector<8x512xf32>
    %159 = arith.truncf %152 : vector<8x128xf32> to vector<8x128xbf16>
    %c0_52 = arith.constant 0 : index
    %c0_53 = arith.constant 0 : index
    %c0_54 = arith.constant 0 : index
    %160 = vector.load %arg4[%c0_52, %c0_53, %c0_54] : memref<2x128x512xbf16, #tpu.memory_space<vmem>>, vector<1x128x512xbf16>
    %161 = vector.shape_cast %160 : vector<1x128x512xbf16> to vector<128x512xbf16>
    %cst_55 = arith.constant dense<0.000000e+00> : vector<8x512xf32>
    %162 = tpu.matmul %159, %161, %cst_55 {dimension_numbers = #tpu.dot_dimension_numbers<[1], [0], [0], [1], [0, 0, 1, 1], [], []>} : vector<8x128xbf16>, vector<128x512xbf16>, vector<8x512xf32> -> vector<8x512xf32>
    %163 = arith.addf %158, %162 : vector<8x512xf32>
    %164 = vector.extract_strided_slice %163 {offsets = [0, 0], sizes = [8, 128], strides = [1, 1]} : vector<8x512xf32> to vector<8x128xf32>
    %165 = arith.negf %164 : vector<8x128xf32>
    %166 = math.exp %165 : vector<8x128xf32>
    %cst_56 = arith.constant 1.000000e+00 : f32
    %167 = vector.broadcast %cst_56 : f32 to vector<8x128xf32>
    %168 = arith.addf %167, %166 : vector<8x128xf32>
    %169 = arith.divf %167, %168 : vector<8x128xf32>
    %170 = vector.extract_strided_slice %163 {offsets = [0, 128], sizes = [8, 128], strides = [1, 1]} : vector<8x512xf32> to vector<8x128xf32>
    %171 = arith.negf %170 : vector<8x128xf32>
    %172 = math.exp %171 : vector<8x128xf32>
    %cst_57 = arith.constant 1.000000e+00 : f32
    %173 = vector.broadcast %cst_57 : f32 to vector<8x128xf32>
    %174 = arith.addf %173, %172 : vector<8x128xf32>
    %175 = arith.divf %173, %174 : vector<8x128xf32>
    %176 = vector.extract_strided_slice %163 {offsets = [0, 256], sizes = [8, 128], strides = [1, 1]} : vector<8x512xf32> to vector<8x128xf32>
    %177 = math.tanh %176 : vector<8x128xf32>
    %178 = vector.extract_strided_slice %163 {offsets = [0, 384], sizes = [8, 128], strides = [1, 1]} : vector<8x512xf32> to vector<8x128xf32>
    %179 = arith.negf %178 : vector<8x128xf32>
    %180 = math.exp %179 : vector<8x128xf32>
    %cst_58 = arith.constant 1.000000e+00 : f32
    %181 = vector.broadcast %cst_58 : f32 to vector<8x128xf32>
    %182 = arith.addf %181, %180 : vector<8x128xf32>
    %183 = arith.divf %181, %182 : vector<8x128xf32>
    %184 = arith.mulf %175, %150 : vector<8x128xf32>
    %185 = arith.mulf %169, %177 : vector<8x128xf32>
    %186 = arith.addf %184, %185 : vector<8x128xf32>
    %187 = math.tanh %186 : vector<8x128xf32>
    %188 = arith.mulf %183, %187 : vector<8x128xf32>
    %189 = arith.index_cast %156 : i32 to index
    %c0_59 = arith.constant 0 : index
    %190 = vector.load %arg10[%189, %c0_59] : memref<64x128xf32, #tpu.memory_space<vmem>>, vector<8x128xf32>
    tpu.vector_store %arg10[%189, %c0_59], %188 {strides = array<i32>} : memref<64x128xf32, #tpu.memory_space<vmem>>, vector<8x128xf32>,
    %c5_i32 = arith.constant 5 : i32
    %c8_i32_60 = arith.constant 8 : i32
    %191 = arith.muli %c5_i32, %c8_i32_60 : i32
    %192 = tpu.assume_multiple %191, 8 : i32
    %193 = arith.index_cast %192 : i32 to index
    %c0_61 = arith.constant 0 : index
    %194 = vector.load %arg9[%193, %c0_61] : memref<64x512xf32, #tpu.memory_space<vmem>>, vector<8x512xf32>
    %195 = arith.truncf %188 : vector<8x128xf32> to vector<8x128xbf16>
    %c0_62 = arith.constant 0 : index
    %c0_63 = arith.constant 0 : index
    %c0_64 = arith.constant 0 : index
    %196 = vector.load %arg4[%c0_62, %c0_63, %c0_64] : memref<2x128x512xbf16, #tpu.memory_space<vmem>>, vector<1x128x512xbf16>
    %197 = vector.shape_cast %196 : vector<1x128x512xbf16> to vector<128x512xbf16>
    %cst_65 = arith.constant dense<0.000000e+00> : vector<8x512xf32>
    %198 = tpu.matmul %195, %197, %cst_65 {dimension_numbers = #tpu.dot_dimension_numbers<[1], [0], [0], [1], [0, 0, 1, 1], [], []>} : vector<8x128xbf16>, vector<128x512xbf16>, vector<8x512xf32> -> vector<8x512xf32>
    %199 = arith.addf %194, %198 : vector<8x512xf32>
    %200 = vector.extract_strided_slice %199 {offsets = [0, 0], sizes = [8, 128], strides = [1, 1]} : vector<8x512xf32> to vector<8x128xf32>
    %201 = arith.negf %200 : vector<8x128xf32>
    %202 = math.exp %201 : vector<8x128xf32>
    %cst_66 = arith.constant 1.000000e+00 : f32
    %203 = vector.broadcast %cst_66 : f32 to vector<8x128xf32>
    %204 = arith.addf %203, %202 : vector<8x128xf32>
    %205 = arith.divf %203, %204 : vector<8x128xf32>
    %206 = vector.extract_strided_slice %199 {offsets = [0, 128], sizes = [8, 128], strides = [1, 1]} : vector<8x512xf32> to vector<8x128xf32>
    %207 = arith.negf %206 : vector<8x128xf32>
    %208 = math.exp %207 : vector<8x128xf32>
    %cst_67 = arith.constant 1.000000e+00 : f32
    %209 = vector.broadcast %cst_67 : f32 to vector<8x128xf32>
    %210 = arith.addf %209, %208 : vector<8x128xf32>
    %211 = arith.divf %209, %210 : vector<8x128xf32>
    %212 = vector.extract_strided_slice %199 {offsets = [0, 256], sizes = [8, 128], strides = [1, 1]} : vector<8x512xf32> to vector<8x128xf32>
    %213 = math.tanh %212 : vector<8x128xf32>
    %214 = vector.extract_strided_slice %199 {offsets = [0, 384], sizes = [8, 128], strides = [1, 1]} : vector<8x512xf32> to vector<8x128xf32>
    %215 = arith.negf %214 : vector<8x128xf32>
    %216 = math.exp %215 : vector<8x128xf32>
    %cst_68 = arith.constant 1.000000e+00 : f32
    %217 = vector.broadcast %cst_68 : f32 to vector<8x128xf32>
    %218 = arith.addf %217, %216 : vector<8x128xf32>
    %219 = arith.divf %217, %218 : vector<8x128xf32>
    %220 = arith.mulf %211, %186 : vector<8x128xf32>
    %221 = arith.mulf %205, %213 : vector<8x128xf32>
    %222 = arith.addf %220, %221 : vector<8x128xf32>
    %223 = math.tanh %222 : vector<8x128xf32>
    %224 = arith.mulf %219, %223 : vector<8x128xf32>
    %225 = arith.index_cast %192 : i32 to index
    %c0_69 = arith.constant 0 : index
    %226 = vector.load %arg10[%225, %c0_69] : memref<64x128xf32, #tpu.memory_space<vmem>>, vector<8x128xf32>
    tpu.vector_store %arg10[%225, %c0_69], %224 {strides = array<i32>} : memref<64x128xf32, #tpu.memory_space<vmem>>, vector<8x128xf32>,
    %c6_i32 = arith.constant 6 : i32
    %c8_i32_70 = arith.constant 8 : i32
    %227 = arith.muli %c6_i32, %c8_i32_70 : i32
    %228 = tpu.assume_multiple %227, 8 : i32
    %229 = arith.index_cast %228 : i32 to index
    %c0_71 = arith.constant 0 : index
    %230 = vector.load %arg9[%229, %c0_71] : memref<64x512xf32, #tpu.memory_space<vmem>>, vector<8x512xf32>
    %231 = arith.truncf %224 : vector<8x128xf32> to vector<8x128xbf16>
    %c0_72 = arith.constant 0 : index
    %c0_73 = arith.constant 0 : index
    %c0_74 = arith.constant 0 : index
    %232 = vector.load %arg4[%c0_72, %c0_73, %c0_74] : memref<2x128x512xbf16, #tpu.memory_space<vmem>>, vector<1x128x512xbf16>
    %233 = vector.shape_cast %232 : vector<1x128x512xbf16> to vector<128x512xbf16>
    %cst_75 = arith.constant dense<0.000000e+00> : vector<8x512xf32>
    %234 = tpu.matmul %231, %233, %cst_75 {dimension_numbers = #tpu.dot_dimension_numbers<[1], [0], [0], [1], [0, 0, 1, 1], [], []>} : vector<8x128xbf16>, vector<128x512xbf16>, vector<8x512xf32> -> vector<8x512xf32>
    %235 = arith.addf %230, %234 : vector<8x512xf32>
    %236 = vector.extract_strided_slice %235 {offsets = [0, 0], sizes = [8, 128], strides = [1, 1]} : vector<8x512xf32> to vector<8x128xf32>
    %237 = arith.negf %236 : vector<8x128xf32>
    %238 = math.exp %237 : vector<8x128xf32>
    %cst_76 = arith.constant 1.000000e+00 : f32
    %239 = vector.broadcast %cst_76 : f32 to vector<8x128xf32>
    %240 = arith.addf %239, %238 : vector<8x128xf32>
    %241 = arith.divf %239, %240 : vector<8x128xf32>
    %242 = vector.extract_strided_slice %235 {offsets = [0, 128], sizes = [8, 128], strides = [1, 1]} : vector<8x512xf32> to vector<8x128xf32>
    %243 = arith.negf %242 : vector<8x128xf32>
    %244 = math.exp %243 : vector<8x128xf32>
    %cst_77 = arith.constant 1.000000e+00 : f32
    %245 = vector.broadcast %cst_77 : f32 to vector<8x128xf32>
    %246 = arith.addf %245, %244 : vector<8x128xf32>
    %247 = arith.divf %245, %246 : vector<8x128xf32>
    %248 = vector.extract_strided_slice %235 {offsets = [0, 256], sizes = [8, 128], strides = [1, 1]} : vector<8x512xf32> to vector<8x128xf32>
    %249 = math.tanh %248 : vector<8x128xf32>
    %250 = vector.extract_strided_slice %235 {offsets = [0, 384], sizes = [8, 128], strides = [1, 1]} : vector<8x512xf32> to vector<8x128xf32>
    %251 = arith.negf %250 : vector<8x128xf32>
    %252 = math.exp %251 : vector<8x128xf32>
    %cst_78 = arith.constant 1.000000e+00 : f32
    %253 = vector.broadcast %cst_78 : f32 to vector<8x128xf32>
    %254 = arith.addf %253, %252 : vector<8x128xf32>
    %255 = arith.divf %253, %254 : vector<8x128xf32>
    %256 = arith.mulf %247, %222 : vector<8x128xf32>
    %257 = arith.mulf %241, %249 : vector<8x128xf32>
    %258 = arith.addf %256, %257 : vector<8x128xf32>
    %259 = math.tanh %258 : vector<8x128xf32>
    %260 = arith.mulf %255, %259 : vector<8x128xf32>
    %261 = arith.index_cast %228 : i32 to index
    %c0_79 = arith.constant 0 : index
    %262 = vector.load %arg10[%261, %c0_79] : memref<64x128xf32, #tpu.memory_space<vmem>>, vector<8x128xf32>
    tpu.vector_store %arg10[%261, %c0_79], %260 {strides = array<i32>} : memref<64x128xf32, #tpu.memory_space<vmem>>, vector<8x128xf32>,
    %c7_i32 = arith.constant 7 : i32
    %c8_i32_80 = arith.constant 8 : i32
    %263 = arith.muli %c7_i32, %c8_i32_80 : i32
    %264 = tpu.assume_multiple %263, 8 : i32
    %265 = arith.index_cast %264 : i32 to index
    %c0_81 = arith.constant 0 : index
    %266 = vector.load %arg9[%265, %c0_81] : memref<64x512xf32, #tpu.memory_space<vmem>>, vector<8x512xf32>
    %267 = arith.truncf %260 : vector<8x128xf32> to vector<8x128xbf16>
    %c0_82 = arith.constant 0 : index
    %c0_83 = arith.constant 0 : index
    %c0_84 = arith.constant 0 : index
    %268 = vector.load %arg4[%c0_82, %c0_83, %c0_84] : memref<2x128x512xbf16, #tpu.memory_space<vmem>>, vector<1x128x512xbf16>
    %269 = vector.shape_cast %268 : vector<1x128x512xbf16> to vector<128x512xbf16>
    %cst_85 = arith.constant dense<0.000000e+00> : vector<8x512xf32>
    %270 = tpu.matmul %267, %269, %cst_85 {dimension_numbers = #tpu.dot_dimension_numbers<[1], [0], [0], [1], [0, 0, 1, 1], [], []>} : vector<8x128xbf16>, vector<128x512xbf16>, vector<8x512xf32> -> vector<8x512xf32>
    %271 = arith.addf %266, %270 : vector<8x512xf32>
    %272 = vector.extract_strided_slice %271 {offsets = [0, 0], sizes = [8, 128], strides = [1, 1]} : vector<8x512xf32> to vector<8x128xf32>
    %273 = arith.negf %272 : vector<8x128xf32>
    %274 = math.exp %273 : vector<8x128xf32>
    %cst_86 = arith.constant 1.000000e+00 : f32
    %275 = vector.broadcast %cst_86 : f32 to vector<8x128xf32>
    %276 = arith.addf %275, %274 : vector<8x128xf32>
    %277 = arith.divf %275, %276 : vector<8x128xf32>
    %278 = vector.extract_strided_slice %271 {offsets = [0, 128], sizes = [8, 128], strides = [1, 1]} : vector<8x512xf32> to vector<8x128xf32>
    %279 = arith.negf %278 : vector<8x128xf32>
    %280 = math.exp %279 : vector<8x128xf32>
    %cst_87 = arith.constant 1.000000e+00 : f32
    %281 = vector.broadcast %cst_87 : f32 to vector<8x128xf32>
    %282 = arith.addf %281, %280 : vector<8x128xf32>
    %283 = arith.divf %281, %282 : vector<8x128xf32>
    %284 = vector.extract_strided_slice %271 {offsets = [0, 256], sizes = [8, 128], strides = [1, 1]} : vector<8x512xf32> to vector<8x128xf32>
    %285 = math.tanh %284 : vector<8x128xf32>
    %286 = vector.extract_strided_slice %271 {offsets = [0, 384], sizes = [8, 128], strides = [1, 1]} : vector<8x512xf32> to vector<8x128xf32>
    %287 = arith.negf %286 : vector<8x128xf32>
    %288 = math.exp %287 : vector<8x128xf32>
    %cst_88 = arith.constant 1.000000e+00 : f32
    %289 = vector.broadcast %cst_88 : f32 to vector<8x128xf32>
    %290 = arith.addf %289, %288 : vector<8x128xf32>
    %291 = arith.divf %289, %290 : vector<8x128xf32>
    %292 = arith.mulf %283, %258 : vector<8x128xf32>
    %293 = arith.mulf %277, %285 : vector<8x128xf32>
    %294 = arith.addf %292, %293 : vector<8x128xf32>
    %295 = math.tanh %294 : vector<8x128xf32>
    %296 = arith.mulf %291, %295 : vector<8x128xf32>
    %297 = arith.index_cast %264 : i32 to index
    %c0_89 = arith.constant 0 : index
    %298 = vector.load %arg10[%297, %c0_89] : memref<64x128xf32, #tpu.memory_space<vmem>>, vector<8x128xf32>
    tpu.vector_store %arg10[%297, %c0_89], %296 {strides = array<i32>} : memref<64x128xf32, #tpu.memory_space<vmem>>, vector<8x128xf32>,
    %c8_i32_90 = arith.constant 8 : i32
    %c1 = arith.constant 1 : index
    %c0_91 = arith.constant 0 : index
    %c0_92 = arith.constant 0 : index
    %299 = vector.load %arg5[%c1, %c0_91, %c0_92] : memref<2x1x512xf32, #tpu.memory_space<vmem>>, vector<1x1x512xf32>
    %300 = vector.shape_cast %299 : vector<1x1x512xf32> to vector<1x512xf32>
    %c0_93 = arith.constant 0 : index
    %c0_94 = arith.constant 0 : index
    %301 = vector.load %arg10[%c0_93, %c0_94] : memref<64x128xf32, #tpu.memory_space<vmem>>, vector<64x128xf32>
    %302 = arith.truncf %301 : vector<64x128xf32> to vector<64x128xbf16>
    %c0_95 = arith.constant 0 : index
    %c0_96 = arith.constant 0 : index
    %c0_97 = arith.constant 0 : index
    %303 = vector.load %arg3[%c0_95, %c0_96, %c0_97] : memref<1x128x512xbf16, #tpu.memory_space<vmem>>, vector<1x128x512xbf16>
    %304 = vector.shape_cast %303 : vector<1x128x512xbf16> to vector<128x512xbf16>
    %cst_98 = arith.constant dense<0.000000e+00> : vector<64x512xf32>
    %305 = tpu.matmul %302, %304, %cst_98 {dimension_numbers = #tpu.dot_dimension_numbers<[1], [0], [0], [1], [0, 0, 1, 1], [], []>} : vector<64x128xbf16>, vector<128x512xbf16>, vector<64x512xf32> -> vector<64x512xf32>
    %306 = vector.broadcast %300 : vector<1x512xf32> to vector<64x512xf32>
    %307 = arith.addf %305, %306 : vector<64x512xf32>
    %c0_99 = arith.constant 0 : index
    %c0_100 = arith.constant 0 : index
    %308 = vector.load %arg9[%c0_99, %c0_100] : memref<64x512xf32, #tpu.memory_space<vmem>>, vector<64x512xf32>
    tpu.vector_store %arg9[%c0_99, %c0_100], %307 {strides = array<i32>} : memref<64x512xf32, #tpu.memory_space<vmem>>, vector<64x512xf32>,
    %cst_101 = arith.constant 0.000000e+00 : f32
    %309 = vector.broadcast %cst_101 : f32 to vector<8x128xf32>
    %cst_102 = arith.constant 0.000000e+00 : f32
    %310 = vector.broadcast %cst_102 : f32 to vector<8x128xf32>
    %c0_i32_103 = arith.constant 0 : i32
    %c8_i32_104 = arith.constant 8 : i32
    %311 = arith.muli %c0_i32_103, %c8_i32_104 : i32
    %312 = tpu.assume_multiple %311, 8 : i32
    %313 = arith.index_cast %312 : i32 to index
    %c0_105 = arith.constant 0 : index
    %314 = vector.load %arg9[%313, %c0_105] : memref<64x512xf32, #tpu.memory_space<vmem>>, vector<8x512xf32>
    %315 = arith.truncf %309 : vector<8x128xf32> to vector<8x128xbf16>
    %c1_106 = arith.constant 1 : index
    %c0_107 = arith.constant 0 : index
    %c0_108 = arith.constant 0 : index
    %316 = vector.load %arg4[%c1_106, %c0_107, %c0_108] : memref<2x128x512xbf16, #tpu.memory_space<vmem>>, vector<1x128x512xbf16>
    %317 = vector.shape_cast %316 : vector<1x128x512xbf16> to vector<128x512xbf16>
    %cst_109 = arith.constant dense<0.000000e+00> : vector<8x512xf32>
    %318 = tpu.matmul %315, %317, %cst_109 {dimension_numbers = #tpu.dot_dimension_numbers<[1], [0], [0], [1], [0, 0, 1, 1], [], []>} : vector<8x128xbf16>, vector<128x512xbf16>, vector<8x512xf32> -> vector<8x512xf32>
    %319 = arith.addf %314, %318 : vector<8x512xf32>
    %320 = vector.extract_strided_slice %319 {offsets = [0, 0], sizes = [8, 128], strides = [1, 1]} : vector<8x512xf32> to vector<8x128xf32>
    %321 = arith.negf %320 : vector<8x128xf32>
    %322 = math.exp %321 : vector<8x128xf32>
    %cst_110 = arith.constant 1.000000e+00 : f32
    %323 = vector.broadcast %cst_110 : f32 to vector<8x128xf32>
    %324 = arith.addf %323, %322 : vector<8x128xf32>
    %325 = arith.divf %323, %324 : vector<8x128xf32>
    %326 = vector.extract_strided_slice %319 {offsets = [0, 128], sizes = [8, 128], strides = [1, 1]} : vector<8x512xf32> to vector<8x128xf32>
    %327 = arith.negf %326 : vector<8x128xf32>
    %328 = math.exp %327 : vector<8x128xf32>
    %cst_111 = arith.constant 1.000000e+00 : f32
    %329 = vector.broadcast %cst_111 : f32 to vector<8x128xf32>
    %330 = arith.addf %329, %328 : vector<8x128xf32>
    %331 = arith.divf %329, %330 : vector<8x128xf32>
    %332 = vector.extract_strided_slice %319 {offsets = [0, 256], sizes = [8, 128], strides = [1, 1]} : vector<8x512xf32> to vector<8x128xf32>
    %333 = math.tanh %332 : vector<8x128xf32>
    %334 = vector.extract_strided_slice %319 {offsets = [0, 384], sizes = [8, 128], strides = [1, 1]} : vector<8x512xf32> to vector<8x128xf32>
    %335 = arith.negf %334 : vector<8x128xf32>
    %336 = math.exp %335 : vector<8x128xf32>
    %cst_112 = arith.constant 1.000000e+00 : f32
    %337 = vector.broadcast %cst_112 : f32 to vector<8x128xf32>
    %338 = arith.addf %337, %336 : vector<8x128xf32>
    %339 = arith.divf %337, %338 : vector<8x128xf32>
    %340 = arith.mulf %331, %310 : vector<8x128xf32>
    %341 = arith.mulf %325, %333 : vector<8x128xf32>
    %342 = arith.addf %340, %341 : vector<8x128xf32>
    %343 = math.tanh %342 : vector<8x128xf32>
    %344 = arith.mulf %339, %343 : vector<8x128xf32>
    %c1_i32_113 = arith.constant 1 : i32
    %c8_i32_114 = arith.constant 8 : i32
    %345 = arith.muli %c1_i32_113, %c8_i32_114 : i32
    %346 = tpu.assume_multiple %345, 8 : i32
    %347 = arith.index_cast %346 : i32 to index
    %c0_115 = arith.constant 0 : index
    %348 = vector.load %arg9[%347, %c0_115] : memref<64x512xf32, #tpu.memory_space<vmem>>, vector<8x512xf32>
    %349 = arith.truncf %344 : vector<8x128xf32> to vector<8x128xbf16>
    %c1_116 = arith.constant 1 : index
    %c0_117 = arith.constant 0 : index
    %c0_118 = arith.constant 0 : index
    %350 = vector.load %arg4[%c1_116, %c0_117, %c0_118] : memref<2x128x512xbf16, #tpu.memory_space<vmem>>, vector<1x128x512xbf16>
    %351 = vector.shape_cast %350 : vector<1x128x512xbf16> to vector<128x512xbf16>
    %cst_119 = arith.constant dense<0.000000e+00> : vector<8x512xf32>
    %352 = tpu.matmul %349, %351, %cst_119 {dimension_numbers = #tpu.dot_dimension_numbers<[1], [0], [0], [1], [0, 0, 1, 1], [], []>} : vector<8x128xbf16>, vector<128x512xbf16>, vector<8x512xf32> -> vector<8x512xf32>
    %353 = arith.addf %348, %352 : vector<8x512xf32>
    %354 = vector.extract_strided_slice %353 {offsets = [0, 0], sizes = [8, 128], strides = [1, 1]} : vector<8x512xf32> to vector<8x128xf32>
    %355 = arith.negf %354 : vector<8x128xf32>
    %356 = math.exp %355 : vector<8x128xf32>
    %cst_120 = arith.constant 1.000000e+00 : f32
    %357 = vector.broadcast %cst_120 : f32 to vector<8x128xf32>
    %358 = arith.addf %357, %356 : vector<8x128xf32>
    %359 = arith.divf %357, %358 : vector<8x128xf32>
    %360 = vector.extract_strided_slice %353 {offsets = [0, 128], sizes = [8, 128], strides = [1, 1]} : vector<8x512xf32> to vector<8x128xf32>
    %361 = arith.negf %360 : vector<8x128xf32>
    %362 = math.exp %361 : vector<8x128xf32>
    %cst_121 = arith.constant 1.000000e+00 : f32
    %363 = vector.broadcast %cst_121 : f32 to vector<8x128xf32>
    %364 = arith.addf %363, %362 : vector<8x128xf32>
    %365 = arith.divf %363, %364 : vector<8x128xf32>
    %366 = vector.extract_strided_slice %353 {offsets = [0, 256], sizes = [8, 128], strides = [1, 1]} : vector<8x512xf32> to vector<8x128xf32>
    %367 = math.tanh %366 : vector<8x128xf32>
    %368 = vector.extract_strided_slice %353 {offsets = [0, 384], sizes = [8, 128], strides = [1, 1]} : vector<8x512xf32> to vector<8x128xf32>
    %369 = arith.negf %368 : vector<8x128xf32>
    %370 = math.exp %369 : vector<8x128xf32>
    %cst_122 = arith.constant 1.000000e+00 : f32
    %371 = vector.broadcast %cst_122 : f32 to vector<8x128xf32>
    %372 = arith.addf %371, %370 : vector<8x128xf32>
    %373 = arith.divf %371, %372 : vector<8x128xf32>
    %374 = arith.mulf %365, %342 : vector<8x128xf32>
    %375 = arith.mulf %359, %367 : vector<8x128xf32>
    %376 = arith.addf %374, %375 : vector<8x128xf32>
    %377 = math.tanh %376 : vector<8x128xf32>
    %378 = arith.mulf %373, %377 : vector<8x128xf32>
    %c2_i32_123 = arith.constant 2 : i32
    %c8_i32_124 = arith.constant 8 : i32
    %379 = arith.muli %c2_i32_123, %c8_i32_124 : i32
    %380 = tpu.assume_multiple %379, 8 : i32
    %381 = arith.index_cast %380 : i32 to index
    %c0_125 = arith.constant 0 : index
    %382 = vector.load %arg9[%381, %c0_125] : memref<64x512xf32, #tpu.memory_space<vmem>>, vector<8x512xf32>
    %383 = arith.truncf %378 : vector<8x128xf32> to vector<8x128xbf16>
    %c1_126 = arith.constant 1 : index
    %c0_127 = arith.constant 0 : index
    %c0_128 = arith.constant 0 : index
    %384 = vector.load %arg4[%c1_126, %c0_127, %c0_128] : memref<2x128x512xbf16, #tpu.memory_space<vmem>>, vector<1x128x512xbf16>
    %385 = vector.shape_cast %384 : vector<1x128x512xbf16> to vector<128x512xbf16>
    %cst_129 = arith.constant dense<0.000000e+00> : vector<8x512xf32>
    %386 = tpu.matmul %383, %385, %cst_129 {dimension_numbers = #tpu.dot_dimension_numbers<[1], [0], [0], [1], [0, 0, 1, 1], [], []>} : vector<8x128xbf16>, vector<128x512xbf16>, vector<8x512xf32> -> vector<8x512xf32>
    %387 = arith.addf %382, %386 : vector<8x512xf32>
    %388 = vector.extract_strided_slice %387 {offsets = [0, 0], sizes = [8, 128], strides = [1, 1]} : vector<8x512xf32> to vector<8x128xf32>
    %389 = arith.negf %388 : vector<8x128xf32>
    %390 = math.exp %389 : vector<8x128xf32>
    %cst_130 = arith.constant 1.000000e+00 : f32
    %391 = vector.broadcast %cst_130 : f32 to vector<8x128xf32>
    %392 = arith.addf %391, %390 : vector<8x128xf32>
    %393 = arith.divf %391, %392 : vector<8x128xf32>
    %394 = vector.extract_strided_slice %387 {offsets = [0, 128], sizes = [8, 128], strides = [1, 1]} : vector<8x512xf32> to vector<8x128xf32>
    %395 = arith.negf %394 : vector<8x128xf32>
    %396 = math.exp %395 : vector<8x128xf32>
    %cst_131 = arith.constant 1.000000e+00 : f32
    %397 = vector.broadcast %cst_131 : f32 to vector<8x128xf32>
    %398 = arith.addf %397, %396 : vector<8x128xf32>
    %399 = arith.divf %397, %398 : vector<8x128xf32>
    %400 = vector.extract_strided_slice %387 {offsets = [0, 256], sizes = [8, 128], strides = [1, 1]} : vector<8x512xf32> to vector<8x128xf32>
    %401 = math.tanh %400 : vector<8x128xf32>
    %402 = vector.extract_strided_slice %387 {offsets = [0, 384], sizes = [8, 128], strides = [1, 1]} : vector<8x512xf32> to vector<8x128xf32>
    %403 = arith.negf %402 : vector<8x128xf32>
    %404 = math.exp %403 : vector<8x128xf32>
    %cst_132 = arith.constant 1.000000e+00 : f32
    %405 = vector.broadcast %cst_132 : f32 to vector<8x128xf32>
    %406 = arith.addf %405, %404 : vector<8x128xf32>
    %407 = arith.divf %405, %406 : vector<8x128xf32>
    %408 = arith.mulf %399, %376 : vector<8x128xf32>
    %409 = arith.mulf %393, %401 : vector<8x128xf32>
    %410 = arith.addf %408, %409 : vector<8x128xf32>
    %411 = math.tanh %410 : vector<8x128xf32>
    %412 = arith.mulf %407, %411 : vector<8x128xf32>
    %c3_i32_133 = arith.constant 3 : i32
    %c8_i32_134 = arith.constant 8 : i32
    %413 = arith.muli %c3_i32_133, %c8_i32_134 : i32
    %414 = tpu.assume_multiple %413, 8 : i32
    %415 = arith.index_cast %414 : i32 to index
    %c0_135 = arith.constant 0 : index
    %416 = vector.load %arg9[%415, %c0_135] : memref<64x512xf32, #tpu.memory_space<vmem>>, vector<8x512xf32>
    %417 = arith.truncf %412 : vector<8x128xf32> to vector<8x128xbf16>
    %c1_136 = arith.constant 1 : index
    %c0_137 = arith.constant 0 : index
    %c0_138 = arith.constant 0 : index
    %418 = vector.load %arg4[%c1_136, %c0_137, %c0_138] : memref<2x128x512xbf16, #tpu.memory_space<vmem>>, vector<1x128x512xbf16>
    %419 = vector.shape_cast %418 : vector<1x128x512xbf16> to vector<128x512xbf16>
    %cst_139 = arith.constant dense<0.000000e+00> : vector<8x512xf32>
    %420 = tpu.matmul %417, %419, %cst_139 {dimension_numbers = #tpu.dot_dimension_numbers<[1], [0], [0], [1], [0, 0, 1, 1], [], []>} : vector<8x128xbf16>, vector<128x512xbf16>, vector<8x512xf32> -> vector<8x512xf32>
    %421 = arith.addf %416, %420 : vector<8x512xf32>
    %422 = vector.extract_strided_slice %421 {offsets = [0, 0], sizes = [8, 128], strides = [1, 1]} : vector<8x512xf32> to vector<8x128xf32>
    %423 = arith.negf %422 : vector<8x128xf32>
    %424 = math.exp %423 : vector<8x128xf32>
    %cst_140 = arith.constant 1.000000e+00 : f32
    %425 = vector.broadcast %cst_140 : f32 to vector<8x128xf32>
    %426 = arith.addf %425, %424 : vector<8x128xf32>
    %427 = arith.divf %425, %426 : vector<8x128xf32>
    %428 = vector.extract_strided_slice %421 {offsets = [0, 128], sizes = [8, 128], strides = [1, 1]} : vector<8x512xf32> to vector<8x128xf32>
    %429 = arith.negf %428 : vector<8x128xf32>
    %430 = math.exp %429 : vector<8x128xf32>
    %cst_141 = arith.constant 1.000000e+00 : f32
    %431 = vector.broadcast %cst_141 : f32 to vector<8x128xf32>
    %432 = arith.addf %431, %430 : vector<8x128xf32>
    %433 = arith.divf %431, %432 : vector<8x128xf32>
    %434 = vector.extract_strided_slice %421 {offsets = [0, 256], sizes = [8, 128], strides = [1, 1]} : vector<8x512xf32> to vector<8x128xf32>
    %435 = math.tanh %434 : vector<8x128xf32>
    %436 = vector.extract_strided_slice %421 {offsets = [0, 384], sizes = [8, 128], strides = [1, 1]} : vector<8x512xf32> to vector<8x128xf32>
    %437 = arith.negf %436 : vector<8x128xf32>
    %438 = math.exp %437 : vector<8x128xf32>
    %cst_142 = arith.constant 1.000000e+00 : f32
    %439 = vector.broadcast %cst_142 : f32 to vector<8x128xf32>
    %440 = arith.addf %439, %438 : vector<8x128xf32>
    %441 = arith.divf %439, %440 : vector<8x128xf32>
    %442 = arith.mulf %433, %410 : vector<8x128xf32>
    %443 = arith.mulf %427, %435 : vector<8x128xf32>
    %444 = arith.addf %442, %443 : vector<8x128xf32>
    %445 = math.tanh %444 : vector<8x128xf32>
    %446 = arith.mulf %441, %445 : vector<8x128xf32>
    %c4_i32_143 = arith.constant 4 : i32
    %c8_i32_144 = arith.constant 8 : i32
    %447 = arith.muli %c4_i32_143, %c8_i32_144 : i32
    %448 = tpu.assume_multiple %447, 8 : i32
    %449 = arith.index_cast %448 : i32 to index
    %c0_145 = arith.constant 0 : index
    %450 = vector.load %arg9[%449, %c0_145] : memref<64x512xf32, #tpu.memory_space<vmem>>, vector<8x512xf32>
    %451 = arith.truncf %446 : vector<8x128xf32> to vector<8x128xbf16>
    %c1_146 = arith.constant 1 : index
    %c0_147 = arith.constant 0 : index
    %c0_148 = arith.constant 0 : index
    %452 = vector.load %arg4[%c1_146, %c0_147, %c0_148] : memref<2x128x512xbf16, #tpu.memory_space<vmem>>, vector<1x128x512xbf16>
    %453 = vector.shape_cast %452 : vector<1x128x512xbf16> to vector<128x512xbf16>
    %cst_149 = arith.constant dense<0.000000e+00> : vector<8x512xf32>
    %454 = tpu.matmul %451, %453, %cst_149 {dimension_numbers = #tpu.dot_dimension_numbers<[1], [0], [0], [1], [0, 0, 1, 1], [], []>} : vector<8x128xbf16>, vector<128x512xbf16>, vector<8x512xf32> -> vector<8x512xf32>
    %455 = arith.addf %450, %454 : vector<8x512xf32>
    %456 = vector.extract_strided_slice %455 {offsets = [0, 0], sizes = [8, 128], strides = [1, 1]} : vector<8x512xf32> to vector<8x128xf32>
    %457 = arith.negf %456 : vector<8x128xf32>
    %458 = math.exp %457 : vector<8x128xf32>
    %cst_150 = arith.constant 1.000000e+00 : f32
    %459 = vector.broadcast %cst_150 : f32 to vector<8x128xf32>
    %460 = arith.addf %459, %458 : vector<8x128xf32>
    %461 = arith.divf %459, %460 : vector<8x128xf32>
    %462 = vector.extract_strided_slice %455 {offsets = [0, 128], sizes = [8, 128], strides = [1, 1]} : vector<8x512xf32> to vector<8x128xf32>
    %463 = arith.negf %462 : vector<8x128xf32>
    %464 = math.exp %463 : vector<8x128xf32>
    %cst_151 = arith.constant 1.000000e+00 : f32
    %465 = vector.broadcast %cst_151 : f32 to vector<8x128xf32>
    %466 = arith.addf %465, %464 : vector<8x128xf32>
    %467 = arith.divf %465, %466 : vector<8x128xf32>
    %468 = vector.extract_strided_slice %455 {offsets = [0, 256], sizes = [8, 128], strides = [1, 1]} : vector<8x512xf32> to vector<8x128xf32>
    %469 = math.tanh %468 : vector<8x128xf32>
    %470 = vector.extract_strided_slice %455 {offsets = [0, 384], sizes = [8, 128], strides = [1, 1]} : vector<8x512xf32> to vector<8x128xf32>
    %471 = arith.negf %470 : vector<8x128xf32>
    %472 = math.exp %471 : vector<8x128xf32>
    %cst_152 = arith.constant 1.000000e+00 : f32
    %473 = vector.broadcast %cst_152 : f32 to vector<8x128xf32>
    %474 = arith.addf %473, %472 : vector<8x128xf32>
    %475 = arith.divf %473, %474 : vector<8x128xf32>
    %476 = arith.mulf %467, %444 : vector<8x128xf32>
    %477 = arith.mulf %461, %469 : vector<8x128xf32>
    %478 = arith.addf %476, %477 : vector<8x128xf32>
    %479 = math.tanh %478 : vector<8x128xf32>
    %480 = arith.mulf %475, %479 : vector<8x128xf32>
    %c5_i32_153 = arith.constant 5 : i32
    %c8_i32_154 = arith.constant 8 : i32
    %481 = arith.muli %c5_i32_153, %c8_i32_154 : i32
    %482 = tpu.assume_multiple %481, 8 : i32
    %483 = arith.index_cast %482 : i32 to index
    %c0_155 = arith.constant 0 : index
    %484 = vector.load %arg9[%483, %c0_155] : memref<64x512xf32, #tpu.memory_space<vmem>>, vector<8x512xf32>
    %485 = arith.truncf %480 : vector<8x128xf32> to vector<8x128xbf16>
    %c1_156 = arith.constant 1 : index
    %c0_157 = arith.constant 0 : index
    %c0_158 = arith.constant 0 : index
    %486 = vector.load %arg4[%c1_156, %c0_157, %c0_158] : memref<2x128x512xbf16, #tpu.memory_space<vmem>>, vector<1x128x512xbf16>
    %487 = vector.shape_cast %486 : vector<1x128x512xbf16> to vector<128x512xbf16>
    %cst_159 = arith.constant dense<0.000000e+00> : vector<8x512xf32>
    %488 = tpu.matmul %485, %487, %cst_159 {dimension_numbers = #tpu.dot_dimension_numbers<[1], [0], [0], [1], [0, 0, 1, 1], [], []>} : vector<8x128xbf16>, vector<128x512xbf16>, vector<8x512xf32> -> vector<8x512xf32>
    %489 = arith.addf %484, %488 : vector<8x512xf32>
    %490 = vector.extract_strided_slice %489 {offsets = [0, 0], sizes = [8, 128], strides = [1, 1]} : vector<8x512xf32> to vector<8x128xf32>
    %491 = arith.negf %490 : vector<8x128xf32>
    %492 = math.exp %491 : vector<8x128xf32>
    %cst_160 = arith.constant 1.000000e+00 : f32
    %493 = vector.broadcast %cst_160 : f32 to vector<8x128xf32>
    %494 = arith.addf %493, %492 : vector<8x128xf32>
    %495 = arith.divf %493, %494 : vector<8x128xf32>
    %496 = vector.extract_strided_slice %489 {offsets = [0, 128], sizes = [8, 128], strides = [1, 1]} : vector<8x512xf32> to vector<8x128xf32>
    %497 = arith.negf %496 : vector<8x128xf32>
    %498 = math.exp %497 : vector<8x128xf32>
    %cst_161 = arith.constant 1.000000e+00 : f32
    %499 = vector.broadcast %cst_161 : f32 to vector<8x128xf32>
    %500 = arith.addf %499, %498 : vector<8x128xf32>
    %501 = arith.divf %499, %500 : vector<8x128xf32>
    %502 = vector.extract_strided_slice %489 {offsets = [0, 256], sizes = [8, 128], strides = [1, 1]} : vector<8x512xf32> to vector<8x128xf32>
    %503 = math.tanh %502 : vector<8x128xf32>
    %504 = vector.extract_strided_slice %489 {offsets = [0, 384], sizes = [8, 128], strides = [1, 1]} : vector<8x512xf32> to vector<8x128xf32>
    %505 = arith.negf %504 : vector<8x128xf32>
    %506 = math.exp %505 : vector<8x128xf32>
    %cst_162 = arith.constant 1.000000e+00 : f32
    %507 = vector.broadcast %cst_162 : f32 to vector<8x128xf32>
    %508 = arith.addf %507, %506 : vector<8x128xf32>
    %509 = arith.divf %507, %508 : vector<8x128xf32>
    %510 = arith.mulf %501, %478 : vector<8x128xf32>
    %511 = arith.mulf %495, %503 : vector<8x128xf32>
    %512 = arith.addf %510, %511 : vector<8x128xf32>
    %513 = math.tanh %512 : vector<8x128xf32>
    %514 = arith.mulf %509, %513 : vector<8x128xf32>
    %c6_i32_163 = arith.constant 6 : i32
    %c8_i32_164 = arith.constant 8 : i32
    %515 = arith.muli %c6_i32_163, %c8_i32_164 : i32
    %516 = tpu.assume_multiple %515, 8 : i32
    %517 = arith.index_cast %516 : i32 to index
    %c0_165 = arith.constant 0 : index
    %518 = vector.load %arg9[%517, %c0_165] : memref<64x512xf32, #tpu.memory_space<vmem>>, vector<8x512xf32>
    %519 = arith.truncf %514 : vector<8x128xf32> to vector<8x128xbf16>
    %c1_166 = arith.constant 1 : index
    %c0_167 = arith.constant 0 : index
    %c0_168 = arith.constant 0 : index
    %520 = vector.load %arg4[%c1_166, %c0_167, %c0_168] : memref<2x128x512xbf16, #tpu.memory_space<vmem>>, vector<1x128x512xbf16>
    %521 = vector.shape_cast %520 : vector<1x128x512xbf16> to vector<128x512xbf16>
    %cst_169 = arith.constant dense<0.000000e+00> : vector<8x512xf32>
    %522 = tpu.matmul %519, %521, %cst_169 {dimension_numbers = #tpu.dot_dimension_numbers<[1], [0], [0], [1], [0, 0, 1, 1], [], []>} : vector<8x128xbf16>, vector<128x512xbf16>, vector<8x512xf32> -> vector<8x512xf32>
    %523 = arith.addf %518, %522 : vector<8x512xf32>
    %524 = vector.extract_strided_slice %523 {offsets = [0, 0], sizes = [8, 128], strides = [1, 1]} : vector<8x512xf32> to vector<8x128xf32>
    %525 = arith.negf %524 : vector<8x128xf32>
    %526 = math.exp %525 : vector<8x128xf32>
    %cst_170 = arith.constant 1.000000e+00 : f32
    %527 = vector.broadcast %cst_170 : f32 to vector<8x128xf32>
    %528 = arith.addf %527, %526 : vector<8x128xf32>
    %529 = arith.divf %527, %528 : vector<8x128xf32>
    %530 = vector.extract_strided_slice %523 {offsets = [0, 128], sizes = [8, 128], strides = [1, 1]} : vector<8x512xf32> to vector<8x128xf32>
    %531 = arith.negf %530 : vector<8x128xf32>
    %532 = math.exp %531 : vector<8x128xf32>
    %cst_171 = arith.constant 1.000000e+00 : f32
    %533 = vector.broadcast %cst_171 : f32 to vector<8x128xf32>
    %534 = arith.addf %533, %532 : vector<8x128xf32>
    %535 = arith.divf %533, %534 : vector<8x128xf32>
    %536 = vector.extract_strided_slice %523 {offsets = [0, 256], sizes = [8, 128], strides = [1, 1]} : vector<8x512xf32> to vector<8x128xf32>
    %537 = math.tanh %536 : vector<8x128xf32>
    %538 = vector.extract_strided_slice %523 {offsets = [0, 384], sizes = [8, 128], strides = [1, 1]} : vector<8x512xf32> to vector<8x128xf32>
    %539 = arith.negf %538 : vector<8x128xf32>
    %540 = math.exp %539 : vector<8x128xf32>
    %cst_172 = arith.constant 1.000000e+00 : f32
    %541 = vector.broadcast %cst_172 : f32 to vector<8x128xf32>
    %542 = arith.addf %541, %540 : vector<8x128xf32>
    %543 = arith.divf %541, %542 : vector<8x128xf32>
    %544 = arith.mulf %535, %512 : vector<8x128xf32>
    %545 = arith.mulf %529, %537 : vector<8x128xf32>
    %546 = arith.addf %544, %545 : vector<8x128xf32>
    %547 = math.tanh %546 : vector<8x128xf32>
    %548 = arith.mulf %543, %547 : vector<8x128xf32>
    %c7_i32_173 = arith.constant 7 : i32
    %c8_i32_174 = arith.constant 8 : i32
    %549 = arith.muli %c7_i32_173, %c8_i32_174 : i32
    %550 = tpu.assume_multiple %549, 8 : i32
    %551 = arith.index_cast %550 : i32 to index
    %c0_175 = arith.constant 0 : index
    %552 = vector.load %arg9[%551, %c0_175] : memref<64x512xf32, #tpu.memory_space<vmem>>, vector<8x512xf32>
    %553 = arith.truncf %548 : vector<8x128xf32> to vector<8x128xbf16>
    %c1_176 = arith.constant 1 : index
    %c0_177 = arith.constant 0 : index
    %c0_178 = arith.constant 0 : index
    %554 = vector.load %arg4[%c1_176, %c0_177, %c0_178] : memref<2x128x512xbf16, #tpu.memory_space<vmem>>, vector<1x128x512xbf16>
    %555 = vector.shape_cast %554 : vector<1x128x512xbf16> to vector<128x512xbf16>
    %cst_179 = arith.constant dense<0.000000e+00> : vector<8x512xf32>
    %556 = tpu.matmul %553, %555, %cst_179 {dimension_numbers = #tpu.dot_dimension_numbers<[1], [0], [0], [1], [0, 0, 1, 1], [], []>} : vector<8x128xbf16>, vector<128x512xbf16>, vector<8x512xf32> -> vector<8x512xf32>
    %557 = arith.addf %552, %556 : vector<8x512xf32>
    %558 = vector.extract_strided_slice %557 {offsets = [0, 0], sizes = [8, 128], strides = [1, 1]} : vector<8x512xf32> to vector<8x128xf32>
    %559 = arith.negf %558 : vector<8x128xf32>
    %560 = math.exp %559 : vector<8x128xf32>
    %cst_180 = arith.constant 1.000000e+00 : f32
    %561 = vector.broadcast %cst_180 : f32 to vector<8x128xf32>
    %562 = arith.addf %561, %560 : vector<8x128xf32>
    %563 = arith.divf %561, %562 : vector<8x128xf32>
    %564 = vector.extract_strided_slice %557 {offsets = [0, 128], sizes = [8, 128], strides = [1, 1]} : vector<8x512xf32> to vector<8x128xf32>
    %565 = arith.negf %564 : vector<8x128xf32>
    %566 = math.exp %565 : vector<8x128xf32>
    %cst_181 = arith.constant 1.000000e+00 : f32
    %567 = vector.broadcast %cst_181 : f32 to vector<8x128xf32>
    %568 = arith.addf %567, %566 : vector<8x128xf32>
    %569 = arith.divf %567, %568 : vector<8x128xf32>
    %570 = vector.extract_strided_slice %557 {offsets = [0, 256], sizes = [8, 128], strides = [1, 1]} : vector<8x512xf32> to vector<8x128xf32>
    %571 = math.tanh %570 : vector<8x128xf32>
    %572 = vector.extract_strided_slice %557 {offsets = [0, 384], sizes = [8, 128], strides = [1, 1]} : vector<8x512xf32> to vector<8x128xf32>
    %573 = arith.negf %572 : vector<8x128xf32>
    %574 = math.exp %573 : vector<8x128xf32>
    %cst_182 = arith.constant 1.000000e+00 : f32
    %575 = vector.broadcast %cst_182 : f32 to vector<8x128xf32>
    %576 = arith.addf %575, %574 : vector<8x128xf32>
    %577 = arith.divf %575, %576 : vector<8x128xf32>
    %578 = arith.mulf %569, %546 : vector<8x128xf32>
    %579 = arith.mulf %563, %571 : vector<8x128xf32>
    %580 = arith.addf %578, %579 : vector<8x128xf32>
    %581 = math.tanh %580 : vector<8x128xf32>
    %582 = arith.mulf %577, %581 : vector<8x128xf32>
    %c8_i32_183 = arith.constant 8 : i32
    %583 = arith.truncf %582 : vector<8x128xf32> to vector<8x128xbf16>
    %c0_184 = arith.constant 0 : index
    %c0_185 = arith.constant 0 : index
    %584 = vector.load %arg6[%c0_184, %c0_185] : memref<128x128xbf16, #tpu.memory_space<vmem>>, vector<128x128xbf16>
    %cst_186 = arith.constant dense<0.000000e+00> : vector<8x128xf32>
    %585 = tpu.matmul %583, %584, %cst_186 {dimension_numbers = #tpu.dot_dimension_numbers<[1], [0], [0], [1], [0, 0, 1, 1], [], []>} : vector<8x128xbf16>, vector<128x128xbf16>, vector<8x128xf32> -> vector<8x128xf32>
    %c0_187 = arith.constant 0 : index
    %c0_188 = arith.constant 0 : index
    %586 = vector.load %arg7[%c0_187, %c0_188] : memref<1x128xf32, #tpu.memory_space<vmem>>, vector<1x128xf32>
    %587 = vector.broadcast %586 : vector<1x128xf32> to vector<8x128xf32>
    %588 = arith.addf %585, %587 : vector<8x128xf32>
    %c0_189 = arith.constant 0 : index
    %c0_190 = arith.constant 0 : index
    %589 = vector.load %arg8[%c0_189, %c0_190] : memref<8x128xf32, #tpu.memory_space<vmem>>, vector<8x128xf32>
    tpu.vector_store %arg8[%c0_189, %c0_190], %588 {strides = array<i32>} : memref<8x128xf32, #tpu.memory_space<vmem>>, vector<8x128xf32>,
    return
  }
  func.func @transform_0(%arg0: i32) -> (i32, i32, i32) {
    %c0_i32 = arith.constant 0 : i32
    %c0_i32_0 = arith.constant 0 : i32
    %c0_i32_1 = arith.constant 0 : i32
    return %arg0, %c0_i32, %c0_i32_0 : i32, i32, i32
  }
  func.func @transform_1(%arg0: i32) -> (i32, i32) {
    %c0_i32 = arith.constant 0 : i32
    %c0_i32_0 = arith.constant 0 : i32
    %c0_i32_1 = arith.constant 0 : i32
    return %c0_i32, %c0_i32_0 : i32, i32
  }
  func.func @transform_2(%arg0: i32) -> (i32, i32, i32) {
    %c0_i32 = arith.constant 0 : i32
    %c0_i32_0 = arith.constant 0 : i32
    %c0_i32_1 = arith.constant 0 : i32
    %c0_i32_2 = arith.constant 0 : i32
    return %c0_i32, %c0_i32_0, %c0_i32_1 : i32, i32, i32
  }
  func.func @transform_3(%arg0: i32) -> (i32, i32, i32) {
    %c0_i32 = arith.constant 0 : i32
    %c0_i32_0 = arith.constant 0 : i32
    %c0_i32_1 = arith.constant 0 : i32
    %c0_i32_2 = arith.constant 0 : i32
    return %c0_i32, %c0_i32_0, %c0_i32_1 : i32, i32, i32
  }
  func.func @transform_4(%arg0: i32) -> (i32, i32, i32) {
    %c0_i32 = arith.constant 0 : i32
    %c0_i32_0 = arith.constant 0 : i32
    %c0_i32_1 = arith.constant 0 : i32
    %c0_i32_2 = arith.constant 0 : i32
    return %c0_i32, %c0_i32_0, %c0_i32_1 : i32, i32, i32
  }
  func.func @transform_5(%arg0: i32) -> (i32, i32) {
    %c0_i32 = arith.constant 0 : i32
    %c0_i32_0 = arith.constant 0 : i32
    %c0_i32_1 = arith.constant 0 : i32
    return %c0_i32, %c0_i32_0 : i32, i32
  }
  func.func @transform_6(%arg0: i32) -> (i32, i32) {
    %c0_i32 = arith.constant 0 : i32
    %c0_i32_0 = arith.constant 0 : i32
    %c0_i32_1 = arith.constant 0 : i32
    return %c0_i32, %c0_i32_0 : i32, i32
  }
  func.func @transform_7(%arg0: i32) -> (i32, i32) {
    %c0_i32 = arith.constant 0 : i32
    %c0_i32_0 = arith.constant 0 : i32
    return %arg0, %c0_i32 : i32, i32
  }
}

</mosaic_0001>

<bundles_post_ra>
// kernel: lstm_model_forward.1
= control target key start
LH: loop header
LB: loop body
LE: loop exit
PB: predicated region body
PF: predicated region fallthrough
CT: control target
= control target key end

     0   :  { %vm89_vm0 = vcmask 130048   ;;  %s9348_s1 = inlined_call_operand.vmem [shape: bf16[16,512], index: 1, kind: input, shape index: {}]   ;;  %s9349_s0 = inlined_call_operand.vmem [shape: bf16[1,64,16], index: 0, kind: input, shape index: {}]   ;;  %s9350_s3 = inlined_call_operand.vmem [shape: bf16[2,128,512], index: 3, kind: input, shape index: {}]   ;;  %s9351_s4 = inlined_call_operand.vmem [shape: f32[2,1,512], index: 4, kind: input, shape index: {}]   ;;  %s9352_s2 = inlined_call_operand.vmem [shape: bf16[1,128,512], index: 2, kind: input, shape index: {}]   ;;  %s9353_s6 = inlined_call_operand.vmem [shape: f32[1,128], index: 6, kind: input, shape index: {}]   ;;  %s9354_s5 = inlined_call_operand.vmem [shape: bf16[128,128], index: 5, kind: input, shape index: {}]   ;;  %s9355_s7 = inlined_call_operand.vmem [shape: f32[8,128], index: 7, kind: output, shape index: {}]  }
   0x1   :  { %v4475_v0 = vld [vmem:[%s9348_s1] sm:$0xf]  ;;  %v5904_v1 = vld [vmem:[%s9348_s1 + $0xc] sm:$0xf0]  ;;  %v4483_v2 = vld [vmem:[%s9348_s1 + $0x8] sm:$0xf] }
   0x2   :  { %v4476_v3 = vor.u32 %v5904_v1, %v4475_v0  ;;  %v5905_v4 = vld [vmem:[%s9348_s1 + $0x14] sm:$0xf0]  ;;  %v5903_v5 = vld [vmem:[%s9348_s1 + $0xc] sm:$0xf]  ;;  %v4485_v6 = vld [vmem:[%s9348_s1 + $0x18] sm:$0xf0] }
   0x3   :  { %v4484_v7 = vor.u32 %v5905_v4, %v4483_v2  ;;  %v4488_v8 = vor.u32 %v5903_v5, %v4485_v6  ;;  %v6555_v9 = vld [vmem:[%s9349_s0] sm:$0xff]  ;;  %v6560_v10 = vld [vmem:[%s9349_s0 + $0x18] sm:$0xff]  ;;  %v4477_v12 = vld [vmem:[%s9348_s1 + $0x10] sm:$0xf0] }
   0x4   :  { %v5902_v11 = vld [vmem:[%s9348_s1 + $0x4] sm:$0xf]  ;;  %109 = vmatpush.bf16.msra.mxu0 %v4476_v3  ;;  %6234 = vmatpush.bf16.msra.mxu1 %v4476_v3  ;;  %v4621_v15 = vld [vmem:[%s9350_s3 + $0xf0] sm:$0xf0]  ;;  %v4619_v16 = vld [vmem:[%s9350_s3 + $0xe0] sm:$0xf] }
   0x5   :  { %v5934_v13 = vld [vmem:[%s9350_s3 + $0xe4] sm:$0xf]  ;;  %167 = vmatpush.bf16.msra.mxu2 %v4484_v7  ;;  %196 = vmatpush.bf16.msra.mxu3 %v4488_v8  ;;  %v4480_v14 = vor.u32 %v5902_v11, %v4477_v12  ;;  %v5936_v17 = vld [vmem:[%s9350_s3 + $0xec] sm:$0xf0]  ;;  %v4603_v20 = vld [vmem:[%s9350_s3 + $0xc0] sm:$0xf] }
   0x6   :  { %v4624_v18 = vor.u32 %v5934_v13, %v4621_v15  ;;  %v4620_v19 = vor.u32 %v5936_v17, %v4619_v16  ;;  %v5932_v21 = vld [vmem:[%s9350_s3 + $0xcc] sm:$0xf0]  ;;  %v5935_v22 = vld [vmem:[%s9350_s3 + $0xec] sm:$0xf]  ;;  %v4629_v23 = vld [vmem:[%s9350_s3 + $0xf8] sm:$0xf0] }
   0x7   :  { %4489 = vmatmul.msk.bf16.vlgmr.msra.gmra.mxu0 %vm89_vm0, %v6555_v9  ;;  %4492 = vmatmul.msk.bf16.vlgmr.msra.gmra.mxu1 %vm89_vm0, %v6560_v10  ;;  %v5930_v24 = vld [vmem:[%s9350_s3 + $0xc4] sm:$0xf]  ;;  %v4605_v25 = vld [vmem:[%s9350_s3 + $0xd0] sm:$0xf0]  ;;  %v4632_v26 = vor.u32 %v5935_v22, %v4629_v23  ;;  %v5931_v28 = vld [vmem:[%s9350_s3 + $0xcc] sm:$0xf]  ;;  %v4604_v30 = vor.u32 %v5932_v21, %v4603_v20 }
   0x8   :  { %138 = vmatpush.bf16.msrb.mxu1 %v4480_v14  ;;  %4497 = vmatmul.msk.bf16.vlgmr.msra.gmra.mxu2 %vm89_vm0, %v6555_v9  ;;  %v4608_v27 = vor.u32 %v5930_v24, %v4605_v25  ;;  %v4613_v29 = vld [vmem:[%s9350_s3 + $0xd8] sm:$0xf0]  ;;  %v4587_v31 = vld [vmem:[%s9350_s3 + $0xa0] sm:$0xf]  ;;  %v4627_v33 = vld [vmem:[%s9350_s3 + $0xe8] sm:$0xf] }
   0x9   :  { %4501 = vmatmul.msk.bf16.vlgmr.msra.gmra.mxu3 %vm89_vm0, %v6555_v9  ;;  %449 = vmatpush.bf16.msrb.mxu0 %v4620_v19  ;;  %v4616_v32 = vor.u32 %v5931_v28, %v4613_v29  ;;  %v5937_v34 = vld [vmem:[%s9350_s3 + $0xf4] sm:$0xf0]  ;;  %v5928_v35 = vld [vmem:[%s9350_s3 + $0xac] sm:$0xf0]  ;;  %v5926_v37 = vld [vmem:[%s9350_s3 + $0xa4] sm:$0xf] }
   0xa   :  { %488 = vmatpush.bf16.msrb.mxu3 %v4632_v26  ;;  %v4628_v36 = vor.u32 %v5937_v34, %v4627_v33  ;;  %v4589_v38 = vld [vmem:[%s9350_s3 + $0xb0] sm:$0xf0]  ;;  %v4611_v40 = vld [vmem:[%s9350_s3 + $0xc8] sm:$0xf]  ;;  %v5933_v41 = vld [vmem:[%s9350_s3 + $0xd4] sm:$0xf0]  ;;  %v4588_v43 = vor.u32 %v5928_v35, %v4587_v31 }
   0xb   :  { %v4592_v39 = vor.u32 %v5926_v37, %v4589_v38  ;;  %v5927_v42 = vld [vmem:[%s9350_s3 + $0xac] sm:$0xf]  ;;  %v4612_v44 = vor.u32 %v5933_v41, %v4611_v40  ;;  %v4597_v45 = vld [vmem:[%s9350_s3 + $0xb8] sm:$0xf0]  ;;  %v5922_v46 = vld [vmem:[%s9350_s3 + $0x84] sm:$0xf] }
   0xc   :  { %462 = vmatpush.bf16.msra.mxu1 %v4624_v18  ;;  %475 = vmatpush.bf16.msrb.mxu2 %v4628_v36  ;;  %v4573_v47 = vld [vmem:[%s9350_s3 + $0x90] sm:$0xf0]  ;;  %v4571_v48 = vld [vmem:[%s9350_s3 + $0x80] sm:$0xf]  ;;  %v5924_v49 = vld [vmem:[%s9350_s3 + $0x8c] sm:$0xf0]  ;;  %v4600_v50 = vor.u32 %v5927_v42, %v4597_v45 }
   0xd   :  { %450 = vmatpush.bf16.msrb.mxu0 %v4604_v30  ;;  %v4595_v51 = vld [vmem:[%s9350_s3 + $0xa8] sm:$0xf]  ;;  %v5929_v52 = vld [vmem:[%s9350_s3 + $0xb4] sm:$0xf0]  ;;  %v4576_v53 = vor.u32 %v5922_v46, %v4573_v47  ;;  %v5923_v55 = vld [vmem:[%s9350_s3 + $0x8c] sm:$0xf]  ;;  %v4572_v56 = vor.u32 %v5924_v49, %v4571_v48 }
   0xe   :  { %489 = vmatpush.bf16.msrb.mxu3 %v4616_v32  ;;  %v4596_v54 = vor.u32 %v5929_v52, %v4595_v51  ;;  %v4579_v57 = vld [vmem:[%s9350_s3 + $0x88] sm:$0xf]  ;;  %v5925_v58 = vld [vmem:[%s9350_s3 + $0x94] sm:$0xf0]  ;;  %v4581_v59 = vld [vmem:[%s9350_s3 + $0x98] sm:$0xf0] }
   0xf   :  { %v6675_v60 = vld [vmem:[%s9349_s0 + $0x8] sm:$0xff]  ;;  %v4555_v61 = vld [vmem:[%s9350_s3 + $0x60] sm:$0xf]  ;;  %v5920_v62 = vld [vmem:[%s9350_s3 + $0x6c] sm:$0xf0]  ;;  %v4584_v63 = vor.u32 %v5923_v55, %v4581_v59  ;;  %v4580_v0 = vor.u32 %v5925_v58, %v4579_v57  ;;  %v6493_v49 = vmov 0  }
  0x10   :  { %463 = vmatpush.bf16.msra.mxu1 %v4608_v27  ;;  %476 = vmatpush.bf16.msrb.mxu2 %v4612_v44  ;;  %v4556_v1 = vor.u32 %v5920_v62, %v4555_v61  ;;  %v4539_v2 = vld [vmem:[%s9350_s3 + $0x40] sm:$0xf]  ;;  %v5916_v3 = vld [vmem:[%s9350_s3 + $0x4c] sm:$0xf0]  ;;  %v4563_v4 = vld [vmem:[%s9350_s3 + $0x68] sm:$0xf] }
  0x11   :  { %451 = vmatpush.bf16.msrb.mxu0 %v4588_v43  ;;  %v5921_v5 = vld [vmem:[%s9350_s3 + $0x74] sm:$0xf0]  ;;  %v5919_v6 = vld [vmem:[%s9350_s3 + $0x6c] sm:$0xf]  ;;  %v4565_v7 = vld [vmem:[%s9350_s3 + $0x78] sm:$0xf0]  ;;  %v4540_v15 = vor.u32 %v5916_v3, %v4539_v2 }
  0x12   :  { %490 = vmatpush.bf16.msrb.mxu3 %v4600_v50  ;;  %v4523_v8 = vld [vmem:[%s9350_s3 + $0x20] sm:$0xf]  ;;  %v4557_v11 = vld [vmem:[%s9350_s3 + $0x70] sm:$0xf0]  ;;  %v4564_v12 = vor.u32 %v5921_v5, %v4563_v4  ;;  %v4568_v13 = vor.u32 %v5919_v6, %v4565_v7  ;;  %v4547_v14 = vld [vmem:[%s9350_s3 + $0x48] sm:$0xf] }
  0x13   :  { %v5917_v17 = vld [vmem:[%s9350_s3 + $0x54] sm:$0xf0]  ;;  %v5915_v18 = vld [vmem:[%s9350_s3 + $0x4c] sm:$0xf]  ;;  %v4549_v19 = vld [vmem:[%s9350_s3 + $0x58] sm:$0xf0] }
  0x14   :  { %464 = vmatpush.bf16.msra.mxu1 %v4592_v39  ;;  %477 = vmatpush.bf16.msrb.mxu2 %v4596_v54  ;;  %v5912_v20 = vld [vmem:[%s9350_s3 + $0x2c] sm:$0xf0]  ;;  %v4552_v21 = vor.u32 %v5915_v18, %v4549_v19  ;;  %v5914_v22 = vld [vmem:[%s9350_s3 + $0x44] sm:$0xf]  ;;  %v4541_v23 = vld [vmem:[%s9350_s3 + $0x50] sm:$0xf0]  ;;  %v4548_v27 = vor.u32 %v5917_v17, %v4547_v14 }
  0x15   :  { %452 = vmatpush.bf16.msrb.mxu0 %v4572_v56  ;;  %v4544_v24 = vor.u32 %v5914_v22, %v4541_v23  ;;  %v5911_v25 = vld [vmem:[%s9350_s3 + $0x2c] sm:$0xf]  ;;  %v4533_v26 = vld [vmem:[%s9350_s3 + $0x38] sm:$0xf0]  ;;  %v4524_v28 = vor.u32 %v5912_v20, %v4523_v8  ;;  %v4531_v29 = vld [vmem:[%s9350_s3 + $0x28] sm:$0xf] }
  0x16   :  { %491 = vmatpush.bf16.msrb.mxu3 %v4584_v63  ;;  %v5913_v30 = vld [vmem:[%s9350_s3 + $0x34] sm:$0xf0]  ;;  %v4507_v31 = vld [vmem:[%s9350_s3] sm:$0xf]  ;;  %v5908_v32 = vld [vmem:[%s9350_s3 + $0xc] sm:$0xf0]  ;;  %v4536_v33 = vor.u32 %v5911_v25, %v4533_v26 }
  0x17   :  { %4490 = vmatmul.msk.bf16.gmra.mxu0 %vm89_vm0, %v6675_v60  ;;  %4493 = vmatmul.msk.bf16.vlgmr.msrb.gmra.mxu1 %vm89_vm0, %v6555_v9  ;;  %v5918_v9 = vld [vmem:[%s9350_s3 + $0x64] sm:$0xf]  ;;  %v4532_v34 = vor.u32 %v5913_v30, %v4531_v29  ;;  %v5907_v35 = vld [vmem:[%s9350_s3 + $0xc] sm:$0xf]  ;;  %v4517_v36 = vld [vmem:[%s9350_s3 + $0x18] sm:$0xf0]  ;;  %v4508_v37 = vor.u32 %v5908_v32, %v4507_v31 }
  0x18   :  { %465 = vmatpush.bf16.msra.mxu1 %v4576_v53  ;;  %4498 = vmatmul.msk.bf16.gmra.mxu2 %vm89_vm0, %v6675_v60  ;;  %v4560_v16 = vor.u32 %v5918_v9, %v4557_v11  ;;  %v4515_v38 = vld [vmem:[%s9350_s3 + $0x8] sm:$0xf]  ;;  %v5909_v39 = vld [vmem:[%s9350_s3 + $0x14] sm:$0xf0]  ;;  %v5900_v40 = vld [vmem:[%s9349_s0 + $0x10] sm:$0xff]  ;;  %v4520_v41 = vor.u32 %v5907_v35, %v4517_v36 }
  0x19   :  { %4502 = vmatmul.msk.bf16.gmra.mxu3 %vm89_vm0, %v6675_v60  ;;  %478 = vmatpush.bf16.msrb.mxu2 %v4580_v0  ;;  %v4516_v42 = vor.u32 %v5909_v39, %v4515_v38  ;;  %v5910_v43 = vld [vmem:[%s9350_s3 + $0x24] sm:$0xf]  ;;  %v4525_v44 = vld [vmem:[%s9350_s3 + $0x30] sm:$0xf0]  ;;  %v27_v50 = vld [vmem:[%s9351_s4] sm:$0xf] }
  0x1a   :  { %453 = vmatpush.bf16.msrb.mxu0 %v4556_v1  ;;  %492 = vmatpush.bf16.msrb.mxu3 %v4568_v13  ;;  %v4528_v45 = vor.u32 %v5910_v43, %v4525_v44  ;;  %v5906_v46 = vld [vmem:[%s9350_s3 + $0x4] sm:$0xf]  ;;  %v4509_v47 = vld [vmem:[%s9350_s3 + $0x10] sm:$0xf0]  ;;  %v6803_v51 = vperm.slane %v27_v50, 0  ;;  %v6825_v63 = vperm.slane %v27_v50, 2 }
  0x1b   :  { %v4512_v48 = vor.u32 %v5906_v46, %v4509_v47  ;;  %v6827_v0 = vperm.slane %v27_v50, 3  ;;  %v6841_v8 = vperm.slane %v27_v50, 1  ;;  %v5968_v39 = vld [vmem:[%s9350_s3 + $0xec] sm:$0xf0]  ;;  %v4758_v44 = vld [vmem:[%s9350_s3 + $0xe8] sm:$0xf] }
  0x1c   :  { %466 = vmatpush.bf16.msra.mxu1 %v4560_v16  ;;  %v5967_v50 = vld [vmem:[%s9350_s3 + $0xec] sm:$0xf] }
  0x1d   :  { %479 = vmatpush.bf16.msrb.mxu2 %v4564_v12 }
  0x1e   :  { %454 = vmatpush.bf16.msrb.mxu0 %v4540_v15  ;;  %493 = vmatpush.bf16.msrb.mxu3 %v4552_v21 }
  0x20   :  { %467 = vmatpush.bf16.msra.mxu1 %v4544_v24 }
  0x21   :  { %480 = vmatpush.bf16.msrb.mxu2 %v4548_v27 }
  0x22   :  { %455 = vmatpush.bf16.msrb.mxu0 %v4524_v28  ;;  %494 = vmatpush.bf16.msrb.mxu3 %v4536_v33 }
  0x24   :  { %468 = vmatpush.bf16.msra.mxu1 %v4528_v45  ;;  %v5969_v45 = vld [vmem:[%s9350_s3 + $0xf4] sm:$0xf0] }
  0x25   :  { %481 = vmatpush.bf16.msrb.mxu2 %v4532_v34 }
  0x26   :  { %456 = vmatpush.bf16.msrb.mxu0 %v4508_v37  ;;  %495 = vmatpush.bf16.msrb.mxu3 %v4520_v41  ;;  %v4750_v37 = vld [vmem:[%s9350_s3 + $0xe0] sm:$0xf]  ;;  %v4752_v41 = vld [vmem:[%s9350_s3 + $0xf0] sm:$0xf0] }
  0x27   :  { %4491 = vmatmul.msk.bf16.gmra.mxu0 %vm89_vm0, %v5900_v40  ;;  %4494 = vmatmul.msk.bf16.gmra.mxu1 %vm89_vm0, %v6675_v60  ;;  %v4751_v43 = vor.u32 %v5968_v39, %v4750_v37  ;;  %v4718_v39 = vld [vmem:[%s9350_s3 + $0xa0] sm:$0xf] }
  0x28   :  { %4499 = vmatmul.msk.bf16.gmra.mxu2 %vm89_vm0, %v5900_v40  ;;  %469 = vmatpush.bf16.msra.mxu1 %v4512_v48  ;;  %v4759_v48 = vor.u32 %v5969_v45, %v4758_v44 }
  0x29   :  { %4503 = vmatmul.msk.bf16.gmra.mxu3 %vm89_vm0, %v5900_v40  ;;  %482 = vmatpush.bf16.msrb.mxu2 %v4516_v42 }
  0x2a   :  { %769 = vmatpush.bf16.msra.mxu0 %v4751_v43 }
  0x2d   :  { %795 = vmatpush.bf16.msra.mxu2 %v4759_v48 }
  0x37   :  { %4495 = vmatmul.msk.bf16.gmra.mxu1 %vm89_vm0, %v5900_v40  ;;  %457 = vmatmul.bf16.vlgmr.msrb.gmra.mxu0 %v6493_v49  ;;  %v5966_v40 = vld [vmem:[%s9350_s3 + $0xe4] sm:$0xf] }
  0x38   :  { %4500 = vmatmul.msk.bf16.gmra.mxu2 %vm89_vm0, %v6560_v10  ;;  %v4755_v47 = vor.u32 %v5966_v40, %v4752_v41  ;;  %v5960_v40 = vld [vmem:[%s9350_s3 + $0xac] sm:$0xf0] }
  0x39   :  { %4504 = vmatmul.msk.bf16.gmra.mxu3 %vm89_vm0, %v6560_v10 }
  0x3a   :  { %782 = vmatpush.bf16.msrb.mxu1 %v4755_v47  ;;  %v4720_v47 = vld [vmem:[%s9350_s3 + $0xb0] sm:$0xf0] }
  0x47   :  { %4496 = vmatmul.msk.bf16.gmra.mxu1 %vm89_vm0, %v6560_v10 }
  0x48   :  { %483 = vmatmul.bf16.vlgmr.msrb.gmra.mxu2 %v6493_v49 }
  0x49   :  { %496 = vmatmul.bf16.vlgmr.msrb.gmra.mxu3 %v6493_v49 }
  0x57   :  { %470 = vmatmul.bf16.vlgmr.msra.gmra.mxu1 %v6493_v49 }
  0x84   :  { %v111_v52 = vpop.f32.mrf.mxu0  ;;  %v126_v53 = vpop.f32.mrf.mxu1 }
  0x85   :  { %v6806_v54 = vadd.f32 %v126_v53, %v6803_v51  ;;  %v112_v21 = vadd.f32 %v111_v52, %v6803_v51  ;;  %v4760_v52 = vld [vmem:[%s9350_s3 + $0xf8] sm:$0xf0] }
  0x8b   :  { %v6808_v55 = vpop.f32.mrf.mxu2 }
  0x8c   :  { %v6810_v10 = vpop.f32.mrf.mxu3  ;;  %v6812_v56 = vpop.f32.mrf.mxu0 }
  0x8d   :  { %v6814_v57 = vpop.f32.mrf.mxu1  ;;  %v199_v41 = vadd.f32 %v6810_v10, %v6827_v0 }
  0x93   :  { %v6816_v58 = vpop.f32.mrf.mxu2 }
  0x94   :  { %v6818_v59 = vpop.f32.mrf.mxu3  ;;  %v116_v60 = vpop.f32.mrf.mxu0 }
  0x95   :  { %v6821_v61 = vadd.f32 %v116_v60, %v6803_v51  ;;  %v6823_v62 = vpop.f32.mrf.mxu1  ;;  %v4763_v60 = vor.u32 %v5967_v50, %v4760_v52  ;;  %v4726_v52 = vld [vmem:[%s9350_s3 + $0xa8] sm:$0xf] }
  0x97   :  { %808 = vmatpush.bf16.msra.mxu3 %v4763_v60  ;;  %v5961_v60 = vld [vmem:[%s9350_s3 + $0xb4] sm:$0xf0] }
  0x9b   :  { %v174_v1 = vpop.f32.mrf.mxu2 }
  0x9c   :  { %v6830_v2 = vadd.f32 %v174_v1, %v6825_v63  ;;  %v203_v3 = vpop.f32.mrf.mxu3  ;;  %v6832_v4 = vpop.f32.mrf.mxu0  ;;  %v4734_v1 = vld [vmem:[%s9350_s3 + $0xc0] sm:$0xf] }
  0x9d   :  { %v6835_v5 = vadd.f32 %v203_v3, %v6827_v0  ;;  %v6837_v6 = vpop.f32.mrf.mxu1  ;;  %v5964_v3 = vld [vmem:[%s9350_s3 + $0xcc] sm:$0xf0] }
  0xa3   :  { %v6839_v7 = vpop.f32.mrf.mxu2 }
  0xa4   :  { %v6843_v9 = vpop.f32.mrf.mxu3  ;;  %v121_v11 = vpop.f32.mrf.mxu0 }
  0xa5   :  { %v6846_v12 = vadd.f32 %v121_v11, %v6803_v51  ;;  %v145_v13 = vpop.f32.mrf.mxu1  ;;  %v5962_v11 = vld [vmem:[%s9350_s3 + $0xc4] sm:$0xf] }
  0xa6   :  { %v6849_v14 = vadd.f32 %v145_v13, %v6841_v8  ;;  %v4735_v13 = vor.u32 %v5964_v3, %v4734_v1  ;;  %v5959_v1 = vld [vmem:[%s9350_s3 + $0xac] sm:$0xf] }
  0xa8   :  { %770 = vmatpush.bf16.msra.mxu0 %v4735_v13 }
  0xab   :  { %v179_v15 = vpop.f32.mrf.mxu2 }
  0xac   :  { %v6852_v16 = vadd.f32 %v179_v15, %v6825_v63  ;;  %v208_v17 = vpop.f32.mrf.mxu3  ;;  %v6854_v18 = vpop.f32.mrf.mxu0  ;;  %v4736_v15 = vld [vmem:[%s9350_s3 + $0xd0] sm:$0xf0] }
  0xad   :  { %v6857_v19 = vadd.f32 %v208_v17, %v6827_v0  ;;  %v6859_v20 = vpop.f32.mrf.mxu1  ;;  %v4742_v17 = vld [vmem:[%s9350_s3 + $0xc8] sm:$0xf] }
  0xb3   :  { %v6862_v22 = vpop.f32.mrf.mxu2 }
  0xb4   :  { %v6864_v23 = vpop.f32.mrf.mxu3  ;;  %v458_v24 = vpop.f32.mrf.mxu0 }
  0xb5   :  { %v150_v25 = vpop.f32.mrf.mxu1  ;;  %v501_v26 = vadd.f32 %v458_v24, %v112_v21  ;;  %v5965_v21 = vld [vmem:[%s9350_s3 + $0xd4] sm:$0xf0] }
  0xb6   :  { %v6867_v27 = vadd.f32 %v150_v25, %v6841_v8  ;;  %v4739_v25 = vor.u32 %v5962_v11, %v4736_v15  ;;  %v4727_v15 = vor.u32 %v5961_v60, %v4726_v52  ;;  %v5950_v52 = vld [vmem:[%s9350_s3 + $0x64] sm:$0xf] }
  0xb7   :  { %v4633_v28 = vmul.f32 -1.442695, %v501_v26  ;;  %v4743_v26 = vor.u32 %v5965_v21, %v4742_v17  ;;  %v4728_v17 = vld [vmem:[%s9350_s3 + $0xb8] sm:$0xf0] }
  0xb8   :  { %783 = vmatpush.bf16.msrb.mxu1 %v4739_v25  ;;  %v4731_v21 = vor.u32 %v5959_v1, %v4728_v17  ;;  %v4702_v25 = vld [vmem:[%s9350_s3 + $0x80] sm:$0xf]  ;;  %v4688_v1 = vld [vmem:[%s9350_s3 + $0x70] sm:$0xf0]  ;;  %v141_v17 = vadd.f32 %v6823_v62, %v6841_v8 }
  0xb9   :  { %6237 = vpow2.f32 %v4633_v28  ;;  %v5963_v28 = vld [vmem:[%s9350_s3 + $0xcc] sm:$0xf]  ;;  %796 = vmatpush.bf16.msra.mxu2 %v4743_v26  ;;  %v5956_v26 = vld [vmem:[%s9350_s3 + $0x8c] sm:$0xf0]  ;;  %v4670_v62 = vld [vmem:[%s9350_s3 + $0x40] sm:$0xf] }
  0xbb   :  { %v184_v29 = vpop.f32.mrf.mxu2 }
  0xbc   :  { %v6870_v30 = vadd.f32 %v184_v29, %v6825_v63  ;;  %v213_v31 = vpop.f32.mrf.mxu3  ;;  %v460_v32 = vpop.f32.mrf.mxu0  ;;  %v4744_v29 = vld [vmem:[%s9350_s3 + $0xd8] sm:$0xf0] }
  0xbd   :  { %v6873_v33 = vadd.f32 %v213_v31, %v6827_v0  ;;  %v6875_v34 = vpop.f32.mrf.mxu1  ;;  %v4747_v32 = vor.u32 %v5963_v28, %v4744_v29  ;;  %v5954_v28 = vld [vmem:[%s9350_s3 + $0x84] sm:$0xf]  ;;  %797 = vmatpush.bf16.msra.mxu2 %v4727_v15 }
  0xbf   :  { %v6238_v35 = vpop.eup %6237  ;;  %809 = vmatpush.bf16.msra.mxu3 %v4747_v32 }
  0xc0   :  { %v6877_v36 = vadd.f32 1.0, %v6238_v35  ;;  %v170_v35 = vadd.f32 %v6808_v55, %v6825_v63  ;;  %v4719_v55 = vor.u32 %v5960_v40, %v4718_v39  ;;  %v4704_v39 = vld [vmem:[%s9350_s3 + $0x90] sm:$0xf0]  ;;  %v4710_v40 = vld [vmem:[%s9350_s3 + $0x88] sm:$0xf] }
  0xc2   :  { %6239 = vrcp.f32 %v6877_v36  ;;  %v518_v37 = vand.u32 2147483647, %v6877_v36  ;;  %v520_v45 = vand.u32 2147483648, %v6877_v36  ;;  %vm514_vm2 = vweird.f32 %v6877_v36  ;;  %771 = vmatpush.bf16.msra.mxu0 %v4719_v55 }
  0xc3   :  { %v6883_v38 = vpop.f32.mrf.mxu2  ;;  %810 = vmatpush.bf16.msra.mxu3 %v4731_v21 }
  0xc4   :  { %v6894_v42 = vpop.f32.mrf.mxu3  ;;  %vm6983_vm4 = vcmp.eq.f32.partialorder %v518_v37, 8.507059e+37  ;;  %v521_v32 = vor.u32 1.1754944e-38, %v520_v45  ;;  %v5957_v37 = vld [vmem:[%s9350_s3 + $0x94] sm:$0xf0] }
  0xc5   :  { %v155_v46 = vpop.f32.mrf.mxu1 }
  0xc6   :  { %v6909_v53 = vadd.f32 %v155_v46, %v6841_v8  ;;  %v5958_v46 = vld [vmem:[%s9350_s3 + $0xa4] sm:$0xf] }
  0xc7   :  { %v4723_v10 = vor.u32 %v5958_v46, %v4720_v47  ;;  %v4711_v46 = vor.u32 %v5957_v37, %v4710_v40  ;;  %v4672_v37 = vld [vmem:[%s9350_s3 + $0x50] sm:$0xf0] }
  0xc8   :  { %v6240_v24 = vpop.eup %6239 }
  0xc9   :  { %v510_v31 = vmul.f32 %v6240_v24, %v6877_v36  ;;  %vm515_vm1 = vweird.f32 %v6240_v24  ;;  %784 = vmatpush.bf16.msrb.mxu1 %v4723_v10  ;;  %v5952_v10 = vld [vmem:[%s9350_s3 + $0x6c] sm:$0xf0]  ;;  %798 = vmatpush.bf16.msra.mxu2 %v4711_v46 }
  0xca   :  { %vm6979_vm3 = vmor %vm514_vm2, %vm515_vm1 }
  0xcb   :  { %v511_v43 = vsub.f32 1.0, %v510_v31  ;;  %v484_v44 = vpop.f32.mrf.mxu2 }
  0xcc   :  { %v503_v48 = vadd.f32 %v484_v44, %v170_v35  ;;  %v497_v50 = vpop.f32.mrf.mxu3  ;;  %v4703_v35 = vor.u32 %v5956_v26, %v4702_v25  ;;  %v4712_v44 = vld [vmem:[%s9350_s3 + $0x98] sm:$0xf0]  ;;  %v4691_v25 = vor.u32 %v5950_v52, %v4688_v1  ;;  %v5944_v52 = vld [vmem:[%s9350_s3 + $0x2c] sm:$0xf0]  ;;  %v4662_v1 = vld [vmem:[%s9350_s3 + $0x28] sm:$0xf] }
  0xcd   :  { %v512_v3 = vmul.f32 %v6240_v24, %v511_v43  ;;  %v504_v11 = vadd.f32 %v497_v50, %v199_v41  ;;  %v6963_v13 = vpop.f32.mrf.mxu1  ;;  %v4707_v41 = vor.u32 %v5954_v28, %v4704_v39  ;;  %v5955_v43 = vld [vmem:[%s9350_s3 + $0x8c] sm:$0xf]  ;;  %v4686_v50 = vld [vmem:[%s9350_s3 + $0x60] sm:$0xf]  ;;  %v5946_v39 = vld [vmem:[%s9350_s3 + $0x44] sm:$0xf] }
  0xce   :  { %6241 = vtanh.f32 %v503_v48  ;;  %v4715_v47 = vor.u32 %v5955_v43, %v4712_v44  ;;  %772 = vmatpush.bf16.msra.mxu0 %v4703_v35  ;;  %v4687_v60 = vor.u32 %v5952_v10, %v4686_v50  ;;  %v5951_v28 = vld [vmem:[%s9350_s3 + $0x6c] sm:$0xf]  ;;  %v5948_v35 = vld [vmem:[%s9350_s3 + $0x4c] sm:$0xf0]  ;;  %v4678_v43 = vld [vmem:[%s9350_s3 + $0x48] sm:$0xf] }
  0xcf   :  { %v513_v29 = vadd.f32 %v6240_v24, %v512_v3  ;;  %v4635_v55 = vmul.f32 -1.442695, %v504_v11  ;;  %785 = vmatpush.bf16.msrb.mxu1 %v4707_v41  ;;  %v4694_v3 = vld [vmem:[%s9350_s3 + $0x68] sm:$0xf]  ;;  %v5953_v11 = vld [vmem:[%s9350_s3 + $0x74] sm:$0xf0]  ;;  %v4671_v41 = vor.u32 %v5948_v35, %v4670_v62 }
  0xd0   :  { %811 = vmatpush.bf16.msra.mxu3 %v4715_v47  ;;  %v4695_v26 = vor.u32 %v5953_v11, %v4694_v3  ;;  %v5949_v44 = vld [vmem:[%s9350_s3 + $0x54] sm:$0xf0]  ;;  %v4680_v47 = vld [vmem:[%s9350_s3 + $0x58] sm:$0xf0]  ;;  %v4640_v62 = vld [vmem:[%s9350_s3 + $0x10] sm:$0xf0] }
  0xd1   :  { %v517_v45 = vsel %vm6979_vm3, %v6240_v24, %v513_v29  ;;  %v4696_v29 = vld [vmem:[%s9350_s3 + $0x78] sm:$0xf0]  ;;  %6243 = vpow2.f32 %v4635_v55  ;;  %v4679_v46 = vor.u32 %v5949_v44, %v4678_v43  ;;  %v5947_v55 = vld [vmem:[%s9350_s3 + $0x4c] sm:$0xf]  ;;  %v5945_v11 = vld [vmem:[%s9350_s3 + $0x34] sm:$0xf0] }
  0xd2   :  { %v522_v48 = vsel %vm6983_vm4, %v521_v32, %v517_v45  ;;  %v4699_v32 = vor.u32 %v5951_v28, %v4696_v29  ;;  %773 = vmatpush.bf16.msra.mxu0 %v4687_v60  ;;  %799 = vmatpush.bf16.msra.mxu2 %v4695_v26  ;;  %v4675_v45 = vor.u32 %v5946_v39, %v4672_v37  ;;  %v4656_v60 = vld [vmem:[%s9350_s3 + $0x30] sm:$0xf0]  ;;  %v4638_v26 = vld [vmem:[%s9350_s3] sm:$0xf]  ;;  %v5940_v28 = vld [vmem:[%s9350_s3 + $0xc] sm:$0xf0] }
  0xd3   :  { %v486_v24 = vpop.f32.mrf.mxu2  ;;  %786 = vmatpush.bf16.msrb.mxu1 %v4691_v25  ;;  %v4683_v10 = vor.u32 %v5947_v55, %v4680_v47  ;;  %v4663_v25 = vor.u32 %v5945_v11, %v4662_v1  ;;  %v5938_v29 = vld [vmem:[%s9350_s3 + $0x4] sm:$0xf]  ;;  %v4646_v35 = vld [vmem:[%s9350_s3 + $0x8] sm:$0xf]  ;;  %v5941_v39 = vld [vmem:[%s9350_s3 + $0x14] sm:$0xf0]  ;;  %v4639_v43 = vor.u32 %v5940_v28, %v4638_v26 }
  0xd4   :  { %v6242_v15 = vpop.eup %6241  ;;  %v499_v21 = vpop.f32.mrf.mxu3  ;;  %812 = vmatpush.bf16.msra.mxu3 %v4699_v32  ;;  %v5942_v24 = vld [vmem:[%s9350_s3 + $0x24] sm:$0xf]  ;;  %v4648_v37 = vld [vmem:[%s9350_s3 + $0x18] sm:$0xf0] }
  0xd5   :  { %v7032_v31 = vmul.f32 %v6242_v15, %v522_v48  ;;  %v471_v36 = vpop.f32.mrf.mxu1  ;;  %v4654_v48 = vld [vmem:[%s9350_s3 + $0x20] sm:$0xf]  ;;  %v5943_v15 = vld [vmem:[%s9350_s3 + $0x2c] sm:$0xf]  ;;  %v4659_v21 = vor.u32 %v5942_v24, %v4656_v60 }
  0xd6   :  { %v502_v40 = vadd.f32 %v471_v36, %v141_v17  ;;  %774 = vmatpush.bf16.msra.mxu0 %v4671_v41  ;;  %v4655_v3 = vor.u32 %v5944_v52, %v4654_v48  ;;  %v4664_v17 = vld [vmem:[%s9350_s3 + $0x38] sm:$0xf0]  ;;  %800 = vmatpush.bf16.msra.mxu2 %v4679_v46  ;;  %v5939_v41 = vld [vmem:[%s9350_s3 + $0xc] sm:$0xf]  ;;  %v4647_v46 = vor.u32 %v5941_v39, %v4646_v35 }
  0xd7   :  { %787 = vmatpush.bf16.msrb.mxu1 %v4675_v45  ;;  %v6244_v36 = vpop.eup %6243  ;;  %v4667_v32 = vor.u32 %v5943_v15, %v4664_v17  ;;  %v4643_v45 = vor.u32 %v5938_v29, %v4640_v62  ;;  %v4651_v55 = vor.u32 %v5939_v41, %v4648_v37 }
  0xd8   :  { %v4634_v50 = vmul.f32 -1.442695, %v502_v40  ;;  %813 = vmatpush.bf16.msra.mxu3 %v4683_v10  ;;  %v547_v44 = vadd.f32 1.0, %v6244_v36 }
  0xda   :  { %6245 = vpow2.f32 %v4634_v50  ;;  %775 = vmatpush.bf16.msra.mxu0 %v4655_v3  ;;  %801 = vmatpush.bf16.msra.mxu2 %v4663_v25  ;;  %v559_v62 = vand.u32 2147483648, %v547_v44  ;;  %vm553_vm10 = vweird.f32 %v547_v44  ;;  %v557_v35 = vand.u32 2147483647, %v547_v44 }
  0xdb   :  { %788 = vmatpush.bf16.msrb.mxu1 %v4659_v21  ;;  %6247 = vrcp.f32 %v547_v44 }
  0xdc   :  { %814 = vmatpush.bf16.msra.mxu3 %v4667_v32  ;;  %vm558_vm12 = vcmp.eq.f32.partialorder %v557_v35, 8.507059e+37 }
  0xdd   :  { %v473_v40 = vpop.f32.mrf.mxu1 }
  0xde   :  { %776 = vmatpush.bf16.msra.mxu0 %v4639_v43  ;;  %802 = vmatpush.bf16.msra.mxu2 %v4647_v46  ;;  %v560_v40 = vor.u32 1.1754944e-38, %v559_v62  ;;  %v5998_v46 = vld [vmem:[%s9350_s3 + $0xe4] sm:$0xf]  ;;  %v4875_v62 = vld [vmem:[%s9350_s3 + $0xd8] sm:$0xf0] }
  0xdf   :  { %789 = vmatpush.bf16.msrb.mxu1 %v4643_v45 }
  0xe0   :  { %v6246_v47 = vpop.eup %6245  ;;  %815 = vmatpush.bf16.msra.mxu3 %v4651_v55 }
  0xe1   :  { %v527_v48 = vadd.f32 1.0, %v6246_v47  ;;  %v6248_v50 = vpop.eup %6247  ;;  %v4883_v47 = vld [vmem:[%s9350_s3 + $0xf0] sm:$0xf0] }
  0xe2   :  { %v549_v24 = vmul.f32 %v6248_v50, %v547_v44  ;;  %vm554_vm9 = vweird.f32 %v6248_v50  ;;  %v6000_v44 = vld [vmem:[%s9350_s3 + $0xec] sm:$0xf0] }
  0xe3   :  { %6249 = vrcp.f32 %v527_v48  ;;  %v539_v1 = vand.u32 2147483648, %v527_v48  ;;  %v537_v11 = vand.u32 2147483647, %v527_v48  ;;  %vm533_vm6 = vweird.f32 %v527_v48  ;;  %vm555_vm11 = vmor %vm553_vm10, %vm554_vm9 }
  0xe4   :  { %v550_v15 = vsub.f32 1.0, %v549_v24  ;;  %v5999_v24 = vld [vmem:[%s9350_s3 + $0xec] sm:$0xf] }
  0xe5   :  { %v540_v21 = vor.u32 1.1754944e-38, %v539_v1  ;;  %vm538_vm8 = vcmp.eq.f32.partialorder %v537_v11, 8.507059e+37  ;;  %v5996_v11 = vld [vmem:[%s9350_s3 + $0xcc] sm:$0xf0] }
  0xe6   :  { %v551_v26 = vmul.f32 %v6248_v50, %v550_v15  ;;  %v5994_v15 = vld [vmem:[%s9350_s3 + $0xc4] sm:$0xf] }
  0xe8   :  { %v552_v32 = vadd.f32 %v6248_v50, %v551_v26  ;;  %v5997_v26 = vld [vmem:[%s9350_s3 + $0xd4] sm:$0xf0] }
  0xe9   :  { %v6250_v10 = vpop.eup %6249 }
  0xea   :  { %v529_v52 = vmul.f32 %v6250_v10, %v527_v48  ;;  %vm534_vm5 = vweird.f32 %v6250_v10  ;;  %v556_v39 = vsel %vm555_vm11, %v6248_v50, %v552_v32  ;;  %v4889_v48 = vld [vmem:[%s9350_s3 + $0xe8] sm:$0xf]  ;;  %v6001_v50 = vld [vmem:[%s9350_s3 + $0xf4] sm:$0xf0]  ;;  %v5995_v32 = vld [vmem:[%s9350_s3 + $0xcc] sm:$0xf] }
  0xeb   :  { %vm535_vm7 = vmor %vm533_vm6, %vm534_vm5  ;;  %v561_v37 = vsel %vm558_vm12, %v560_v40, %v556_v39  ;;  %v4878_v35 = vor.u32 %v5995_v32, %v4875_v62  ;;  %v4849_v39 = vld [vmem:[%s9350_s3 + $0xa0] sm:$0xf]  ;;  %v5992_v40 = vld [vmem:[%s9350_s3 + $0xac] sm:$0xf0] }
  0xec   :  { %v530_v60 = vsub.f32 1.0, %v529_v52  ;;  %v4890_v52 = vor.u32 %v6001_v50, %v4889_v48  ;;  %v4859_v48 = vld [vmem:[%s9350_s3 + $0xb8] sm:$0xf0] }
  0xee   :  { %v531_v3 = vmul.f32 %v6250_v10, %v530_v60  ;;  %v4891_v60 = vld [vmem:[%s9350_s3 + $0xf8] sm:$0xf0]  ;;  %1116 = vmatpush.bf16.msrb.mxu2 %v4890_v52  ;;  %v5988_v52 = vld [vmem:[%s9350_s3 + $0x8c] sm:$0xf0] }
  0xef   :  { %v4894_v1 = vor.u32 %v5999_v24, %v4891_v60  ;;  %v5986_v24 = vld [vmem:[%s9350_s3 + $0x84] sm:$0xf] }
  0xf0   :  { %v532_v17 = vadd.f32 %v6250_v10, %v531_v3  ;;  %v4865_v3 = vld [vmem:[%s9350_s3 + $0xc0] sm:$0xf] }
  0xf1   :  { %1129 = vmatpush.bf16.msrb.mxu3 %v4894_v1  ;;  %v4835_v1 = vld [vmem:[%s9350_s3 + $0x90] sm:$0xf0] }
  0xf2   :  { %v536_v25 = vsel %vm535_vm7, %v6250_v10, %v532_v17  ;;  %v4886_v10 = vor.u32 %v5998_v46, %v4883_v47  ;;  %v4866_v17 = vor.u32 %v5996_v11, %v4865_v3  ;;  %v5991_v47 = vld [vmem:[%s9350_s3 + $0xac] sm:$0xf]  ;;  %v4841_v3 = vld [vmem:[%s9350_s3 + $0x88] sm:$0xf]  ;;  %v5989_v11 = vld [vmem:[%s9350_s3 + $0x94] sm:$0xf0] }
  0xf3   :  { %v541_v28 = vsel %vm538_vm8, %v540_v21, %v536_v25  ;;  %v4867_v21 = vld [vmem:[%s9350_s3 + $0xd0] sm:$0xf0]  ;;  %v4873_v25 = vld [vmem:[%s9350_s3 + $0xc8] sm:$0xf]  ;;  %v4862_v50 = vor.u32 %v5991_v47, %v4859_v48  ;;  %v4827_v47 = vld [vmem:[%s9350_s3 + $0x78] sm:$0xf0] }
  0xf4   :  { %v563_v29 = vmul.f32 0.0, %v541_v28  ;;  %1103 = vmatpush.bf16.msra.mxu1 %v4886_v10  ;;  %v4870_v28 = vor.u32 %v5994_v15, %v4867_v21  ;;  %v4833_v10 = vld [vmem:[%s9350_s3 + $0x80] sm:$0xf]  ;;  %v4838_v15 = vor.u32 %v5986_v24, %v4835_v1  ;;  %v5987_v21 = vld [vmem:[%s9350_s3 + $0x8c] sm:$0xf] }
  0xf5   :  { %1130 = vmatpush.bf16.msrb.mxu3 %v4878_v35  ;;  %v4834_v60 = vor.u32 %v5988_v52, %v4833_v10  ;;  %v4817_v35 = vld [vmem:[%s9350_s3 + $0x60] sm:$0xf]  ;;  %v5980_v24 = vld [vmem:[%s9350_s3 + $0x4c] sm:$0xf0] }
  0xf6   :  { %v7107_v36 = vadd.f32 %v7032_v31, %v563_v29  ;;  %v4881_v31 = vld [vmem:[%s9350_s3 + $0xe0] sm:$0xf]  ;;  %v4874_v29 = vor.u32 %v5997_v26, %v4873_v25  ;;  %v4843_v25 = vld [vmem:[%s9350_s3 + $0x98] sm:$0xf0]  ;;  %v114_v26 = vadd.f32 %v6812_v56, %v6803_v51  ;;  %v5982_v56 = vld [vmem:[%s9350_s3 + $0x64] sm:$0xf] }
  0xf7   :  { %v4882_v55 = vor.u32 %v6000_v44, %v4881_v31  ;;  %v4857_v31 = vld [vmem:[%s9350_s3 + $0xa8] sm:$0xf]  ;;  %v5993_v44 = vld [vmem:[%s9350_s3 + $0xb4] sm:$0xf0]  ;;  %v4801_v52 = vld [vmem:[%s9350_s3 + $0x40] sm:$0xf] }
  0xf8   :  { %6251 = vtanh.f32 %v7107_v36  ;;  %1104 = vmatpush.bf16.msra.mxu1 %v4870_v28  ;;  %1117 = vmatpush.bf16.msrb.mxu2 %v4874_v29  ;;  %v143_v28 = vadd.f32 %v6837_v6, %v6841_v8  ;;  %v4846_v29 = vor.u32 %v5987_v21, %v4843_v25  ;;  %v4802_v1 = vor.u32 %v5980_v24, %v4801_v52  ;;  %v5970_v24 = vld [vmem:[%s9350_s3 + $0x4] sm:$0xf] }
  0xf9   :  { %1090 = vmatpush.bf16.msrb.mxu0 %v4882_v55  ;;  %v4858_v55 = vor.u32 %v5993_v44, %v4857_v31  ;;  %1131 = vmatpush.bf16.msrb.mxu3 %v4862_v50  ;;  %v5985_v31 = vld [vmem:[%s9350_s3 + $0x74] sm:$0xf0] }
  0xfc   :  { %1118 = vmatpush.bf16.msrb.mxu2 %v4858_v55  ;;  %v5983_v55 = vld [vmem:[%s9350_s3 + $0x6c] sm:$0xf] }
  0xfd   :  { %1091 = vmatpush.bf16.msrb.mxu0 %v4866_v17  ;;  %v4842_v17 = vor.u32 %v5989_v11, %v4841_v3  ;;  %1132 = vmatpush.bf16.msrb.mxu3 %v4846_v29  ;;  %v4830_v10 = vor.u32 %v5983_v55, %v4827_v47  ;;  %v4803_v3 = vld [vmem:[%s9350_s3 + $0x50] sm:$0xf0]  ;;  %v4809_v11 = vld [vmem:[%s9350_s3 + $0x48] sm:$0xf]  ;;  %v4785_v29 = vld [vmem:[%s9350_s3 + $0x20] sm:$0xf] }
  0xfe   :  { %v6252_v41 = vpop.eup %6251  ;;  %v4795_v47 = vld [vmem:[%s9350_s3 + $0x38] sm:$0xf0] }
  0xff   :  { %v7110_v43 = vmul.f32 %v6252_v41, %v561_v37  ;;  %v5990_v41 = vld [vmem:[%s9350_s3 + $0xa4] sm:$0xf]  ;;  %v4850_v37 = vor.u32 %v5992_v40, %v4849_v39  ;;  %v5984_v39 = vld [vmem:[%s9350_s3 + $0x6c] sm:$0xf0] }
 0x100   :  { %1119 = vmatpush.bf16.msrb.mxu2 %v4842_v17  ;;  %v201_v17 = vadd.f32 %v6818_v59, %v6827_v0  ;;  %v5976_v59 = vld [vmem:[%s9350_s3 + $0x2c] sm:$0xf0] }
 0x101   :  { %v576_v45 = vpack.c.bf16 %v7110_v43, %v7110_v43  ;;  %1092 = vmatpush.bf16.msrb.mxu0 %v4850_v37  ;;  %v4819_v37 = vld [vmem:[%s9350_s3 + $0x70] sm:$0xf0]  ;;  %1133 = vmatpush.bf16.msrb.mxu3 %v4830_v10 }
 0x102   :  { %v4822_v44 = vor.u32 %v5982_v56, %v4819_v37  ;;  %v4787_v56 = vld [vmem:[%s9350_s3 + $0x30] sm:$0xf0]  ;;  %v4786_v37 = vor.u32 %v5976_v59, %v4785_v29  ;;  %v4779_v29 = vld [vmem:[%s9350_s3 + $0x18] sm:$0xf0] }
 0x103   :  { %777 = vmatmul.bf16.vlgmr.msra.gmra.mxu0 %v576_v45  ;;  %790 = vmatmul.bf16.vlgmr.msrb.gmra.mxu1 %v576_v45 }
 0x104   :  { %803 = vmatmul.bf16.vlgmr.msra.gmra.mxu2 %v576_v45  ;;  %816 = vmatmul.bf16.vlgmr.msra.gmra.mxu3 %v576_v45  ;;  %v4851_v45 = vld [vmem:[%s9350_s3 + $0xb0] sm:$0xf0] }
 0x105   :  { %v4854_v46 = vor.u32 %v5990_v41, %v4851_v45  ;;  %1093 = vmatpush.bf16.msrb.mxu0 %v4834_v60  ;;  %v4818_v41 = vor.u32 %v5984_v39, %v4817_v35  ;;  %v4825_v45 = vld [vmem:[%s9350_s3 + $0x68] sm:$0xf]  ;;  %v5978_v60 = vld [vmem:[%s9350_s3 + $0x44] sm:$0xf] }
 0x106   :  { %v4806_v21 = vor.u32 %v5978_v60, %v4803_v3  ;;  %v5974_v39 = vld [vmem:[%s9350_s3 + $0x24] sm:$0xf]  ;;  %v4771_v60 = vld [vmem:[%s9350_s3 + $0x10] sm:$0xf0] }
 0x107   :  { %1105 = vmatpush.bf16.msra.mxu1 %v4854_v46  ;;  %v4826_v46 = vor.u32 %v5985_v31, %v4825_v45  ;;  %v4793_v45 = vld [vmem:[%s9350_s3 + $0x28] sm:$0xf]  ;;  %v5977_v31 = vld [vmem:[%s9350_s3 + $0x34] sm:$0xf0] }
 0x108   :  { %v4794_v55 = vor.u32 %v5977_v31, %v4793_v45 }
 0x109   :  { %1094 = vmatpush.bf16.msrb.mxu0 %v4818_v41  ;;  %1120 = vmatpush.bf16.msrb.mxu2 %v4826_v46  ;;  %v4790_v46 = vor.u32 %v5974_v39, %v4787_v56 }
 0x10b   :  { %1106 = vmatpush.bf16.msra.mxu1 %v4838_v15  ;;  %v5981_v15 = vld [vmem:[%s9350_s3 + $0x54] sm:$0xf0] }
 0x10c   :  { %v4810_v25 = vor.u32 %v5981_v15, %v4809_v11  ;;  %v4777_v11 = vld [vmem:[%s9350_s3 + $0x8] sm:$0xf]  ;;  %v5973_v15 = vld [vmem:[%s9350_s3 + $0x14] sm:$0xf0] }
 0x10d   :  { %1095 = vmatpush.bf16.msrb.mxu0 %v4802_v1 }
 0x10e   :  { %1121 = vmatpush.bf16.msrb.mxu2 %v4810_v25 }
 0x10f   :  { %1107 = vmatpush.bf16.msra.mxu1 %v4822_v44  ;;  %v5975_v44 = vld [vmem:[%s9350_s3 + $0x2c] sm:$0xf] }
 0x110   :  { %v4798_v52 = vor.u32 %v5975_v44, %v4795_v47 }
 0x111   :  { %1096 = vmatpush.bf16.msrb.mxu0 %v4786_v37 }
 0x112   :  { %1122 = vmatpush.bf16.msrb.mxu2 %v4794_v55 }
 0x113   :  { %1108 = vmatpush.bf16.msra.mxu1 %v4806_v21 }
 0x117   :  { %1109 = vmatpush.bf16.msra.mxu1 %v4790_v46 }
 0x180   :  { %v778_v32 = vpop.f32.mrf.mxu0  ;;  %v791_v62 = vpop.f32.mrf.mxu1 }
 0x181   :  { %v821_v40 = vadd.f32 %v778_v32, %v114_v26  ;;  %v822_v6 = vadd.f32 %v791_v62, %v143_v28  ;;  %v5979_v26 = vld [vmem:[%s9350_s3 + $0x4c] sm:$0xf]  ;;  %v4811_v28 = vld [vmem:[%s9350_s3 + $0x58] sm:$0xf0] }
 0x182   :  { %v4814_v35 = vor.u32 %v5979_v26, %v4811_v28  ;;  %v4774_v26 = vor.u32 %v5970_v24, %v4771_v60  ;;  %v4778_v28 = vor.u32 %v5973_v15, %v4777_v11 }
 0x183   :  { %v4764_v48 = vmul.f32 -1.442695, %v821_v40  ;;  %v4765_v50 = vmul.f32 -1.442695, %v822_v6 }
 0x184   :  { %1134 = vmatpush.bf16.msrb.mxu3 %v4814_v35  ;;  %1110 = vmatpush.bf16.msra.mxu1 %v4774_v26 }
 0x185   :  { %6253 = vpow2.f32 %v4764_v48  ;;  %v4769_v48 = vld [vmem:[%s9350_s3] sm:$0xf]  ;;  %1123 = vmatpush.bf16.msrb.mxu2 %v4778_v28 }
 0x186   :  { %6255 = vpow2.f32 %v4765_v50  ;;  %v5972_v50 = vld [vmem:[%s9350_s3 + $0xc] sm:$0xf0] }
 0x187   :  { %v804_v32 = vpop.f32.mrf.mxu2  ;;  %v817_v62 = vpop.f32.mrf.mxu3  ;;  %v4770_v3 = vor.u32 %v5972_v50, %v4769_v48 }
 0x188   :  { %v824_v40 = vadd.f32 %v817_v62, %v201_v17  ;;  %v780_v6 = vpop.f32.mrf.mxu0  ;;  %v793_v41 = vpop.f32.mrf.mxu1  ;;  %v5971_v17 = vld [vmem:[%s9350_s3 + $0xc] sm:$0xf]  ;;  %1135 = vmatpush.bf16.msrb.mxu3 %v4798_v52 }
 0x189   :  { %v4782_v35 = vor.u32 %v5971_v17, %v4779_v29  ;;  %1097 = vmatpush.bf16.msrb.mxu0 %v4770_v3 }
 0x18a   :  { %v4766_v10 = vmul.f32 -1.442695, %v824_v40  ;;  %v172_v40 = vadd.f32 %v6816_v58, %v6825_v63 }
 0x18b   :  { %v6254_v1 = vpop.eup %6253 }
 0x18c   :  { %v6256_v21 = vpop.eup %6255  ;;  %v828_v25 = vadd.f32 1.0, %v6254_v1  ;;  %6257 = vpow2.f32 %v4766_v10  ;;  %1136 = vmatpush.bf16.msrb.mxu3 %v4782_v35  ;;  %v823_v37 = vadd.f32 %v804_v32, %v172_v40 }
 0x18d   :  { %v847_v62 = vadd.f32 1.0, %v6256_v21 }
 0x18e   :  { %6259 = vrcp.f32 %v828_v25  ;;  %v840_v47 = vand.u32 2147483648, %v828_v25  ;;  %v838_v10 = vand.u32 2147483647, %v828_v25  ;;  %vm834_vm15 = vweird.f32 %v828_v25 }
 0x18f   :  { %6261 = vrcp.f32 %v847_v62  ;;  %v806_v59 = vpop.f32.mrf.mxu2  ;;  %v819_v39 = vpop.f32.mrf.mxu3  ;;  %v859_v48 = vand.u32 2147483648, %v847_v62  ;;  %v857_v24 = vand.u32 2147483647, %v847_v62  ;;  %vm853_vm0 = vweird.f32 %v847_v62 }
 0x190   :  { %v841_v32 = vor.u32 1.1754944e-38, %v840_v47  ;;  %vm839_vm3 = vcmp.eq.f32.partialorder %v838_v10, 8.507059e+37  ;;  %v6033_v10 = vld [vmem:[%s9350_s3 + $0xf4] sm:$0xf0] }
 0x191   :  { %v860_v11 = vor.u32 1.1754944e-38, %v859_v48  ;;  %vm858_vm4 = vcmp.eq.f32.partialorder %v857_v24, 8.507059e+37  ;;  %v5014_v48 = vld [vmem:[%s9350_s3 + $0xf0] sm:$0xf0] }
 0x192   :  { %v6258_v56 = vpop.eup %6257 }
 0x193   :  { %v867_v6 = vadd.f32 1.0, %v6258_v56 }
 0x194   :  { %v6260_v41 = vpop.eup %6259 }
 0x195   :  { %v6262_v45 = vpop.eup %6261  ;;  %v830_v31 = vmul.f32 %v6260_v41, %v828_v25  ;;  %6263 = vrcp.f32 %v867_v6  ;;  %vm835_vm13 = vweird.f32 %v6260_v41  ;;  %v879_v56 = vand.u32 2147483648, %v867_v6 }
 0x196   :  { %v849_v44 = vmul.f32 %v6262_v45, %v847_v62  ;;  %6265 = vtanh.f32 %v823_v37  ;;  %vm854_vm14 = vweird.f32 %v6262_v45  ;;  %vm836_vm1 = vmor %vm834_vm15, %vm835_vm13  ;;  %vm873_vm6 = vweird.f32 %v867_v6 }
 0x197   :  { %v831_v46 = vsub.f32 1.0, %v830_v31  ;;  %vm855_vm2 = vmor %vm853_vm0, %vm854_vm14  ;;  %v877_v40 = vand.u32 2147483647, %v867_v6  ;;  %v880_v37 = vor.u32 1.1754944e-38, %v879_v56  ;;  %v6024_v56 = vld [vmem:[%s9350_s3 + $0xac] sm:$0xf0] }
 0x198   :  { %v850_v55 = vsub.f32 1.0, %v849_v44 }
 0x199   :  { %v832_v50 = vmul.f32 %v6260_v41, %v831_v46  ;;  %vm878_vm8 = vcmp.eq.f32.partialorder %v877_v40, 8.507059e+37  ;;  %v5012_v46 = vld [vmem:[%s9350_s3 + $0xe0] sm:$0xf]  ;;  %v6022_v40 = vld [vmem:[%s9350_s3 + $0xa4] sm:$0xf] }
 0x19a   :  { %v851_v52 = vmul.f32 %v6262_v45, %v850_v55  ;;  %v6030_v55 = vld [vmem:[%s9350_s3 + $0xe4] sm:$0xf] }
 0x19b   :  { %v6264_v60 = vpop.eup %6263  ;;  %v833_v58 = vadd.f32 %v6260_v41, %v832_v50  ;;  %v5020_v50 = vld [vmem:[%s9350_s3 + $0xe8] sm:$0xf] }
 0x19c   :  { %v852_v1 = vadd.f32 %v6262_v45, %v851_v52  ;;  %v869_v3 = vmul.f32 %v6264_v60, %v867_v6  ;;  %v6266_v17 = vpop.eup %6265  ;;  %vm874_vm5 = vweird.f32 %v6264_v60  ;;  %v6032_v6 = vld [vmem:[%s9350_s3 + $0xec] sm:$0xf0]  ;;  %v5017_v52 = vor.u32 %v6030_v55, %v5014_v48  ;;  %v4990_v55 = vld [vmem:[%s9350_s3 + $0xb8] sm:$0xf0]  ;;  %v4964_v48 = vld [vmem:[%s9350_s3 + $0x80] sm:$0xf] }
 0x19d   :  { %v837_v15 = vsel %vm836_vm1, %v6260_v41, %v833_v58  ;;  %vm875_vm7 = vmor %vm873_vm6, %vm874_vm5  ;;  %v5013_v47 = vor.u32 %v6032_v6, %v5012_v46  ;;  %v5021_v24 = vor.u32 %v6033_v10, %v5020_v50  ;;  %v5022_v58 = vld [vmem:[%s9350_s3 + $0xf8] sm:$0xf0]  ;;  %v6023_v6 = vld [vmem:[%s9350_s3 + $0xac] sm:$0xf] }
 0x19e   :  { %v842_v21 = vsel %vm839_vm3, %v841_v32, %v837_v15  ;;  %v856_v26 = vsel %vm855_vm2, %v6262_v45, %v852_v1  ;;  %v870_v28 = vsub.f32 1.0, %v869_v3  ;;  %1424 = vmatpush.bf16.msrb.mxu1 %v5017_v52  ;;  %v4996_v1 = vld [vmem:[%s9350_s3 + $0xc0] sm:$0xf]  ;;  %v6028_v3 = vld [vmem:[%s9350_s3 + $0xcc] sm:$0xf0] }
 0x19f   :  { %v861_v29 = vsel %vm858_vm4, %v860_v11, %v856_v26  ;;  %v884_v35 = vmul.f32 %v6266_v17, %v842_v21  ;;  %1411 = vmatpush.bf16.msra.mxu0 %v5013_v47  ;;  %1437 = vmatpush.bf16.msra.mxu2 %v5021_v24  ;;  %v6026_v11 = vld [vmem:[%s9350_s3 + $0xc4] sm:$0xf]  ;;  %v4997_v15 = vor.u32 %v6028_v3, %v4996_v1  ;;  %v4998_v17 = vld [vmem:[%s9350_s3 + $0xd0] sm:$0xf0]  ;;  %v5004_v21 = vld [vmem:[%s9350_s3 + $0xc8] sm:$0xf] }
 0x1a0   :  { %v883_v59 = vmul.f32 %v861_v29, %v7107_v36  ;;  %v871_v39 = vmul.f32 %v6264_v60, %v870_v28  ;;  %v6029_v26 = vld [vmem:[%s9350_s3 + $0xd4] sm:$0xf0]  ;;  %v5001_v28 = vor.u32 %v6026_v11, %v4998_v17  ;;  %v4993_v47 = vor.u32 %v6023_v6, %v4990_v55  ;;  %v6020_v50 = vld [vmem:[%s9350_s3 + $0x8c] sm:$0xf0]  ;;  %v6018_v10 = vld [vmem:[%s9350_s3 + $0x84] sm:$0xf] }
 0x1a1   :  { %v5005_v29 = vor.u32 %v6029_v26, %v5004_v21  ;;  %v4965_v52 = vor.u32 %v6020_v50, %v4964_v48  ;;  %v4966_v24 = vld [vmem:[%s9350_s3 + $0x90] sm:$0xf0]  ;;  %v6019_v3 = vld [vmem:[%s9350_s3 + $0x8c] sm:$0xf]  ;;  %v4974_v11 = vld [vmem:[%s9350_s3 + $0x98] sm:$0xf0] }
 0x1a2   :  { %v7315_v25 = vadd.f32 %v884_v35, %v883_v59  ;;  %v872_v62 = vadd.f32 %v6264_v60, %v871_v39  ;;  %v6027_v35 = vld [vmem:[%s9350_s3 + $0xcc] sm:$0xf]  ;;  %v5006_v59 = vld [vmem:[%s9350_s3 + $0xd8] sm:$0xf0]  ;;  %1425 = vmatpush.bf16.msrb.mxu1 %v5001_v28  ;;  %v4948_v17 = vld [vmem:[%s9350_s3 + $0x60] sm:$0xf] }
 0x1a3   :  { %1412 = vmatpush.bf16.msra.mxu0 %v4997_v15  ;;  %v5009_v39 = vor.u32 %v6027_v35, %v5006_v59  ;;  %1438 = vmatpush.bf16.msra.mxu2 %v5005_v29  ;;  %v4977_v15 = vor.u32 %v6019_v3, %v4974_v11  ;;  %v6016_v21 = vld [vmem:[%s9350_s3 + $0x6c] sm:$0xf0]  ;;  %v6014_v26 = vld [vmem:[%s9350_s3 + $0x64] sm:$0xf]  ;;  %v4950_v59 = vld [vmem:[%s9350_s3 + $0x70] sm:$0xf0] }
 0x1a4   :  { %6267 = vtanh.f32 %v7315_v25  ;;  %v876_v41 = vsel %vm875_vm7, %v6264_v60, %v872_v62  ;;  %v6031_v60 = vld [vmem:[%s9350_s3 + $0xec] sm:$0xf]  ;;  %v4980_v62 = vld [vmem:[%s9350_s3 + $0xa0] sm:$0xf]  ;;  %v4949_v35 = vor.u32 %v6016_v21, %v4948_v17  ;;  %v6010_v55 = vld [vmem:[%s9350_s3 + $0x44] sm:$0xf] }
 0x1a5   :  { %v881_v31 = vsel %vm878_vm8, %v880_v37, %v876_v41  ;;  %v5025_v32 = vor.u32 %v6031_v60, %v5022_v58  ;;  %v4981_v41 = vor.u32 %v6024_v56, %v4980_v62  ;;  %v4982_v37 = vld [vmem:[%s9350_s3 + $0xb0] sm:$0xf0]  ;;  %v4972_v60 = vld [vmem:[%s9350_s3 + $0x88] sm:$0xf]  ;;  %v6021_v58 = vld [vmem:[%s9350_s3 + $0x94] sm:$0xf0] }
 0x1a6   :  { %v4973_v1 = vor.u32 %v6021_v58, %v4972_v60  ;;  %v6017_v62 = vld [vmem:[%s9350_s3 + $0x74] sm:$0xf0]  ;;  %v4942_v58 = vld [vmem:[%s9350_s3 + $0x58] sm:$0xf0]  ;;  %v6006_v21 = vld [vmem:[%s9350_s3 + $0x24] sm:$0xf] }
 0x1a7   :  { %1450 = vmatpush.bf16.msra.mxu3 %v5025_v32  ;;  %1413 = vmatpush.bf16.msra.mxu0 %v4981_v41  ;;  %v4969_v32 = vor.u32 %v6018_v10, %v4966_v24  ;;  %v4953_v41 = vor.u32 %v6014_v26, %v4950_v59  ;;  %v4940_v10 = vld [vmem:[%s9350_s3 + $0x48] sm:$0xf]  ;;  %v6011_v24 = vld [vmem:[%s9350_s3 + $0x4c] sm:$0xf]  ;;  %v4918_v26 = vld [vmem:[%s9350_s3 + $0x30] sm:$0xf0] }
 0x1aa   :  { %v6268_v45 = vpop.eup %6267 }
 0x1ab   :  { %v7318_v44 = vmul.f32 %v6268_v45, %v881_v31  ;;  %1451 = vmatpush.bf16.msra.mxu3 %v5009_v39  ;;  %v4988_v45 = vld [vmem:[%s9350_s3 + $0xa8] sm:$0xf]  ;;  %v6025_v31 = vld [vmem:[%s9350_s3 + $0xb4] sm:$0xf0]  ;;  %1414 = vmatpush.bf16.msra.mxu0 %v4965_v52 }
 0x1ac   :  { %v4989_v46 = vor.u32 %v6025_v31, %v4988_v45  ;;  %v4956_v39 = vld [vmem:[%s9350_s3 + $0x68] sm:$0xf]  ;;  %v6015_v45 = vld [vmem:[%s9350_s3 + $0x6c] sm:$0xf]  ;;  %v4958_v31 = vld [vmem:[%s9350_s3 + $0x78] sm:$0xf0] }
 0x1ad   :  { %v897_v36 = vpack.c.bf16 %v7318_v44, %v7318_v44  ;;  %v6013_v52 = vld [vmem:[%s9350_s3 + $0x54] sm:$0xf0] }
 0x1ae   :  { %1439 = vmatpush.bf16.msra.mxu2 %v4989_v46  ;;  %v4941_v60 = vor.u32 %v6013_v52, %v4940_v10 }
 0x1af   :  { %1098 = vmatmul.bf16.vlgmr.msrb.gmra.mxu0 %v897_v36  ;;  %1111 = vmatmul.bf16.vlgmr.msra.gmra.mxu1 %v897_v36 }
 0x1b0   :  { %1124 = vmatmul.bf16.vlgmr.msrb.gmra.mxu2 %v897_v36  ;;  %1137 = vmatmul.bf16.vlgmr.msrb.gmra.mxu3 %v897_v36  ;;  %v4985_v36 = vor.u32 %v6022_v40, %v4982_v37  ;;  %v4957_v37 = vor.u32 %v6017_v62, %v4956_v39  ;;  %v4921_v39 = vor.u32 %v6006_v21, %v4918_v26  ;;  %v6009_v62 = vld [vmem:[%s9350_s3 + $0x34] sm:$0xf0] }
 0x1b1   :  { %1452 = vmatpush.bf16.msra.mxu3 %v4993_v47  ;;  %1415 = vmatpush.bf16.msra.mxu0 %v4949_v35  ;;  %v4934_v47 = vld [vmem:[%s9350_s3 + $0x50] sm:$0xf0] }
 0x1b2   :  { %1426 = vmatpush.bf16.msrb.mxu1 %v4985_v36  ;;  %1440 = vmatpush.bf16.msra.mxu2 %v4973_v1  ;;  %v4961_v36 = vor.u32 %v6015_v45, %v4958_v31  ;;  %v4937_v50 = vor.u32 %v6010_v55, %v4934_v47  ;;  %v6008_v1 = vld [vmem:[%s9350_s3 + $0x2c] sm:$0xf0]  ;;  %v6002_v31 = vld [vmem:[%s9350_s3 + $0x4] sm:$0xf]  ;;  %v6005_v47 = vld [vmem:[%s9350_s3 + $0x14] sm:$0xf0] }
 0x1b3   :  { %v6004_v45 = vld [vmem:[%s9350_s3 + $0xc] sm:$0xf0] }
 0x1b5   :  { %1453 = vmatpush.bf16.msra.mxu3 %v4977_v15  ;;  %v4945_v15 = vor.u32 %v6011_v24, %v4942_v58 }
 0x1b6   :  { %1427 = vmatpush.bf16.msrb.mxu1 %v4969_v32  ;;  %1441 = vmatpush.bf16.msra.mxu2 %v4957_v37  ;;  %v4916_v32 = vld [vmem:[%s9350_s3 + $0x20] sm:$0xf] }
 0x1b7   :  { %v4917_v17 = vor.u32 %v6008_v1, %v4916_v32 }
 0x1b9   :  { %1454 = vmatpush.bf16.msra.mxu3 %v4961_v36 }
 0x1ba   :  { %1428 = vmatpush.bf16.msrb.mxu1 %v4953_v41  ;;  %1442 = vmatpush.bf16.msra.mxu2 %v4941_v60 }
 0x1bd   :  { %1455 = vmatpush.bf16.msra.mxu3 %v4945_v15 }
 0x1be   :  { %1429 = vmatpush.bf16.msrb.mxu1 %v4937_v50  ;;  %v4910_v50 = vld [vmem:[%s9350_s3 + $0x18] sm:$0xf0] }
 0x1c2   :  { %1430 = vmatpush.bf16.msrb.mxu1 %v4921_v39 }
 0x22c   :  { %v1099_v28 = vpop.f32.mrf.mxu0  ;;  %v1112_v29 = vpop.f32.mrf.mxu1 }
 0x22d   :  { %v1142_v56 = vadd.f32 %v1099_v28, %v6821_v61  ;;  %v1143_v40 = vadd.f32 %v1112_v29, %v6849_v14  ;;  %v4932_v61 = vld [vmem:[%s9350_s3 + $0x40] sm:$0xf]  ;;  %v6012_v14 = vld [vmem:[%s9350_s3 + $0x4c] sm:$0xf0]  ;;  %v4924_v28 = vld [vmem:[%s9350_s3 + $0x28] sm:$0xf] }
 0x22e   :  { %v4933_v48 = vor.u32 %v6012_v14, %v4932_v61  ;;  %v4925_v41 = vor.u32 %v6009_v62, %v4924_v28 }
 0x22f   :  { %v4895_v46 = vmul.f32 -1.442695, %v1142_v56  ;;  %v4896_v6 = vmul.f32 -1.442695, %v1143_v40  ;;  %v6007_v56 = vld [vmem:[%s9350_s3 + $0x2c] sm:$0xf] }
 0x230   :  { %1416 = vmatpush.bf16.msra.mxu0 %v4933_v48  ;;  %v4926_v40 = vld [vmem:[%s9350_s3 + $0x38] sm:$0xf0]  ;;  %v6003_v48 = vld [vmem:[%s9350_s3 + $0xc] sm:$0xf]  ;;  %1443 = vmatpush.bf16.msra.mxu2 %v4925_v41 }
 0x231   :  { %6269 = vpow2.f32 %v4895_v46  ;;  %v4929_v37 = vor.u32 %v6007_v56, %v4926_v40  ;;  %v4902_v46 = vld [vmem:[%s9350_s3 + $0x10] sm:$0xf0]  ;;  %v4913_v58 = vor.u32 %v6003_v48, %v4910_v50 }
 0x232   :  { %6271 = vpow2.f32 %v4896_v6  ;;  %v4908_v6 = vld [vmem:[%s9350_s3 + $0x8] sm:$0xf]  ;;  %v4905_v55 = vor.u32 %v6002_v31, %v4902_v46 }
 0x233   :  { %v1125_v3 = vpop.f32.mrf.mxu2  ;;  %v1138_v11 = vpop.f32.mrf.mxu3  ;;  %v4909_v24 = vor.u32 %v6005_v47, %v4908_v6  ;;  %1456 = vmatpush.bf16.msra.mxu3 %v4929_v37 }
 0x234   :  { %v1145_v29 = vadd.f32 %v1138_v11, %v6835_v5  ;;  %v1101_v35 = vpop.f32.mrf.mxu0  ;;  %v1114_v59 = vpop.f32.mrf.mxu1  ;;  %v4900_v5 = vld [vmem:[%s9350_s3] sm:$0xf]  ;;  %1417 = vmatpush.bf16.msra.mxu0 %v4917_v17  ;;  %1431 = vmatpush.bf16.msrb.mxu1 %v4905_v55  ;;  %v1144_v21 = vadd.f32 %v1125_v3, %v6830_v2 }
 0x235   :  { %v4901_v14 = vor.u32 %v6004_v45, %v4900_v5  ;;  %1444 = vmatpush.bf16.msra.mxu2 %v4909_v24 }
 0x236   :  { %v4897_v36 = vmul.f32 -1.442695, %v1145_v29 }
 0x237   :  { %v6270_v61 = vpop.eup %6269  ;;  %1457 = vmatpush.bf16.msra.mxu3 %v4913_v58 }
 0x238   :  { %v6272_v10 = vpop.eup %6271  ;;  %v1149_v52 = vadd.f32 1.0, %v6270_v61  ;;  %6273 = vpow2.f32 %v4897_v36  ;;  %1418 = vmatpush.bf16.msra.mxu0 %v4901_v14 }
 0x239   :  { %v1168_v60 = vadd.f32 1.0, %v6272_v10 }
 0x23a   :  { %6275 = vrcp.f32 %v1149_v52  ;;  %v1161_v39 = vand.u32 2147483648, %v1149_v52  ;;  %v1159_v40 = vand.u32 2147483647, %v1149_v52  ;;  %vm1155_vm11 = vweird.f32 %v1149_v52 }
 0x23b   :  { %6277 = vrcp.f32 %v1168_v60  ;;  %v1127_v32 = vpop.f32.mrf.mxu2  ;;  %v1140_v1 = vpop.f32.mrf.mxu3  ;;  %v1180_v62 = vand.u32 2147483648, %v1168_v60  ;;  %v1178_v37 = vand.u32 2147483647, %v1168_v60  ;;  %vm1174_vm12 = vweird.f32 %v1168_v60 }
 0x23c   :  { %v1162_v2 = vor.u32 1.1754944e-38, %v1161_v39  ;;  %vm1160_vm15 = vcmp.eq.f32.partialorder %v1159_v40, 8.507059e+37  ;;  %v6065_v39 = vld [vmem:[%s9350_s3 + $0xf4] sm:$0xf0]  ;;  %v6063_v40 = vld [vmem:[%s9350_s3 + $0xec] sm:$0xf] }
 0x23d   :  { %v1181_v36 = vor.u32 1.1754944e-38, %v1180_v62  ;;  %vm1179_vm0 = vcmp.eq.f32.partialorder %v1178_v37, 8.507059e+37 }
 0x23e   :  { %v6274_v11 = vpop.eup %6273 }
 0x23f   :  { %v1188_v15 = vadd.f32 1.0, %v6274_v11 }
 0x240   :  { %v6276_v17 = vpop.eup %6275 }
 0x241   :  { %v6278_v26 = vpop.eup %6277  ;;  %v1151_v28 = vmul.f32 %v6276_v17, %v1149_v52  ;;  %6279 = vrcp.f32 %v1188_v15  ;;  %vm1156_vm9 = vweird.f32 %v6276_v17  ;;  %vm1194_vm2 = vweird.f32 %v1188_v15 }
 0x242   :  { %v1170_v29 = vmul.f32 %v6278_v26, %v1168_v60  ;;  %6281 = vtanh.f32 %v1144_v21  ;;  %vm1175_vm10 = vweird.f32 %v6278_v26  ;;  %vm1157_vm13 = vmor %vm1155_vm11, %vm1156_vm9  ;;  %v1200_v60 = vand.u32 2147483648, %v1188_v15 }
 0x243   :  { %v1152_v35 = vsub.f32 1.0, %v1151_v28  ;;  %vm1176_vm14 = vmor %vm1174_vm12, %vm1175_vm10  ;;  %v1198_v58 = vand.u32 2147483647, %v1188_v15  ;;  %v6062_v28 = vld [vmem:[%s9350_s3 + $0xe4] sm:$0xf] }
 0x244   :  { %v1171_v59 = vsub.f32 1.0, %v1170_v29  ;;  %v1201_v1 = vor.u32 1.1754944e-38, %v1200_v60  ;;  %v5113_v60 = vld [vmem:[%s9350_s3 + $0xb0] sm:$0xf0] }
 0x245   :  { %v1153_v56 = vmul.f32 %v6276_v17, %v1152_v35  ;;  %vm1199_vm4 = vcmp.eq.f32.partialorder %v1198_v58, 8.507059e+37  ;;  %v5145_v35 = vld [vmem:[%s9350_s3 + $0xf0] sm:$0xf0]  ;;  %v5119_v58 = vld [vmem:[%s9350_s3 + $0xa8] sm:$0xf] }
 0x246   :  { %v1172_v41 = vmul.f32 %v6278_v26, %v1171_v59  ;;  %v5151_v59 = vld [vmem:[%s9350_s3 + $0xe8] sm:$0xf]  ;;  %v5148_v62 = vor.u32 %v6062_v28, %v5145_v35  ;;  %v6052_v28 = vld [vmem:[%s9350_s3 + $0x8c] sm:$0xf0] }
 0x247   :  { %v6280_v5 = vpop.eup %6279  ;;  %v1154_v45 = vadd.f32 %v6276_v17, %v1153_v56  ;;  %v5152_v56 = vor.u32 %v6065_v39, %v5151_v59  ;;  %v5097_v59 = vld [vmem:[%s9350_s3 + $0x90] sm:$0xf0]  ;;  %v5103_v39 = vld [vmem:[%s9350_s3 + $0x88] sm:$0xf] }
 0x248   :  { %v1173_v3 = vadd.f32 %v6278_v26, %v1172_v41  ;;  %v1190_v31 = vmul.f32 %v6280_v5, %v1188_v15  ;;  %v6282_v6 = vpop.eup %6281  ;;  %vm1195_vm1 = vweird.f32 %v6280_v5  ;;  %v6064_v15 = vld [vmem:[%s9350_s3 + $0xec] sm:$0xf0]  ;;  %v5153_v41 = vld [vmem:[%s9350_s3 + $0xf8] sm:$0xf0]  ;;  %1745 = vmatpush.bf16.msra.mxu1 %v5148_v62  ;;  %v6053_v62 = vld [vmem:[%s9350_s3 + $0x94] sm:$0xf0] }
 0x249   :  { %v1158_v46 = vsel %vm1157_vm13, %v6276_v17, %v1154_v45  ;;  %vm1196_vm3 = vmor %vm1194_vm2, %vm1195_vm1  ;;  %v5156_v37 = vor.u32 %v6063_v40, %v5153_v41  ;;  %1758 = vmatpush.bf16.msrb.mxu2 %v5152_v56  ;;  %v6060_v45 = vld [vmem:[%s9350_s3 + $0xcc] sm:$0xf0]  ;;  %v5104_v40 = vor.u32 %v6053_v62, %v5103_v39  ;;  %v6051_v41 = vld [vmem:[%s9350_s3 + $0x8c] sm:$0xf] }
 0x24a   :  { %v1163_v61 = vsel %vm1160_vm15, %v1162_v2, %v1158_v46  ;;  %v1177_v14 = vsel %vm1176_vm14, %v6278_v26, %v1173_v3  ;;  %v1191_v55 = vsub.f32 1.0, %v1190_v31  ;;  %v5143_v26 = vld [vmem:[%s9350_s3 + $0xe0] sm:$0xf]  ;;  %v6058_v2 = vld [vmem:[%s9350_s3 + $0xc4] sm:$0xf] }
 0x24b   :  { %v1182_v47 = vsel %vm1179_vm0, %v1181_v36, %v1177_v14  ;;  %v1205_v48 = vmul.f32 %v6282_v6, %v1163_v61  ;;  %v5144_v29 = vor.u32 %v6064_v15, %v5143_v26  ;;  %1771 = vmatpush.bf16.msrb.mxu3 %v5156_v37  ;;  %v5129_v31 = vld [vmem:[%s9350_s3 + $0xd0] sm:$0xf0]  ;;  %v5135_v36 = vld [vmem:[%s9350_s3 + $0xc8] sm:$0xf]  ;;  %v6061_v46 = vld [vmem:[%s9350_s3 + $0xd4] sm:$0xf0] }
 0x24c   :  { %v1204_v50 = vmul.f32 %v1182_v47, %v7315_v25  ;;  %v1192_v10 = vmul.f32 %v6280_v5, %v1191_v55  ;;  %v5132_v6 = vor.u32 %v6058_v2, %v5129_v31  ;;  %v5136_v61 = vor.u32 %v6061_v46, %v5135_v36  ;;  %v6059_v14 = vld [vmem:[%s9350_s3 + $0xcc] sm:$0xf]  ;;  %v5137_v55 = vld [vmem:[%s9350_s3 + $0xd8] sm:$0xf0]  ;;  %v5095_v15 = vld [vmem:[%s9350_s3 + $0x80] sm:$0xf] }
 0x24d   :  { %1732 = vmatpush.bf16.msrb.mxu0 %v5144_v29  ;;  %v5140_v47 = vor.u32 %v6059_v14, %v5137_v55  ;;  %v6050_v29 = vld [vmem:[%s9350_s3 + $0x84] sm:$0xf]  ;;  %v5096_v35 = vor.u32 %v6052_v28, %v5095_v15  ;;  %v5105_v37 = vld [vmem:[%s9350_s3 + $0x98] sm:$0xf0]  ;;  %v6048_v2 = vld [vmem:[%s9350_s3 + $0x6c] sm:$0xf0]  ;;  %v119_v31 = vadd.f32 %v6832_v4, %v6803_v51  ;;  %v148_v36 = vadd.f32 %v6859_v20, %v6841_v8 }
 0x24e   :  { %v7519_v52 = vadd.f32 %v1205_v48, %v1204_v50  ;;  %v1193_v24 = vadd.f32 %v6280_v5, %v1192_v10  ;;  %1746 = vmatpush.bf16.msra.mxu1 %v5132_v6  ;;  %1759 = vmatpush.bf16.msrb.mxu2 %v5136_v61  ;;  %v5111_v48 = vld [vmem:[%s9350_s3 + $0xa0] sm:$0xf]  ;;  %v6056_v50 = vld [vmem:[%s9350_s3 + $0xac] sm:$0xf0]  ;;  %v6054_v10 = vld [vmem:[%s9350_s3 + $0xa4] sm:$0xf]  ;;  %v5100_v56 = vor.u32 %v6050_v29, %v5097_v59 }
 0x24f   :  { %1772 = vmatpush.bf16.msrb.mxu3 %v5140_v47  ;;  %v5081_v6 = vld [vmem:[%s9350_s3 + $0x70] sm:$0xf0]  ;;  %v5087_v61 = vld [vmem:[%s9350_s3 + $0x68] sm:$0xf]  ;;  %v6049_v14 = vld [vmem:[%s9350_s3 + $0x74] sm:$0xf0] }
 0x250   :  { %6283 = vtanh.f32 %v7519_v52  ;;  %v1197_v32 = vsel %vm1196_vm3, %v6280_v5, %v1193_v24  ;;  %v5127_v5 = vld [vmem:[%s9350_s3 + $0xc0] sm:$0xf]  ;;  %v5112_v24 = vor.u32 %v6056_v50, %v5111_v48  ;;  %v5088_v48 = vor.u32 %v6049_v14, %v5087_v61  ;;  %v6047_v20 = vld [vmem:[%s9350_s3 + $0x6c] sm:$0xf]  ;;  %v5089_v50 = vld [vmem:[%s9350_s3 + $0x78] sm:$0xf0] }
 0x251   :  { %v1202_v17 = vsel %vm1199_vm4, %v1201_v1, %v1197_v32  ;;  %v5128_v3 = vor.u32 %v6060_v45, %v5127_v5  ;;  %v6057_v32 = vld [vmem:[%s9350_s3 + $0xb4] sm:$0xf0]  ;;  %v5116_v1 = vor.u32 %v6054_v10, %v5113_v60  ;;  %v5108_v5 = vor.u32 %v6051_v41, %v5105_v37  ;;  %v5079_v45 = vld [vmem:[%s9350_s3 + $0x60] sm:$0xf]  ;;  %v5071_v28 = vld [vmem:[%s9350_s3 + $0x48] sm:$0xf] }
 0x252   :  { %v5080_v46 = vor.u32 %v6048_v2, %v5079_v45  ;;  %v5092_v60 = vor.u32 %v6047_v20, %v5089_v50  ;;  %v6045_v29 = vld [vmem:[%s9350_s3 + $0x54] sm:$0xf0]  ;;  %v5073_v39 = vld [vmem:[%s9350_s3 + $0x58] sm:$0xf0]  ;;  %v5047_v62 = vld [vmem:[%s9350_s3 + $0x20] sm:$0xf] }
 0x253   :  { %1733 = vmatpush.bf16.msrb.mxu0 %v5128_v3  ;;  %1747 = vmatpush.bf16.msra.mxu1 %v5116_v1  ;;  %v6046_v3 = vld [vmem:[%s9350_s3 + $0x64] sm:$0xf]  ;;  %v5072_v59 = vor.u32 %v6045_v29, %v5071_v28  ;;  %v5049_v45 = vld [vmem:[%s9350_s3 + $0x30] sm:$0xf0]  ;;  %v5055_v2 = vld [vmem:[%s9350_s3 + $0x28] sm:$0xf] }
 0x254   :  { %v5084_v4 = vor.u32 %v6046_v3, %v5081_v6  ;;  %v6042_v1 = vld [vmem:[%s9350_s3 + $0x44] sm:$0xf]  ;;  %v5057_v6 = vld [vmem:[%s9350_s3 + $0x38] sm:$0xf0]  ;;  %v6036_v20 = vld [vmem:[%s9350_s3 + $0xc] sm:$0xf0] }
 0x255   :  { %v6034_v50 = vld [vmem:[%s9350_s3 + $0x4] sm:$0xf] }
 0x256   :  { %v6284_v11 = vpop.eup %6283 }
 0x257   :  { %v7522_v21 = vmul.f32 %v6284_v11, %v1202_v17  ;;  %v5120_v11 = vor.u32 %v6057_v32, %v5119_v58  ;;  %v6055_v17 = vld [vmem:[%s9350_s3 + $0xac] sm:$0xf]  ;;  %1734 = vmatpush.bf16.msrb.mxu0 %v5112_v24  ;;  %1748 = vmatpush.bf16.msra.mxu1 %v5100_v56  ;;  %v5063_v58 = vld [vmem:[%s9350_s3 + $0x40] sm:$0xf]  ;;  %v6044_v32 = vld [vmem:[%s9350_s3 + $0x4c] sm:$0xf0] }
 0x258   :  { %v6040_v56 = vld [vmem:[%s9350_s3 + $0x2c] sm:$0xf0] }
 0x259   :  { %v1218_v25 = vpack.c.bf16 %v7522_v21, %v7522_v21  ;;  %1760 = vmatpush.bf16.msrb.mxu2 %v5120_v11  ;;  %v5048_v37 = vor.u32 %v6040_v56, %v5047_v62  ;;  %v177_v56 = vadd.f32 %v6839_v7, %v6825_v63 }
 0x25b   :  { %1419 = vmatmul.bf16.vlgmr.msra.gmra.mxu0 %v1218_v25  ;;  %1432 = vmatmul.bf16.vlgmr.msrb.gmra.mxu1 %v1218_v25 }
 0x25c   :  { %1445 = vmatmul.bf16.vlgmr.msra.gmra.mxu2 %v1218_v25  ;;  %1458 = vmatmul.bf16.vlgmr.msra.gmra.mxu3 %v1218_v25  ;;  %v5121_v25 = vld [vmem:[%s9350_s3 + $0xb8] sm:$0xf0] }
 0x25d   :  { %v5124_v26 = vor.u32 %v6055_v17, %v5121_v25  ;;  %1735 = vmatpush.bf16.msrb.mxu0 %v5096_v35  ;;  %1761 = vmatpush.bf16.msrb.mxu2 %v5104_v40  ;;  %v5064_v25 = vor.u32 %v6044_v32, %v5063_v58  ;;  %v6043_v35 = vld [vmem:[%s9350_s3 + $0x4c] sm:$0xf]  ;;  %v206_v40 = vadd.f32 %v6843_v9, %v6827_v0  ;;  %v6037_v58 = vld [vmem:[%s9350_s3 + $0x14] sm:$0xf0] }
 0x25e   :  { %1749 = vmatpush.bf16.msra.mxu1 %v5084_v4  ;;  %v5076_v41 = vor.u32 %v6043_v35, %v5073_v39 }
 0x25f   :  { %1773 = vmatpush.bf16.msrb.mxu3 %v5124_v26  ;;  %v5065_v26 = vld [vmem:[%s9350_s3 + $0x50] sm:$0xf0] }
 0x260   :  { %v5068_v15 = vor.u32 %v6042_v1, %v5065_v26 }
 0x261   :  { %1736 = vmatpush.bf16.msrb.mxu0 %v5080_v46  ;;  %1762 = vmatpush.bf16.msrb.mxu2 %v5088_v48  ;;  %v6039_v46 = vld [vmem:[%s9350_s3 + $0x2c] sm:$0xf]  ;;  %v5031_v48 = vld [vmem:[%s9350_s3] sm:$0xf] }
 0x262   :  { %1750 = vmatpush.bf16.msra.mxu1 %v5068_v15  ;;  %v5060_v4 = vor.u32 %v6039_v46, %v5057_v6 }
 0x263   :  { %1774 = vmatpush.bf16.msrb.mxu3 %v5108_v5  ;;  %v6038_v5 = vld [vmem:[%s9350_s3 + $0x24] sm:$0xf] }
 0x264   :  { %v5052_v9 = vor.u32 %v6038_v5, %v5049_v45 }
 0x265   :  { %1737 = vmatpush.bf16.msrb.mxu0 %v5064_v25  ;;  %1763 = vmatpush.bf16.msrb.mxu2 %v5072_v59 }
 0x266   :  { %1751 = vmatpush.bf16.msra.mxu1 %v5052_v9 }
 0x267   :  { %1775 = vmatpush.bf16.msrb.mxu3 %v5092_v60  ;;  %v5039_v60 = vld [vmem:[%s9350_s3 + $0x8] sm:$0xf] }
 0x268   :  { %v5040_v26 = vor.u32 %v6037_v58, %v5039_v60 }
 0x269   :  { %1738 = vmatpush.bf16.msrb.mxu0 %v5048_v37 }
 0x26b   :  { %1776 = vmatpush.bf16.msrb.mxu3 %v5076_v41 }
 0x26f   :  { %1777 = vmatpush.bf16.msrb.mxu3 %v5060_v4 }
 0x2d8   :  { %v1420_v55 = vpop.f32.mrf.mxu0  ;;  %v1433_v47 = vpop.f32.mrf.mxu1 }
 0x2d9   :  { %v1463_v10 = vadd.f32 %v1420_v55, %v119_v31  ;;  %v1464_v24 = vadd.f32 %v1433_v47, %v148_v36  ;;  %v6041_v36 = vld [vmem:[%s9350_s3 + $0x34] sm:$0xf0] }
 0x2da   :  { %v5056_v47 = vor.u32 %v6041_v36, %v5055_v2 }
 0x2db   :  { %v5026_v11 = vmul.f32 -1.442695, %v1463_v10  ;;  %v5027_v17 = vmul.f32 -1.442695, %v1464_v24  ;;  %v5032_v10 = vor.u32 %v6036_v20, %v5031_v48  ;;  %v5033_v24 = vld [vmem:[%s9350_s3 + $0x10] sm:$0xf0] }
 0x2dc   :  { %v5036_v1 = vor.u32 %v6034_v50, %v5033_v24  ;;  %1764 = vmatpush.bf16.msrb.mxu2 %v5056_v47 }
 0x2dd   :  { %6285 = vpow2.f32 %v5026_v11  ;;  %v6035_v11 = vld [vmem:[%s9350_s3 + $0xc] sm:$0xf]  ;;  %1739 = vmatpush.bf16.msrb.mxu0 %v5032_v10 }
 0x2de   :  { %6287 = vpow2.f32 %v5027_v17  ;;  %v5041_v17 = vld [vmem:[%s9350_s3 + $0x18] sm:$0xf0]  ;;  %1752 = vmatpush.bf16.msra.mxu1 %v5036_v1 }
 0x2df   :  { %v1446_v3 = vpop.f32.mrf.mxu2  ;;  %v1459_v31 = vpop.f32.mrf.mxu3  ;;  %v5044_v29 = vor.u32 %v6035_v11, %v5041_v17 }
 0x2e0   :  { %v1466_v61 = vadd.f32 %v1459_v31, %v206_v40  ;;  %v1422_v14 = vpop.f32.mrf.mxu0  ;;  %v1435_v55 = vpop.f32.mrf.mxu1  ;;  %1765 = vmatpush.bf16.msrb.mxu2 %v5040_v26  ;;  %v1465_v37 = vadd.f32 %v1446_v3, %v177_v56  ;;  %v5274_v56 = vld [vmem:[%s9350_s3 + $0xe0] sm:$0xf] }
 0x2e1   :  { %1778 = vmatpush.bf16.msrb.mxu3 %v5044_v29 }
 0x2e2   :  { %v5028_v32 = vmul.f32 -1.442695, %v1466_v61 }
 0x2e3   :  { %v6286_v25 = vpop.eup %6285 }
 0x2e4   :  { %v6288_v15 = vpop.eup %6287  ;;  %v1470_v28 = vadd.f32 1.0, %v6286_v25  ;;  %6289 = vpow2.f32 %v5028_v32 }
 0x2e5   :  { %v1489_v35 = vadd.f32 1.0, %v6288_v15 }
 0x2e6   :  { %6291 = vrcp.f32 %v1470_v28  ;;  %v1482_v36 = vand.u32 2147483648, %v1470_v28  ;;  %v1480_v61 = vand.u32 2147483647, %v1470_v28  ;;  %vm1476_vm7 = vweird.f32 %v1470_v28 }
 0x2e7   :  { %6293 = vrcp.f32 %v1489_v35  ;;  %v1448_v59 = vpop.f32.mrf.mxu2  ;;  %v1461_v39 = vpop.f32.mrf.mxu3  ;;  %v1501_v46 = vand.u32 2147483648, %v1489_v35  ;;  %v1499_v55 = vand.u32 2147483647, %v1489_v35  ;;  %vm1495_vm8 = vweird.f32 %v1489_v35 }
 0x2e8   :  { %v1483_v3 = vor.u32 1.1754944e-38, %v1482_v36  ;;  %vm1481_vm11 = vcmp.eq.f32.partialorder %v1480_v61, 8.507059e+37  ;;  %v6095_v36 = vld [vmem:[%s9350_s3 + $0xec] sm:$0xf]  ;;  %v5258_v61 = vld [vmem:[%s9350_s3 + $0xc0] sm:$0xf] }
 0x2e9   :  { %v1502_v20 = vor.u32 1.1754944e-38, %v1501_v46  ;;  %vm1500_vm12 = vcmp.eq.f32.partialorder %v1499_v55, 8.507059e+37  ;;  %v5284_v46 = vld [vmem:[%s9350_s3 + $0xf8] sm:$0xf0]  ;;  %v6090_v55 = vld [vmem:[%s9350_s3 + $0xc4] sm:$0xf] }
 0x2ea   :  { %v6290_v62 = vpop.eup %6289 }
 0x2eb   :  { %v1509_v40 = vadd.f32 1.0, %v6290_v62 }
 0x2ec   :  { %v6292_v41 = vpop.eup %6291 }
 0x2ed   :  { %v6294_v5 = vpop.eup %6293  ;;  %v1472_v45 = vmul.f32 %v6292_v41, %v1470_v28  ;;  %6295 = vrcp.f32 %v1509_v40  ;;  %vm1477_vm5 = vweird.f32 %v6292_v41  ;;  %v1521_v15 = vand.u32 2147483648, %v1509_v40 }
 0x2ee   :  { %v1491_v2 = vmul.f32 %v6294_v5, %v1489_v35  ;;  %6297 = vtanh.f32 %v1465_v37  ;;  %vm1496_vm6 = vweird.f32 %v6294_v5  ;;  %vm1478_vm9 = vmor %vm1476_vm7, %vm1477_vm5  ;;  %vm1515_vm14 = vweird.f32 %v1509_v40 }
 0x2ef   :  { %v1473_v31 = vsub.f32 1.0, %v1472_v45  ;;  %vm1497_vm10 = vmor %vm1495_vm8, %vm1496_vm6  ;;  %v1519_v28 = vand.u32 2147483647, %v1509_v40  ;;  %v1522_v35 = vor.u32 1.1754944e-38, %v1521_v15  ;;  %v5282_v45 = vld [vmem:[%s9350_s3 + $0xe8] sm:$0xf] }
 0x2f0   :  { %v1492_v9 = vsub.f32 1.0, %v1491_v2  ;;  %v6097_v2 = vld [vmem:[%s9350_s3 + $0xf4] sm:$0xf0] }
 0x2f1   :  { %v1474_v6 = vmul.f32 %v6292_v41, %v1473_v31  ;;  %vm1520_vm0 = vcmp.eq.f32.partialorder %v1519_v28, 8.507059e+37 }
 0x2f2   :  { %v1493_v14 = vmul.f32 %v6294_v5, %v1492_v9  ;;  %v5283_v9 = vor.u32 %v6097_v2, %v5282_v45 }
 0x2f3   :  { %v6296_v47 = vpop.eup %6295  ;;  %v1475_v7 = vadd.f32 %v6292_v41, %v1474_v6  ;;  %v5287_v6 = vor.u32 %v6095_v36, %v5284_v46  ;;  %v5210_v46 = vld [vmem:[%s9350_s3 + $0x60] sm:$0xf] }
 0x2f4   :  { %v1494_v4 = vadd.f32 %v6294_v5, %v1493_v14  ;;  %v1511_v48 = vmul.f32 %v6296_v47, %v1509_v40  ;;  %v6298_v10 = vpop.eup %6297  ;;  %vm1516_vm13 = vweird.f32 %v6296_v47  ;;  %v6096_v40 = vld [vmem:[%s9350_s3 + $0xec] sm:$0xf0]  ;;  %2079 = vmatpush.bf16.msra.mxu2 %v5283_v9  ;;  %v5236_v9 = vld [vmem:[%s9350_s3 + $0x98] sm:$0xf0] }
 0x2f5   :  { %v1479_v50 = vsel %vm1478_vm9, %v6292_v41, %v1475_v7  ;;  %vm1517_vm15 = vmor %vm1515_vm14, %vm1516_vm13  ;;  %v6094_v41 = vld [vmem:[%s9350_s3 + $0xe4] sm:$0xf]  ;;  %v5275_v37 = vor.u32 %v6096_v40, %v5274_v56  ;;  %v6092_v14 = vld [vmem:[%s9350_s3 + $0xcc] sm:$0xf0]  ;;  %2092 = vmatpush.bf16.msra.mxu3 %v5287_v6 }
 0x2f6   :  { %v1484_v24 = vsel %vm1481_vm11, %v1483_v3, %v1479_v50  ;;  %v1498_v60 = vsel %vm1497_vm10, %v6294_v5, %v1494_v4  ;;  %v1512_v58 = vsub.f32 1.0, %v1511_v48  ;;  %v5276_v5 = vld [vmem:[%s9350_s3 + $0xf0] sm:$0xf0]  ;;  %v5266_v3 = vld [vmem:[%s9350_s3 + $0xc8] sm:$0xf] }
 0x2f7   :  { %v1503_v32 = vsel %vm1500_vm12, %v1502_v20, %v1498_v60  ;;  %v1526_v1 = vmul.f32 %v6298_v10, %v1484_v24  ;;  %v5279_v31 = vor.u32 %v6094_v41, %v5276_v5  ;;  %2053 = vmatpush.bf16.msra.mxu0 %v5275_v37  ;;  %v5260_v7 = vld [vmem:[%s9350_s3 + $0xd0] sm:$0xf0]  ;;  %v6093_v4 = vld [vmem:[%s9350_s3 + $0xd4] sm:$0xf0]  ;;  %v6091_v50 = vld [vmem:[%s9350_s3 + $0xcc] sm:$0xf] }
 0x2f8   :  { %v1525_v11 = vmul.f32 %v1503_v32, %v7519_v52  ;;  %v1513_v17 = vmul.f32 %v6296_v47, %v1512_v58  ;;  %v5263_v48 = vor.u32 %v6090_v55, %v5260_v7  ;;  %v5267_v20 = vor.u32 %v6093_v4, %v5266_v3  ;;  %v5268_v10 = vld [vmem:[%s9350_s3 + $0xd8] sm:$0xf0]  ;;  %v5242_v60 = vld [vmem:[%s9350_s3 + $0xa0] sm:$0xf]  ;;  %v6088_v58 = vld [vmem:[%s9350_s3 + $0xac] sm:$0xf0] }
 0x2f9   :  { %2066 = vmatpush.bf16.msrb.mxu1 %v5279_v31  ;;  %v5271_v24 = vor.u32 %v6091_v50, %v5268_v10  ;;  %v6086_v32 = vld [vmem:[%s9350_s3 + $0xa4] sm:$0xf]  ;;  %v5228_v41 = vld [vmem:[%s9350_s3 + $0x90] sm:$0xf0]  ;;  %v5234_v37 = vld [vmem:[%s9350_s3 + $0x88] sm:$0xf] }
 0x2fa   :  { %v7727_v25 = vadd.f32 %v1526_v1, %v1525_v11  ;;  %v1514_v26 = vadd.f32 %v6296_v47, %v1513_v17  ;;  %2080 = vmatpush.bf16.msra.mxu2 %v5267_v20  ;;  %v5243_v1 = vor.u32 %v6088_v58, %v5242_v60  ;;  %v5244_v11 = vld [vmem:[%s9350_s3 + $0xb0] sm:$0xf0]  ;;  %v5250_v17 = vld [vmem:[%s9350_s3 + $0xa8] sm:$0xf]  ;;  %v6082_v56 = vld [vmem:[%s9350_s3 + $0x84] sm:$0xf] }
 0x2fb   :  { %2093 = vmatpush.bf16.msra.mxu3 %v5271_v24  ;;  %v5247_v15 = vor.u32 %v6086_v32, %v5244_v11  ;;  %v6085_v5 = vld [vmem:[%s9350_s3 + $0x94] sm:$0xf0]  ;;  %v5231_v45 = vor.u32 %v6082_v56, %v5228_v41  ;;  %v6083_v31 = vld [vmem:[%s9350_s3 + $0x8c] sm:$0xf]  ;;  %v6080_v6 = vld [vmem:[%s9350_s3 + $0x6c] sm:$0xf0] }
 0x2fc   :  { %6299 = vtanh.f32 %v7727_v25  ;;  %v1518_v29 = vsel %vm1517_vm15, %v6296_v47, %v1514_v26  ;;  %v5259_v47 = vor.u32 %v6092_v14, %v5258_v61  ;;  %v6089_v26 = vld [vmem:[%s9350_s3 + $0xb4] sm:$0xf0]  ;;  %v5235_v2 = vor.u32 %v6085_v5, %v5234_v37  ;;  %v6078_v61 = vld [vmem:[%s9350_s3 + $0x64] sm:$0xf]  ;;  %v5212_v55 = vld [vmem:[%s9350_s3 + $0x70] sm:$0xf0] }
 0x2fd   :  { %v1523_v39 = vsel %vm1520_vm0, %v1522_v35, %v1518_v29  ;;  %2067 = vmatpush.bf16.msrb.mxu1 %v5263_v48  ;;  %v5251_v28 = vor.u32 %v6089_v26, %v5250_v17  ;;  %v6087_v29 = vld [vmem:[%s9350_s3 + $0xac] sm:$0xf]  ;;  %v5252_v35 = vld [vmem:[%s9350_s3 + $0xb8] sm:$0xf0]  ;;  %v5239_v36 = vor.u32 %v6083_v31, %v5236_v9  ;;  %v5211_v14 = vor.u32 %v6080_v6, %v5210_v46  ;;  %v6081_v7 = vld [vmem:[%s9350_s3 + $0x74] sm:$0xf0] }
 0x2fe   :  { %2054 = vmatpush.bf16.msra.mxu0 %v5259_v47  ;;  %v5218_v47 = vld [vmem:[%s9350_s3 + $0x68] sm:$0xf]  ;;  %v5215_v3 = vor.u32 %v6078_v61, %v5212_v55  ;;  %v6079_v48 = vld [vmem:[%s9350_s3 + $0x6c] sm:$0xf]  ;;  %v5220_v20 = vld [vmem:[%s9350_s3 + $0x78] sm:$0xf0] }
 0x2ff   :  { %2081 = vmatpush.bf16.msra.mxu2 %v5251_v28  ;;  %v5219_v4 = vor.u32 %v6081_v7, %v5218_v47  ;;  %v5223_v24 = vor.u32 %v6079_v48, %v5220_v20  ;;  %v5194_v32 = vld [vmem:[%s9350_s3 + $0x40] sm:$0xf]  ;;  %v6074_v11 = vld [vmem:[%s9350_s3 + $0x44] sm:$0xf]  ;;  %v6077_v26 = vld [vmem:[%s9350_s3 + $0x54] sm:$0xf0] }
 0x300   :  { %v6072_v56 = vld [vmem:[%s9350_s3 + $0x2c] sm:$0xf0]  ;;  %v6070_v37 = vld [vmem:[%s9350_s3 + $0x24] sm:$0xf]  ;;  %v5180_v5 = vld [vmem:[%s9350_s3 + $0x30] sm:$0xf0] }
 0x301   :  { %2068 = vmatpush.bf16.msrb.mxu1 %v5247_v15  ;;  %v6073_v31 = vld [vmem:[%s9350_s3 + $0x34] sm:$0xf0]  ;;  %v6071_v9 = vld [vmem:[%s9350_s3 + $0x2c] sm:$0xf]  ;;  %v5162_v55 = vld [vmem:[%s9350_s3] sm:$0xf] }
 0x302   :  { %v6300_v59 = vpop.eup %6299  ;;  %2055 = vmatpush.bf16.msra.mxu0 %v5243_v1  ;;  %v6076_v1 = vld [vmem:[%s9350_s3 + $0x4c] sm:$0xf0]  ;;  %v6066_v7 = vld [vmem:[%s9350_s3 + $0x4] sm:$0xf] }
 0x303   :  { %v7730_v62 = vmul.f32 %v6300_v59, %v1523_v39  ;;  %v5255_v59 = vor.u32 %v6087_v29, %v5252_v35  ;;  %v5226_v39 = vld [vmem:[%s9350_s3 + $0x80] sm:$0xf]  ;;  %2082 = vmatpush.bf16.msra.mxu2 %v5235_v2  ;;  %v5195_v17 = vor.u32 %v6076_v1, %v5194_v32  ;;  %v5183_v2 = vor.u32 %v6070_v37, %v5180_v5  ;;  %v6068_v47 = vld [vmem:[%s9350_s3 + $0xc] sm:$0xf0]  ;;  %v5172_v32 = vld [vmem:[%s9350_s3 + $0x18] sm:$0xf0] }
 0x304   :  { %v5163_v20 = vor.u32 %v6068_v47, %v5162_v55 }
 0x305   :  { %v1539_v52 = vpack.c.bf16 %v7730_v62, %v7730_v62  ;;  %2094 = vmatpush.bf16.msra.mxu3 %v5255_v59  ;;  %2069 = vmatpush.bf16.msrb.mxu1 %v5231_v45  ;;  %v6075_v59 = vld [vmem:[%s9350_s3 + $0x4c] sm:$0xf]  ;;  %v5186_v45 = vld [vmem:[%s9350_s3 + $0x28] sm:$0xf] }
 0x306   :  { %v5187_v61 = vor.u32 %v6073_v31, %v5186_v45 }
 0x307   :  { %1740 = vmatmul.bf16.vlgmr.msrb.gmra.mxu0 %v1539_v52  ;;  %1753 = vmatmul.bf16.vlgmr.msra.gmra.mxu1 %v1539_v52 }
 0x308   :  { %1766 = vmatmul.bf16.vlgmr.msrb.gmra.mxu2 %v1539_v52  ;;  %1779 = vmatmul.bf16.vlgmr.msrb.gmra.mxu3 %v1539_v52  ;;  %v6084_v52 = vld [vmem:[%s9350_s3 + $0x8c] sm:$0xf0] }
 0x309   :  { %v5227_v40 = vor.u32 %v6084_v52, %v5226_v39  ;;  %2095 = vmatpush.bf16.msra.mxu3 %v5239_v36  ;;  %2070 = vmatpush.bf16.msrb.mxu1 %v5215_v3  ;;  %v5204_v39 = vld [vmem:[%s9350_s3 + $0x58] sm:$0xf0]  ;;  %v5178_v52 = vld [vmem:[%s9350_s3 + $0x20] sm:$0xf] }
 0x30a   :  { %2083 = vmatpush.bf16.msra.mxu2 %v5219_v4  ;;  %v5179_v41 = vor.u32 %v6072_v56, %v5178_v52  ;;  %v5188_v36 = vld [vmem:[%s9350_s3 + $0x38] sm:$0xf0] }
 0x30b   :  { %2056 = vmatpush.bf16.msra.mxu0 %v5227_v40  ;;  %v5207_v40 = vor.u32 %v6075_v59, %v5204_v39 }
 0x30d   :  { %2096 = vmatpush.bf16.msra.mxu3 %v5223_v24  ;;  %v6069_v24 = vld [vmem:[%s9350_s3 + $0x14] sm:$0xf0] }
 0x30f   :  { %2057 = vmatpush.bf16.msra.mxu0 %v5211_v14  ;;  %v5191_v14 = vor.u32 %v6071_v9, %v5188_v36 }
 0x311   :  { %2097 = vmatpush.bf16.msra.mxu3 %v5207_v40 }
 0x313   :  { %2058 = vmatpush.bf16.msra.mxu0 %v5195_v17 }
 0x315   :  { %2098 = vmatpush.bf16.msra.mxu3 %v5191_v14 }
 0x317   :  { %2059 = vmatpush.bf16.msra.mxu0 %v5179_v41 }
 0x31b   :  { %2060 = vmatpush.bf16.msra.mxu0 %v5163_v20 }
 0x384   :  { %v1741_v50 = vpop.f32.mrf.mxu0  ;;  %v1754_v10 = vpop.f32.mrf.mxu1 }
 0x385   :  { %v1784_v60 = vadd.f32 %v1741_v50, %v6846_v12  ;;  %v1785_v58 = vadd.f32 %v1754_v10, %v6867_v27  ;;  %v5196_v12 = vld [vmem:[%s9350_s3 + $0x50] sm:$0xf0]  ;;  %v5202_v27 = vld [vmem:[%s9350_s3 + $0x48] sm:$0xf] }
 0x386   :  { %v5199_v29 = vor.u32 %v6074_v11, %v5196_v12  ;;  %v5203_v35 = vor.u32 %v6077_v26, %v5202_v27  ;;  %v5164_v50 = vld [vmem:[%s9350_s3 + $0x10] sm:$0xf0]  ;;  %v5170_v10 = vld [vmem:[%s9350_s3 + $0x8] sm:$0xf] }
 0x387   :  { %v5157_v15 = vmul.f32 -1.442695, %v1784_v60  ;;  %v5158_v28 = vmul.f32 -1.442695, %v1785_v58  ;;  %v5167_v60 = vor.u32 %v6066_v7, %v5164_v50  ;;  %v6067_v58 = vld [vmem:[%s9350_s3 + $0xc] sm:$0xf] }
 0x388   :  { %2071 = vmatpush.bf16.msrb.mxu1 %v5199_v29  ;;  %2084 = vmatpush.bf16.msra.mxu2 %v5203_v35  ;;  %v5175_v17 = vor.u32 %v6067_v58, %v5172_v32 }
 0x389   :  { %6301 = vpow2.f32 %v5157_v15 }
 0x38a   :  { %6303 = vpow2.f32 %v5158_v28  ;;  %2099 = vmatpush.bf16.msra.mxu3 %v5175_v17 }
 0x38b   :  { %v1767_v46 = vpop.f32.mrf.mxu2  ;;  %v1780_v6 = vpop.f32.mrf.mxu3 }
 0x38c   :  { %v1787_v3 = vadd.f32 %v1780_v6, %v6857_v19  ;;  %v1743_v4 = vpop.f32.mrf.mxu0  ;;  %v1756_v48 = vpop.f32.mrf.mxu1  ;;  %2072 = vmatpush.bf16.msrb.mxu1 %v5183_v2  ;;  %2085 = vmatpush.bf16.msra.mxu2 %v5187_v61  ;;  %v5171_v19 = vor.u32 %v6069_v24, %v5170_v10  ;;  %v1786_v39 = vadd.f32 %v1767_v46, %v6852_v16 }
 0x38e   :  { %v5159_v1 = vmul.f32 -1.442695, %v1787_v3 }
 0x38f   :  { %v6302_v11 = vpop.eup %6301 }
 0x390   :  { %v6304_v12 = vpop.eup %6303  ;;  %v1791_v27 = vadd.f32 1.0, %v6302_v11  ;;  %6305 = vpow2.f32 %v5159_v1  ;;  %2073 = vmatpush.bf16.msrb.mxu1 %v5167_v60  ;;  %2086 = vmatpush.bf16.msra.mxu2 %v5171_v19 }
 0x391   :  { %v1810_v26 = vadd.f32 1.0, %v6304_v12 }
 0x392   :  { %6307 = vrcp.f32 %v1791_v27  ;;  %v1803_v5 = vand.u32 2147483648, %v1791_v27  ;;  %v1801_v31 = vand.u32 2147483647, %v1791_v27  ;;  %vm1797_vm3 = vweird.f32 %v1791_v27 }
 0x393   :  { %6309 = vrcp.f32 %v1810_v26  ;;  %v1769_v15 = vpop.f32.mrf.mxu2  ;;  %v1782_v28 = vpop.f32.mrf.mxu3  ;;  %v1822_v45 = vand.u32 2147483648, %v1810_v26  ;;  %v1820_v36 = vand.u32 2147483647, %v1810_v26  ;;  %vm1816_vm4 = vweird.f32 %v1810_v26 }
 0x394   :  { %v1804_v16 = vor.u32 1.1754944e-38, %v1803_v5  ;;  %vm1802_vm7 = vcmp.eq.f32.partialorder %v1801_v31, 8.507059e+37  ;;  %v6128_v15 = vld [vmem:[%s9350_s3 + $0xec] sm:$0xf0]  ;;  %v6126_v28 = vld [vmem:[%s9350_s3 + $0xe4] sm:$0xf] }
 0x395   :  { %v1823_v55 = vor.u32 1.1754944e-38, %v1822_v45  ;;  %vm1821_vm8 = vcmp.eq.f32.partialorder %v1820_v36, 8.507059e+37  ;;  %v5389_v5 = vld [vmem:[%s9350_s3 + $0xc0] sm:$0xf]  ;;  %v6124_v45 = vld [vmem:[%s9350_s3 + $0xcc] sm:$0xf0] }
 0x396   :  { %v6306_v29 = vpop.eup %6305  ;;  %v5390_v31 = vor.u32 %v6124_v45, %v5389_v5  ;;  %v5397_v36 = vld [vmem:[%s9350_s3 + $0xc8] sm:$0xf]  ;;  %v6113_v45 = vld [vmem:[%s9350_s3 + $0x74] sm:$0xf0] }
 0x397   :  { %v1830_v35 = vadd.f32 1.0, %v6306_v29  ;;  %v5349_v5 = vld [vmem:[%s9350_s3 + $0x68] sm:$0xf] }
 0x398   :  { %v6308_v59 = vpop.eup %6307 }
 0x399   :  { %v6310_v52 = vpop.eup %6309  ;;  %v1793_v56 = vmul.f32 %v6308_v59, %v1791_v27  ;;  %6311 = vrcp.f32 %v1830_v35  ;;  %vm1798_vm1 = vweird.f32 %v6308_v59  ;;  %v1842_v58 = vand.u32 2147483648, %v1830_v35 }
 0x39a   :  { %v1812_v40 = vmul.f32 %v6310_v52, %v1810_v26  ;;  %6313 = vtanh.f32 %v1786_v39  ;;  %vm1817_vm2 = vweird.f32 %v6310_v52  ;;  %vm1799_vm5 = vmor %vm1797_vm3, %vm1798_vm1  ;;  %vm1836_vm10 = vweird.f32 %v1830_v35  ;;  %v5405_v26 = vld [vmem:[%s9350_s3 + $0xe0] sm:$0xf]  ;;  %v6129_v39 = vld [vmem:[%s9350_s3 + $0xf4] sm:$0xf0] }
 0x39b   :  { %v1794_v41 = vsub.f32 1.0, %v1793_v56  ;;  %vm1818_vm6 = vmor %vm1816_vm4, %vm1817_vm2  ;;  %v1840_v32 = vand.u32 2147483647, %v1830_v35  ;;  %v1843_v11 = vor.u32 1.1754944e-38, %v1842_v58  ;;  %v5406_v29 = vor.u32 %v6128_v15, %v5405_v26  ;;  %v5383_v58 = vld [vmem:[%s9350_s3 + $0xb8] sm:$0xf0] }
 0x39c   :  { %v1813_v37 = vsub.f32 1.0, %v1812_v40  ;;  %v6127_v40 = vld [vmem:[%s9350_s3 + $0xec] sm:$0xf]  ;;  %v5365_v26 = vld [vmem:[%s9350_s3 + $0x88] sm:$0xf] }
 0x39d   :  { %v1795_v2 = vmul.f32 %v6308_v59, %v1794_v41  ;;  %vm1841_vm12 = vcmp.eq.f32.partialorder %v1840_v32, 8.507059e+37  ;;  %v5415_v41 = vld [vmem:[%s9350_s3 + $0xf8] sm:$0xf0]  ;;  %2374 = vmatpush.bf16.msrb.mxu0 %v5406_v29  ;;  %v6117_v15 = vld [vmem:[%s9350_s3 + $0x94] sm:$0xf0] }
 0x39e   :  { %v1814_v9 = vmul.f32 %v6310_v52, %v1813_v37  ;;  %v5418_v37 = vor.u32 %v6127_v40, %v5415_v41  ;;  %v5366_v29 = vor.u32 %v6117_v15, %v5365_v26  ;;  %v6110_v40 = vld [vmem:[%s9350_s3 + $0x64] sm:$0xf]  ;;  %v5311_v26 = vld [vmem:[%s9350_s3 + $0x30] sm:$0xf0]  ;;  %v5317_v15 = vld [vmem:[%s9350_s3 + $0x28] sm:$0xf] }
 0x39f   :  { %v6312_v6 = vpop.eup %6311  ;;  %v1796_v61 = vadd.f32 %v6308_v59, %v1795_v2  ;;  %v6122_v2 = vld [vmem:[%s9350_s3 + $0xc4] sm:$0xf] }
 0x3a0   :  { %v1815_v46 = vadd.f32 %v6310_v52, %v1814_v9  ;;  %v1832_v14 = vmul.f32 %v6312_v6, %v1830_v35  ;;  %v6314_v7 = vpop.eup %6313  ;;  %vm1837_vm9 = vweird.f32 %v6312_v6  ;;  %v5407_v35 = vld [vmem:[%s9350_s3 + $0xf0] sm:$0xf0]  ;;  %2413 = vmatpush.bf16.msrb.mxu3 %v5418_v37 }
 0x3a1   :  { %v1800_v47 = vsel %vm1799_vm5, %v6308_v59, %v1796_v61  ;;  %vm1838_vm11 = vmor %vm1836_vm10, %vm1837_vm9  ;;  %v5413_v59 = vld [vmem:[%s9350_s3 + $0xe8] sm:$0xf]  ;;  %v5391_v9 = vld [vmem:[%s9350_s3 + $0xd0] sm:$0xf0]  ;;  %2375 = vmatpush.bf16.msrb.mxu0 %v5390_v31  ;;  %v153_v31 = vadd.f32 %v6875_v34, %v6841_v8 }
 0x3a2   :  { %v1805_v3 = vsel %vm1802_vm7, %v1804_v16, %v1800_v47  ;;  %v1819_v4 = vsel %vm1818_vm6, %v6310_v52, %v1815_v46  ;;  %v1833_v48 = vsub.f32 1.0, %v1832_v14  ;;  %v5410_v52 = vor.u32 %v6126_v28, %v5407_v35  ;;  %v6123_v46 = vld [vmem:[%s9350_s3 + $0xcc] sm:$0xf]  ;;  %v5399_v14 = vld [vmem:[%s9350_s3 + $0xd8] sm:$0xf0] }
 0x3a3   :  { %v1824_v20 = vsel %vm1821_vm8, %v1823_v55, %v1819_v4  ;;  %v1847_v50 = vmul.f32 %v6314_v7, %v1805_v3  ;;  %v5414_v56 = vor.u32 %v6129_v39, %v5413_v59  ;;  %v5394_v61 = vor.u32 %v6122_v2, %v5391_v9  ;;  %v5373_v47 = vld [vmem:[%s9350_s3 + $0xa0] sm:$0xf]  ;;  %v6120_v7 = vld [vmem:[%s9350_s3 + $0xac] sm:$0xf0]  ;;  %v6118_v3 = vld [vmem:[%s9350_s3 + $0xa4] sm:$0xf] }
 0x3a4   :  { %v1846_v10 = vmul.f32 %v1824_v20, %v7727_v25  ;;  %v1834_v24 = vmul.f32 %v6312_v6, %v1833_v48  ;;  %2387 = vmatpush.bf16.msra.mxu1 %v5410_v52  ;;  %v5402_v55 = vor.u32 %v6123_v46, %v5399_v14  ;;  %v5374_v4 = vor.u32 %v6120_v7, %v5373_v47  ;;  %v5375_v48 = vld [vmem:[%s9350_s3 + $0xb0] sm:$0xf0]  ;;  %v5381_v20 = vld [vmem:[%s9350_s3 + $0xa8] sm:$0xf]  ;;  %v6115_v35 = vld [vmem:[%s9350_s3 + $0x8c] sm:$0xf] }
 0x3a5   :  { %2400 = vmatpush.bf16.msrb.mxu2 %v5414_v56  ;;  %v5367_v59 = vld [vmem:[%s9350_s3 + $0x98] sm:$0xf0]  ;;  %v5341_v52 = vld [vmem:[%s9350_s3 + $0x60] sm:$0xf]  ;;  %v6112_v56 = vld [vmem:[%s9350_s3 + $0x6c] sm:$0xf0]  ;;  %v124_v2 = vadd.f32 %v6854_v18, %v6803_v51 }
 0x3a6   :  { %v7931_v60 = vadd.f32 %v1847_v50, %v1846_v10  ;;  %v1835_v19 = vadd.f32 %v6312_v6, %v1834_v24  ;;  %2414 = vmatpush.bf16.msrb.mxu3 %v5402_v55  ;;  %v6121_v50 = vld [vmem:[%s9350_s3 + $0xb4] sm:$0xf0]  ;;  %v5378_v10 = vor.u32 %v6118_v3, %v5375_v48  ;;  %2376 = vmatpush.bf16.msrb.mxu0 %v5374_v4  ;;  %v5343_v37 = vld [vmem:[%s9350_s3 + $0x70] sm:$0xf0]  ;;  %v5325_v18 = vld [vmem:[%s9350_s3 + $0x40] sm:$0xf] }
 0x3a7   :  { %v5382_v24 = vor.u32 %v6121_v50, %v5381_v20  ;;  %v5370_v39 = vor.u32 %v6115_v35, %v5367_v59  ;;  %v5342_v41 = vor.u32 %v6112_v56, %v5341_v52  ;;  %v5346_v9 = vor.u32 %v6110_v40, %v5343_v37  ;;  %v6108_v34 = vld [vmem:[%s9350_s3 + $0x4c] sm:$0xf0]  ;;  %v6106_v7 = vld [vmem:[%s9350_s3 + $0x44] sm:$0xf]  ;;  %v5327_v4 = vld [vmem:[%s9350_s3 + $0x50] sm:$0xf0] }
 0x3a8   :  { %6315 = vtanh.f32 %v7931_v60  ;;  %v1839_v1 = vsel %vm1838_vm11, %v6312_v6, %v1835_v19  ;;  %v6125_v6 = vld [vmem:[%s9350_s3 + $0xd4] sm:$0xf0]  ;;  %2388 = vmatpush.bf16.msra.mxu1 %v5394_v61  ;;  %v6119_v19 = vld [vmem:[%s9350_s3 + $0xac] sm:$0xf]  ;;  %v5351_v61 = vld [vmem:[%s9350_s3 + $0x78] sm:$0xf0]  ;;  %v5326_v3 = vor.u32 %v6108_v34, %v5325_v18 }
 0x3a9   :  { %v1844_v12 = vsel %vm1841_vm12, %v1843_v11, %v1839_v1  ;;  %v5398_v16 = vor.u32 %v6125_v6, %v5397_v36  ;;  %v5386_v32 = vor.u32 %v6119_v19, %v5383_v58  ;;  %v5357_v1 = vld [vmem:[%s9350_s3 + $0x80] sm:$0xf]  ;;  %v6116_v11 = vld [vmem:[%s9350_s3 + $0x8c] sm:$0xf0]  ;;  %v5350_v36 = vor.u32 %v6113_v45, %v5349_v5  ;;  %v6111_v6 = vld [vmem:[%s9350_s3 + $0x6c] sm:$0xf] }
 0x3aa   :  { %v5354_v14 = vor.u32 %v6111_v6, %v5351_v61  ;;  %v5333_v48 = vld [vmem:[%s9350_s3 + $0x48] sm:$0xf]  ;;  %v6109_v20 = vld [vmem:[%s9350_s3 + $0x54] sm:$0xf0]  ;;  %v6107_v58 = vld [vmem:[%s9350_s3 + $0x4c] sm:$0xf] }
 0x3ab   :  { %2401 = vmatpush.bf16.msrb.mxu2 %v5398_v16  ;;  %2415 = vmatpush.bf16.msrb.mxu3 %v5386_v32  ;;  %v5334_v19 = vor.u32 %v6109_v20, %v5333_v48  ;;  %v5335_v32 = vld [vmem:[%s9350_s3 + $0x58] sm:$0xf0]  ;;  %v6105_v35 = vld [vmem:[%s9350_s3 + $0x34] sm:$0xf0]  ;;  %v6103_v59 = vld [vmem:[%s9350_s3 + $0x2c] sm:$0xf] }
 0x3ac   :  { %2389 = vmatpush.bf16.msra.mxu1 %v5378_v10  ;;  %v5318_v40 = vor.u32 %v6105_v35, %v5317_v15  ;;  %v6100_v37 = vld [vmem:[%s9350_s3 + $0xc] sm:$0xf0]  ;;  %v6098_v5 = vld [vmem:[%s9350_s3 + $0x4] sm:$0xf]  ;;  %v5301_v6 = vld [vmem:[%s9350_s3 + $0x8] sm:$0xf] }
 0x3ad   :  { %v6101_v61 = vld [vmem:[%s9350_s3 + $0x14] sm:$0xf0] }
 0x3ae   :  { %v6316_v17 = vpop.eup %6315 }
 0x3af   :  { %v7934_v27 = vmul.f32 %v6316_v17, %v1844_v12  ;;  %2402 = vmatpush.bf16.msrb.mxu2 %v5382_v24  ;;  %v6114_v17 = vld [vmem:[%s9350_s3 + $0x84] sm:$0xf]  ;;  %v5358_v12 = vor.u32 %v6116_v11, %v5357_v1  ;;  %2416 = vmatpush.bf16.msrb.mxu3 %v5370_v39  ;;  %v5330_v24 = vor.u32 %v6106_v7, %v5327_v4  ;;  %v5309_v1 = vld [vmem:[%s9350_s3 + $0x20] sm:$0xf]  ;;  %v6104_v11 = vld [vmem:[%s9350_s3 + $0x2c] sm:$0xf0] }
 0x3b0   :  { %v5319_v39 = vld [vmem:[%s9350_s3 + $0x38] sm:$0xf0] }
 0x3b1   :  { %v1860_v25 = vpack.c.bf16 %v7934_v27, %v7934_v27  ;;  %2377 = vmatpush.bf16.msrb.mxu0 %v5358_v12  ;;  %v5310_v12 = vor.u32 %v6104_v11, %v5309_v1 }
 0x3b3   :  { %2061 = vmatmul.bf16.vlgmr.msra.gmra.mxu0 %v1860_v25  ;;  %2074 = vmatmul.bf16.vlgmr.msrb.gmra.mxu1 %v1860_v25 }
 0x3b4   :  { %2087 = vmatmul.bf16.vlgmr.msra.gmra.mxu2 %v1860_v25  ;;  %2100 = vmatmul.bf16.vlgmr.msra.gmra.mxu3 %v1860_v25  ;;  %v5359_v25 = vld [vmem:[%s9350_s3 + $0x90] sm:$0xf0] }
 0x3b5   :  { %v5362_v28 = vor.u32 %v6114_v17, %v5359_v25  ;;  %2403 = vmatpush.bf16.msrb.mxu2 %v5366_v29  ;;  %2378 = vmatpush.bf16.msrb.mxu0 %v5342_v41  ;;  %v5338_v17 = vor.u32 %v6107_v58, %v5335_v32  ;;  %v6102_v25 = vld [vmem:[%s9350_s3 + $0x24] sm:$0xf]  ;;  %v5322_v41 = vor.u32 %v6103_v59, %v5319_v39 }
 0x3b6   :  { %2417 = vmatpush.bf16.msrb.mxu3 %v5354_v14  ;;  %v5314_v29 = vor.u32 %v6102_v25, %v5311_v26  ;;  %v6099_v14 = vld [vmem:[%s9350_s3 + $0xc] sm:$0xf] }
 0x3b7   :  { %2390 = vmatpush.bf16.msra.mxu1 %v5362_v28  ;;  %v211_v28 = vadd.f32 %v6864_v23, %v6827_v0  ;;  %v5293_v23 = vld [vmem:[%s9350_s3] sm:$0xf] }
 0x3b9   :  { %2404 = vmatpush.bf16.msrb.mxu2 %v5350_v36  ;;  %2379 = vmatpush.bf16.msrb.mxu0 %v5326_v3  ;;  %v5295_v36 = vld [vmem:[%s9350_s3 + $0x10] sm:$0xf0] }
 0x3ba   :  { %2418 = vmatpush.bf16.msrb.mxu3 %v5338_v17 }
 0x3bb   :  { %2391 = vmatpush.bf16.msra.mxu1 %v5346_v9  ;;  %v5294_v9 = vor.u32 %v6100_v37, %v5293_v23 }
 0x3bd   :  { %2405 = vmatpush.bf16.msrb.mxu2 %v5334_v19  ;;  %2380 = vmatpush.bf16.msrb.mxu0 %v5310_v12 }
 0x3be   :  { %2419 = vmatpush.bf16.msrb.mxu3 %v5322_v41 }
 0x3bf   :  { %2392 = vmatpush.bf16.msra.mxu1 %v5330_v24 }
 0x3c1   :  { %2406 = vmatpush.bf16.msrb.mxu2 %v5318_v40  ;;  %2381 = vmatpush.bf16.msrb.mxu0 %v5294_v9 }
 0x3c3   :  { %2393 = vmatpush.bf16.msra.mxu1 %v5314_v29 }
 0x430   :  { %v2062_v16 = vpop.f32.mrf.mxu0  ;;  %v2075_v46 = vpop.f32.mrf.mxu1 }
 0x431   :  { %v2105_v55 = vadd.f32 %v2062_v16, %v124_v2  ;;  %v2106_v47 = vadd.f32 %v2075_v46, %v153_v31  ;;  %v5298_v16 = vor.u32 %v6098_v5, %v5295_v36  ;;  %v5302_v46 = vor.u32 %v6101_v61, %v5301_v6 }
 0x433   :  { %v5288_v50 = vmul.f32 -1.442695, %v2105_v55  ;;  %v5289_v10 = vmul.f32 -1.442695, %v2106_v47  ;;  %v5303_v55 = vld [vmem:[%s9350_s3 + $0x18] sm:$0xf0]  ;;  %2394 = vmatpush.bf16.msra.mxu1 %v5298_v16  ;;  %2407 = vmatpush.bf16.msrb.mxu2 %v5302_v46 }
 0x434   :  { %v5306_v34 = vor.u32 %v6099_v14, %v5303_v55 }
 0x435   :  { %6317 = vpow2.f32 %v5288_v50 }
 0x436   :  { %6319 = vpow2.f32 %v5289_v10  ;;  %2420 = vmatpush.bf16.msrb.mxu3 %v5306_v34  ;;  %v182_v10 = vadd.f32 %v6862_v22, %v6825_v63 }
 0x437   :  { %v2088_v52 = vpop.f32.mrf.mxu2  ;;  %v2101_v56 = vpop.f32.mrf.mxu3 }
 0x438   :  { %v2108_v45 = vadd.f32 %v2101_v56, %v211_v28  ;;  %v2064_v2 = vpop.f32.mrf.mxu0  ;;  %v2077_v31 = vpop.f32.mrf.mxu1  ;;  %v2107_v58 = vadd.f32 %v2088_v52, %v182_v10  ;;  %v6161_v10 = vld [vmem:[%s9350_s3 + $0xf4] sm:$0xf0] }
 0x43a   :  { %v5290_v47 = vmul.f32 -1.442695, %v2108_v45 }
 0x43b   :  { %v6318_v18 = vpop.eup %6317 }
 0x43c   :  { %v6320_v7 = vpop.eup %6319  ;;  %v2112_v3 = vadd.f32 1.0, %v6318_v18  ;;  %6321 = vpow2.f32 %v5290_v47 }
 0x43d   :  { %v2131_v4 = vadd.f32 1.0, %v6320_v7  ;;  %v5536_v7 = vld [vmem:[%s9350_s3 + $0xe0] sm:$0xf] }
 0x43e   :  { %6323 = vrcp.f32 %v2112_v3  ;;  %v2124_v25 = vand.u32 2147483648, %v2112_v3  ;;  %v2122_v28 = vand.u32 2147483647, %v2112_v3  ;;  %vm2118_vm15 = vweird.f32 %v2112_v3 }
 0x43f   :  { %6325 = vrcp.f32 %v2131_v4  ;;  %v2090_v48 = vpop.f32.mrf.mxu2  ;;  %v2103_v20 = vpop.f32.mrf.mxu3  ;;  %v2143_v26 = vand.u32 2147483648, %v2131_v4  ;;  %v2141_v35 = vand.u32 2147483647, %v2131_v4  ;;  %vm2137_vm0 = vweird.f32 %v2131_v4 }
 0x440   :  { %v2125_v39 = vor.u32 1.1754944e-38, %v2124_v25  ;;  %vm2123_vm3 = vcmp.eq.f32.partialorder %v2122_v28, 8.507059e+37  ;;  %v5538_v20 = vld [vmem:[%s9350_s3 + $0xf0] sm:$0xf0]  ;;  %v6157_v28 = vld [vmem:[%s9350_s3 + $0xd4] sm:$0xf0] }
 0x441   :  { %v2144_v40 = vor.u32 1.1754944e-38, %v2143_v26  ;;  %vm2142_vm4 = vcmp.eq.f32.partialorder %v2141_v35, 8.507059e+37  ;;  %v5522_v26 = vld [vmem:[%s9350_s3 + $0xd0] sm:$0xf0] }
 0x442   :  { %v6322_v50 = vpop.eup %6321 }
 0x443   :  { %v2151_v24 = vadd.f32 1.0, %v6322_v50  ;;  %v5544_v50 = vld [vmem:[%s9350_s3 + $0xe8] sm:$0xf] }
 0x444   :  { %v6324_v19 = vpop.eup %6323 }
 0x445   :  { %v6326_v32 = vpop.eup %6325  ;;  %v2114_v1 = vmul.f32 %v6324_v19, %v2112_v3  ;;  %6327 = vrcp.f32 %v2151_v24  ;;  %vm2119_vm13 = vweird.f32 %v6324_v19  ;;  %v2163_v16 = vand.u32 2147483648, %v2151_v24  ;;  %v6160_v3 = vld [vmem:[%s9350_s3 + $0xec] sm:$0xf0] }
 0x446   :  { %v2133_v11 = vmul.f32 %v6326_v32, %v2131_v4  ;;  %6329 = vtanh.f32 %v2107_v58  ;;  %vm2138_vm14 = vweird.f32 %v6326_v32  ;;  %vm2120_vm1 = vmor %vm2118_vm15, %vm2119_vm13  ;;  %vm2157_vm6 = vweird.f32 %v2151_v24  ;;  %v6158_v4 = vld [vmem:[%s9350_s3 + $0xe4] sm:$0xf]  ;;  %v6159_v58 = vld [vmem:[%s9350_s3 + $0xec] sm:$0xf] }
 0x447   :  { %v2115_v17 = vsub.f32 1.0, %v2114_v1  ;;  %vm2139_vm2 = vmor %vm2137_vm0, %vm2138_vm14  ;;  %v2161_v46 = vand.u32 2147483647, %v2151_v24  ;;  %v2164_v55 = vor.u32 1.1754944e-38, %v2163_v16  ;;  %v5537_v48 = vor.u32 %v6160_v3, %v5536_v7  ;;  %v6148_v16 = vld [vmem:[%s9350_s3 + $0x8c] sm:$0xf0] }
 0x448   :  { %v2134_v12 = vsub.f32 1.0, %v2133_v11  ;;  %v5520_v11 = vld [vmem:[%s9350_s3 + $0xc0] sm:$0xf]  ;;  %v6147_v3 = vld [vmem:[%s9350_s3 + $0x8c] sm:$0xf] }
 0x449   :  { %v2116_v15 = vmul.f32 %v6324_v19, %v2115_v17  ;;  %vm2162_vm8 = vcmp.eq.f32.partialorder %v2161_v46, 8.507059e+37  ;;  %2695 = vmatpush.bf16.msra.mxu0 %v5537_v48  ;;  %v6156_v17 = vld [vmem:[%s9350_s3 + $0xcc] sm:$0xf0]  ;;  %v6146_v46 = vld [vmem:[%s9350_s3 + $0x84] sm:$0xf] }
 0x44a   :  { %v2135_v29 = vmul.f32 %v6326_v32, %v2134_v12  ;;  %v6154_v12 = vld [vmem:[%s9350_s3 + $0xc4] sm:$0xf]  ;;  %v5521_v25 = vor.u32 %v6156_v17, %v5520_v11  ;;  %v6143_v17 = vld [vmem:[%s9350_s3 + $0x6c] sm:$0xf] }
 0x44b   :  { %v6328_v59 = vpop.eup %6327  ;;  %v2117_v22 = vadd.f32 %v6324_v19, %v2116_v15  ;;  %v5528_v15 = vld [vmem:[%s9350_s3 + $0xc8] sm:$0xf] }
 0x44c   :  { %v2136_v52 = vadd.f32 %v6326_v32, %v2135_v29  ;;  %v2153_v56 = vmul.f32 %v6328_v59, %v2151_v24  ;;  %v6330_v23 = vpop.eup %6329  ;;  %vm2158_vm5 = vweird.f32 %v6328_v59  ;;  %v5541_v24 = vor.u32 %v6158_v4, %v5538_v20  ;;  %v5498_v4 = vld [vmem:[%s9350_s3 + $0x98] sm:$0xf0]  ;;  %v5472_v20 = vld [vmem:[%s9350_s3 + $0x60] sm:$0xf] }
 0x44d   :  { %v2121_v41 = vsel %vm2120_vm1, %v6324_v19, %v2117_v22  ;;  %vm2159_vm7 = vmor %vm2157_vm6, %vm2158_vm5  ;;  %v5545_v19 = vor.u32 %v6161_v10, %v5544_v50  ;;  %v5525_v29 = vor.u32 %v6154_v12, %v5522_v26  ;;  %v5529_v35 = vor.u32 %v6157_v28, %v5528_v15  ;;  %v5530_v22 = vld [vmem:[%s9350_s3 + $0xd8] sm:$0xf0]  ;;  %2696 = vmatpush.bf16.msra.mxu0 %v5521_v25  ;;  %v6144_v50 = vld [vmem:[%s9350_s3 + $0x6c] sm:$0xf0] }
 0x44e   :  { %v2126_v37 = vsel %vm2123_vm3, %v2125_v39, %v2121_v41  ;;  %v2140_v5 = vsel %vm2139_vm2, %v6326_v32, %v2136_v52  ;;  %v2154_v45 = vsub.f32 1.0, %v2153_v56  ;;  %v5546_v32 = vld [vmem:[%s9350_s3 + $0xf8] sm:$0xf0]  ;;  %2708 = vmatpush.bf16.msrb.mxu1 %v5541_v24  ;;  %v5504_v52 = vld [vmem:[%s9350_s3 + $0xa0] sm:$0xf]  ;;  %v5501_v48 = vor.u32 %v6147_v3, %v5498_v4 }
 0x44f   :  { %v2145_v2 = vsel %vm2142_vm4, %v2144_v40, %v2140_v5  ;;  %v2168_v31 = vmul.f32 %v6330_v23, %v2126_v37  ;;  %v5549_v1 = vor.u32 %v6159_v58, %v5546_v32  ;;  %2721 = vmatpush.bf16.msra.mxu2 %v5545_v19  ;;  %v6152_v56 = vld [vmem:[%s9350_s3 + $0xac] sm:$0xf0]  ;;  %v6150_v40 = vld [vmem:[%s9350_s3 + $0xa4] sm:$0xf]  ;;  %v5506_v23 = vld [vmem:[%s9350_s3 + $0xb0] sm:$0xf0]  ;;  %v5473_v24 = vor.u32 %v6144_v50, %v5472_v20 }
 0x450   :  { %v2167_v9 = vmul.f32 %v2145_v2, %v7931_v60  ;;  %v2155_v36 = vmul.f32 %v6328_v59, %v2154_v45  ;;  %v5505_v41 = vor.u32 %v6152_v56, %v5504_v52  ;;  %v5512_v37 = vld [vmem:[%s9350_s3 + $0xa8] sm:$0xf]  ;;  %v6153_v5 = vld [vmem:[%s9350_s3 + $0xb4] sm:$0xf0]  ;;  %v5509_v45 = vor.u32 %v6150_v40, %v5506_v23  ;;  %v6142_v10 = vld [vmem:[%s9350_s3 + $0x64] sm:$0xf] }
 0x451   :  { %2734 = vmatpush.bf16.msra.mxu3 %v5549_v1  ;;  %v5513_v2 = vor.u32 %v6153_v5, %v5512_v37  ;;  %v5474_v19 = vld [vmem:[%s9350_s3 + $0x70] sm:$0xf0]  ;;  %v5480_v58 = vld [vmem:[%s9350_s3 + $0x68] sm:$0xf]  ;;  %v6145_v32 = vld [vmem:[%s9350_s3 + $0x74] sm:$0xf0] }
 0x452   :  { %v8139_v6 = vadd.f32 %v2168_v31, %v2167_v9  ;;  %v2156_v61 = vadd.f32 %v6328_v59, %v2155_v36  ;;  %2709 = vmatpush.bf16.msrb.mxu1 %v5525_v29  ;;  %v6151_v31 = vld [vmem:[%s9350_s3 + $0xac] sm:$0xf]  ;;  %v5514_v9 = vld [vmem:[%s9350_s3 + $0xb8] sm:$0xf0]  ;;  %2697 = vmatpush.bf16.msra.mxu0 %v5505_v41  ;;  %v5477_v1 = vor.u32 %v6142_v10, %v5474_v19  ;;  %v5456_v26 = vld [vmem:[%s9350_s3 + $0x40] sm:$0xf] }
 0x453   :  { %2722 = vmatpush.bf16.msra.mxu2 %v5529_v35  ;;  %v5517_v36 = vor.u32 %v6151_v31, %v5514_v9  ;;  %v5481_v11 = vor.u32 %v6145_v32, %v5480_v58  ;;  %v5482_v12 = vld [vmem:[%s9350_s3 + $0x78] sm:$0xf0]  ;;  %v6140_v15 = vld [vmem:[%s9350_s3 + $0x4c] sm:$0xf0]  ;;  %v6138_v28 = vld [vmem:[%s9350_s3 + $0x44] sm:$0xf] }
 0x454   :  { %6331 = vtanh.f32 %v8139_v6  ;;  %v2160_v14 = vsel %vm2159_vm7, %v6328_v59, %v2156_v61  ;;  %v6155_v59 = vld [vmem:[%s9350_s3 + $0xcc] sm:$0xf]  ;;  %v5488_v61 = vld [vmem:[%s9350_s3 + $0x80] sm:$0xf]  ;;  %v5485_v25 = vor.u32 %v6143_v17, %v5482_v12  ;;  %v5457_v29 = vor.u32 %v6140_v15, %v5456_v26  ;;  %v5458_v35 = vld [vmem:[%s9350_s3 + $0x50] sm:$0xf0] }
 0x455   :  { %v2165_v18 = vsel %vm2162_vm8, %v2164_v55, %v2160_v14  ;;  %v5533_v39 = vor.u32 %v6155_v59, %v5530_v22  ;;  %v5489_v14 = vor.u32 %v6148_v16, %v5488_v61  ;;  %v5490_v55 = vld [vmem:[%s9350_s3 + $0x90] sm:$0xf0]  ;;  %v5464_v59 = vld [vmem:[%s9350_s3 + $0x48] sm:$0xf]  ;;  %v6141_v22 = vld [vmem:[%s9350_s3 + $0x54] sm:$0xf0] }
 0x456   :  { %2710 = vmatpush.bf16.msrb.mxu1 %v5509_v45  ;;  %v5465_v52 = vor.u32 %v6141_v22, %v5464_v59  ;;  %v6139_v56 = vld [vmem:[%s9350_s3 + $0x4c] sm:$0xf]  ;;  %v5466_v40 = vld [vmem:[%s9350_s3 + $0x58] sm:$0xf0]  ;;  %v5440_v23 = vld [vmem:[%s9350_s3 + $0x20] sm:$0xf] }
 0x457   :  { %2735 = vmatpush.bf16.msra.mxu3 %v5533_v39  ;;  %2723 = vmatpush.bf16.msra.mxu2 %v5513_v2  ;;  %v5461_v39 = vor.u32 %v6138_v28, %v5458_v35  ;;  %v5469_v41 = vor.u32 %v6139_v56, %v5466_v40  ;;  %v6136_v37 = vld [vmem:[%s9350_s3 + $0x2c] sm:$0xf0]  ;;  %v6134_v5 = vld [vmem:[%s9350_s3 + $0x24] sm:$0xf]  ;;  %v5442_v2 = vld [vmem:[%s9350_s3 + $0x30] sm:$0xf0] }
 0x458   :  { %2698 = vmatpush.bf16.msra.mxu0 %v5489_v14  ;;  %v5441_v45 = vor.u32 %v6136_v37, %v5440_v23  ;;  %v5448_v31 = vld [vmem:[%s9350_s3 + $0x28] sm:$0xf]  ;;  %v6137_v9 = vld [vmem:[%s9350_s3 + $0x34] sm:$0xf0]  ;;  %v6135_v16 = vld [vmem:[%s9350_s3 + $0x2c] sm:$0xf] }
 0x459   :  { %v5449_v61 = vor.u32 %v6137_v9, %v5448_v31  ;;  %v5432_v3 = vld [vmem:[%s9350_s3 + $0x8] sm:$0xf]  ;;  %v6133_v4 = vld [vmem:[%s9350_s3 + $0x14] sm:$0xf0]  ;;  %v6131_v50 = vld [vmem:[%s9350_s3 + $0xc] sm:$0xf] }
 0x45a   :  { %v6332_v47 = vpop.eup %6331  ;;  %v5433_v20 = vor.u32 %v6133_v4, %v5432_v3  ;;  %v5434_v10 = vld [vmem:[%s9350_s3 + $0x18] sm:$0xf0]  ;;  %v6192_v58 = vld [vmem:[%s9352_s2 + $0xec] sm:$0xf0]  ;;  %v6190_v32 = vld [vmem:[%s9352_s2 + $0xe4] sm:$0xf] }
 0x45b   :  { %v8142_v34 = vmul.f32 %v6332_v47, %v2165_v18  ;;  %2736 = vmatpush.bf16.msra.mxu3 %v5517_v36  ;;  %v5496_v47 = vld [vmem:[%s9350_s3 + $0x88] sm:$0xf]  ;;  %v6149_v18 = vld [vmem:[%s9350_s3 + $0x94] sm:$0xf0]  ;;  %v5445_v36 = vor.u32 %v6134_v5, %v5442_v2  ;;  %v5437_v19 = vor.u32 %v6131_v50, %v5434_v10  ;;  %v6191_v28 = vld [vmem:[%s9352_s2 + $0xec] sm:$0xf] }
 0x45c   :  { %v5497_v7 = vor.u32 %v6149_v18, %v5496_v47  ;;  %2699 = vmatpush.bf16.msra.mxu0 %v5473_v24  ;;  %v6132_v47 = vld [vmem:[%s9350_s3 + $0xc] sm:$0xf0]  ;;  %v6130_v18 = vld [vmem:[%s9350_s3 + $0x4] sm:$0xf]  ;;  %v5668_v24 = vld [vmem:[%s9352_s2 + $0xe0] sm:$0xf] }
 0x45d   :  { %v2181_v60 = vpack.c.bf16 %v8142_v34, %v8142_v34  ;;  %v5669_v12 = vor.u32 %v6192_v58, %v5668_v24  ;;  %v5676_v26 = vld [vmem:[%s9352_s2 + $0xe8] sm:$0xf]  ;;  %v6193_v15 = vld [vmem:[%s9352_s2 + $0xf4] sm:$0xf0]  ;;  %v5678_v22 = vld [vmem:[%s9352_s2 + $0xf8] sm:$0xf0] }
 0x45e   :  { %2724 = vmatpush.bf16.msra.mxu2 %v5497_v7  ;;  %v5426_v7 = vld [vmem:[%s9350_s3 + $0x10] sm:$0xf0]  ;;  %v5677_v59 = vor.u32 %v6193_v15, %v5676_v26  ;;  %v5681_v56 = vor.u32 %v6191_v28, %v5678_v22  ;;  %v6187_v31 = vld [vmem:[%s9352_s2 + $0xcc] sm:$0xf]  ;;  %v5662_v9 = vld [vmem:[%s9352_s2 + $0xd8] sm:$0xf0] }
 0x45f   :  { %2382 = vmatmul.bf16.vlgmr.msrb.gmra.mxu0 %v2181_v60  ;;  %2395 = vmatmul.bf16.vlgmr.msra.gmra.mxu1 %v2181_v60  ;;  %v5654_v40 = vld [vmem:[%s9352_s2 + $0xd0] sm:$0xf0]  ;;  %v5620_v50 = vld [vmem:[%s9352_s2 + $0x80] sm:$0xf]  ;;  %v6180_v10 = vld [vmem:[%s9352_s2 + $0x8c] sm:$0xf0] }
 0x460   :  { %2408 = vmatmul.bf16.vlgmr.msrb.gmra.mxu2 %v2181_v60  ;;  %2421 = vmatmul.bf16.vlgmr.msrb.gmra.mxu3 %v2181_v60  ;;  %v5493_v60 = vor.u32 %v6146_v46, %v5490_v55  ;;  %v5450_v46 = vld [vmem:[%s9350_s3 + $0x38] sm:$0xf0]  ;;  %v5424_v55 = vld [vmem:[%s9350_s3] sm:$0xf]  ;;  %v5621_v15 = vor.u32 %v6180_v10, %v5620_v50  ;;  %v6171_v10 = vld [vmem:[%s9352_s2 + $0x4c] sm:$0xf] }
 0x461   :  { %2737 = vmatpush.bf16.msra.mxu3 %v5501_v48  ;;  %2700 = vmatpush.bf16.msra.mxu0 %v5457_v29  ;;  %v5453_v14 = vor.u32 %v6135_v16, %v5450_v46  ;;  %v5429_v48 = vor.u32 %v6130_v18, %v5426_v7  ;;  %v6184_v16 = vld [vmem:[%s9352_s2 + $0xac] sm:$0xf0]  ;;  %v6182_v46 = vld [vmem:[%s9352_s2 + $0xa4] sm:$0xf]  ;;  %v5644_v18 = vld [vmem:[%s9352_s2 + $0xa8] sm:$0xf] }
 0x462   :  { %2711 = vmatpush.bf16.msrb.mxu1 %v5493_v60  ;;  %2725 = vmatpush.bf16.msra.mxu2 %v5481_v11  ;;  %v5425_v60 = vor.u32 %v6132_v47, %v5424_v55  ;;  %v6183_v7 = vld [vmem:[%s9352_s2 + $0xac] sm:$0xf] }
 0x465   :  { %2738 = vmatpush.bf16.msra.mxu3 %v5485_v25  ;;  %2701 = vmatpush.bf16.msra.mxu0 %v5441_v45  ;;  %v6189_v45 = vld [vmem:[%s9352_s2 + $0xd4] sm:$0xf0] }
 0x466   :  { %2712 = vmatpush.bf16.msrb.mxu1 %v5477_v1  ;;  %2726 = vmatpush.bf16.msra.mxu2 %v5465_v52  ;;  %v5670_v1 = vld [vmem:[%s9352_s2 + $0xf0] sm:$0xf0]  ;;  %v6188_v52 = vld [vmem:[%s9352_s2 + $0xcc] sm:$0xf0] }
 0x467   :  { %v5673_v25 = vor.u32 %v6190_v32, %v5670_v1  ;;  %v6178_v1 = vld [vmem:[%s9352_s2 + $0x84] sm:$0xf] }
 0x469   :  { %2739 = vmatpush.bf16.msra.mxu3 %v5469_v41  ;;  %2702 = vmatpush.bf16.msra.mxu0 %v5425_v60  ;;  %v5660_v41 = vld [vmem:[%s9352_s2 + $0xc8] sm:$0xf]  ;;  %v6185_v60 = vld [vmem:[%s9352_s2 + $0xb4] sm:$0xf0] }
 0x46a   :  { %2713 = vmatpush.bf16.msrb.mxu1 %v5461_v39  ;;  %2727 = vmatpush.bf16.msra.mxu2 %v5449_v61  ;;  %v5652_v39 = vld [vmem:[%s9352_s2 + $0xc0] sm:$0xf]  ;;  %v5661_v2 = vor.u32 %v6189_v45, %v5660_v41  ;;  %v5665_v61 = vor.u32 %v6187_v31, %v5662_v9  ;;  %v6177_v31 = vld [vmem:[%s9352_s2 + $0x74] sm:$0xf0] }
 0x46d   :  { %2740 = vmatpush.bf16.msra.mxu3 %v5453_v14  ;;  %3031 = vmatpush.bf16.msrb.mxu0 %v5669_v12  ;;  %v5638_v14 = vld [vmem:[%s9352_s2 + $0xb0] sm:$0xf0]  ;;  %v6179_v12 = vld [vmem:[%s9352_s2 + $0x8c] sm:$0xf] }
 0x46e   :  { %2714 = vmatpush.bf16.msrb.mxu1 %v5445_v36  ;;  %2728 = vmatpush.bf16.msra.mxu2 %v5433_v20  ;;  %v5636_v36 = vld [vmem:[%s9352_s2 + $0xa0] sm:$0xf]  ;;  %v5641_v47 = vor.u32 %v6182_v46, %v5638_v14  ;;  %v5646_v20 = vld [vmem:[%s9352_s2 + $0xb8] sm:$0xf0] }
 0x46f   :  { %v5637_v55 = vor.u32 %v6184_v16, %v5636_v36  ;;  %v5649_v32 = vor.u32 %v6183_v7, %v5646_v20  ;;  %v6175_v16 = vld [vmem:[%s9352_s2 + $0x6c] sm:$0xf]  ;;  %v5614_v46 = vld [vmem:[%s9352_s2 + $0x78] sm:$0xf0]  ;;  %v5588_v14 = vld [vmem:[%s9352_s2 + $0x40] sm:$0xf] }
 0x471   :  { %2741 = vmatpush.bf16.msra.mxu3 %v5437_v19 }
 0x472   :  { %2715 = vmatpush.bf16.msrb.mxu1 %v5429_v48  ;;  %3089 = vmatpush.bf16.msrb.mxu2 %v5677_v59  ;;  %v5645_v48 = vor.u32 %v6185_v60, %v5644_v18  ;;  %v6170_v18 = vld [vmem:[%s9352_s2 + $0x44] sm:$0xf] }
 0x475   :  { %3118 = vmatpush.bf16.msrb.mxu3 %v5681_v56  ;;  %v5604_v56 = vld [vmem:[%s9352_s2 + $0x60] sm:$0xf] }
 0x476   :  { %3060 = vmatpush.bf16.msra.mxu1 %v5673_v25  ;;  %3090 = vmatpush.bf16.msrb.mxu2 %v5661_v2  ;;  %v5630_v25 = vld [vmem:[%s9352_s2 + $0x98] sm:$0xf0]  ;;  %v5612_v2 = vld [vmem:[%s9352_s2 + $0x68] sm:$0xf] }
 0x479   :  { %3119 = vmatpush.bf16.msrb.mxu3 %v5665_v61  ;;  %v5613_v61 = vor.u32 %v6177_v31, %v5612_v2  ;;  %v6164_v2 = vld [vmem:[%s9352_s2 + $0xc] sm:$0xf0]  ;;  %v6162_v31 = vld [vmem:[%s9352_s2 + $0x4] sm:$0xf] }
 0x47a   :  { %3091 = vmatpush.bf16.msrb.mxu2 %v5645_v48  ;;  %v6173_v48 = vld [vmem:[%s9352_s2 + $0x54] sm:$0xf0] }
 0x47d   :  { %3120 = vmatpush.bf16.msrb.mxu3 %v5649_v32 }
 0x4dc   :  { %v2383_v11 = vpop.f32.mrf.mxu0  ;;  %v2396_v17 = vpop.f32.mrf.mxu1 }
 0x4dd   :  { %v2426_v29 = vadd.f32 %v2383_v11, %v6806_v54  ;;  %v2427_v35 = vadd.f32 %v2396_v17, %v6909_v53  ;;  %v5653_v54 = vor.u32 %v6188_v52, %v5652_v39  ;;  %v6186_v53 = vld [vmem:[%s9352_s2 + $0xc4] sm:$0xf]  ;;  %v5622_v11 = vld [vmem:[%s9352_s2 + $0x90] sm:$0xf0]  ;;  %v5628_v17 = vld [vmem:[%s9352_s2 + $0x88] sm:$0xf]  ;;  %v5633_v39 = vor.u32 %v6179_v12, %v5630_v25 }
 0x4de   :  { %v5657_v5 = vor.u32 %v6186_v53, %v5654_v40  ;;  %v5625_v28 = vor.u32 %v6178_v1, %v5622_v11  ;;  %v6176_v40 = vld [vmem:[%s9352_s2 + $0x6c] sm:$0xf0] }
 0x4df   :  { %v5419_v23 = vmul.f32 -1.442695, %v2426_v29  ;;  %v5420_v37 = vmul.f32 -1.442695, %v2427_v35  ;;  %3032 = vmatpush.bf16.msrb.mxu0 %v5653_v54  ;;  %3121 = vmatpush.bf16.msrb.mxu3 %v5633_v39  ;;  %v5605_v41 = vor.u32 %v6176_v40, %v5604_v56  ;;  %v6168_v11 = vld [vmem:[%s9352_s2 + $0x2c] sm:$0xf0] }
 0x4e0   :  { %3061 = vmatpush.bf16.msra.mxu1 %v5657_v5  ;;  %v5580_v39 = vld [vmem:[%s9352_s2 + $0x28] sm:$0xf]  ;;  %v6167_v40 = vld [vmem:[%s9352_s2 + $0x2c] sm:$0xf] }
 0x4e1   :  { %6333 = vpow2.f32 %v5419_v23  ;;  %v6174_v23 = vld [vmem:[%s9352_s2 + $0x64] sm:$0xf] }
 0x4e2   :  { %6335 = vpow2.f32 %v5420_v37  ;;  %v5606_v37 = vld [vmem:[%s9352_s2 + $0x70] sm:$0xf0] }
 0x4e3   :  { %v2409_v3 = vpop.f32.mrf.mxu2  ;;  %v2422_v4 = vpop.f32.mrf.mxu3  ;;  %3033 = vmatpush.bf16.msrb.mxu0 %v5637_v55  ;;  %v5609_v45 = vor.u32 %v6174_v23, %v5606_v37 }
 0x4e4   :  { %v2429_v24 = vadd.f32 %v2422_v4, %v6873_v33  ;;  %v2385_v19 = vpop.f32.mrf.mxu0  ;;  %v2398_v58 = vpop.f32.mrf.mxu1  ;;  %v6181_v33 = vld [vmem:[%s9352_s2 + $0x94] sm:$0xf0]  ;;  %3062 = vmatpush.bf16.msra.mxu1 %v5641_v47  ;;  %v2428_v36 = vadd.f32 %v2409_v3, %v6870_v30  ;;  %v5617_v47 = vor.u32 %v6175_v16, %v5614_v46  ;;  %v6172_v30 = vld [vmem:[%s9352_s2 + $0x4c] sm:$0xf0]  ;;  %v5590_v3 = vld [vmem:[%s9352_s2 + $0x50] sm:$0xf0] }
 0x4e5   :  { %v5629_v35 = vor.u32 %v6181_v33, %v5628_v17  ;;  %v5589_v7 = vor.u32 %v6172_v30, %v5588_v14  ;;  %v5596_v4 = vld [vmem:[%s9352_s2 + $0x48] sm:$0xf]  ;;  %v5572_v19 = vld [vmem:[%s9352_s2 + $0x20] sm:$0xf]  ;;  %v5593_v33 = vor.u32 %v6170_v18, %v5590_v3  ;;  %v5558_v16 = vld [vmem:[%s9352_s2 + $0x10] sm:$0xf0] }
 0x4e6   :  { %v5421_v26 = vmul.f32 -1.442695, %v2429_v24  ;;  %3122 = vmatpush.bf16.msrb.mxu3 %v5617_v47  ;;  %v5598_v24 = vld [vmem:[%s9352_s2 + $0x58] sm:$0xf0]  ;;  %v5597_v12 = vor.u32 %v6173_v48, %v5596_v4  ;;  %v5564_v46 = vld [vmem:[%s9352_s2 + $0x8] sm:$0xf] }
 0x4e7   :  { %v6334_v29 = vpop.eup %6333  ;;  %3034 = vmatpush.bf16.msrb.mxu0 %v5621_v15  ;;  %3092 = vmatpush.bf16.msrb.mxu2 %v5629_v35  ;;  %v5601_v25 = vor.u32 %v6171_v10, %v5598_v24  ;;  %v5574_v15 = vld [vmem:[%s9352_s2 + $0x30] sm:$0xf0]  ;;  %v6165_v14 = vld [vmem:[%s9352_s2 + $0x14] sm:$0xf0]  ;;  %v6163_v3 = vld [vmem:[%s9352_s2 + $0xc] sm:$0xf] }
 0x4e8   :  { %v6336_v59 = vpop.eup %6335  ;;  %v8437_v22 = vadd.f32 1.0, %v6334_v29  ;;  %6337 = vpow2.f32 %v5421_v26  ;;  %3063 = vmatpush.bf16.msra.mxu1 %v5625_v28  ;;  %v6166_v26 = vld [vmem:[%s9352_s2 + $0x24] sm:$0xf]  ;;  %v5566_v4 = vld [vmem:[%s9352_s2 + $0x18] sm:$0xf0]  ;;  %v5565_v10 = vor.u32 %v6165_v14, %v5564_v46 }
 0x4e9   :  { %v8439_v52 = vadd.f32 1.0, %v6336_v59  ;;  %v5573_v59 = vor.u32 %v6168_v11, %v5572_v19 }
 0x4ea   :  { %6339 = vrcp.f32 %v8437_v22  ;;  %v2443_v5 = vand.u32 2147483647, %v8437_v22  ;;  %v2445_v1 = vand.u32 2147483648, %v8437_v22  ;;  %3123 = vmatpush.bf16.msrb.mxu3 %v5601_v25  ;;  %vm2439_vm13 = vweird.f32 %v8437_v22 }
 0x4eb   :  { %6341 = vrcp.f32 %v8439_v52  ;;  %v2411_v54 = vpop.f32.mrf.mxu2  ;;  %v2424_v53 = vpop.f32.mrf.mxu3  ;;  %3035 = vmatpush.bf16.msrb.mxu0 %v5605_v41  ;;  %3093 = vmatpush.bf16.msrb.mxu2 %v5613_v61  ;;  %v2464_v32 = vand.u32 2147483648, %v8439_v52  ;;  %v2462_v35 = vand.u32 2147483647, %v8439_v52  ;;  %v5582_v41 = vld [vmem:[%s9352_s2 + $0x38] sm:$0xf0]  ;;  %vm2458_vm12 = vweird.f32 %v8439_v52 }
 0x4ec   :  { %3064 = vmatpush.bf16.msra.mxu1 %v5609_v45  ;;  %vm8518_vm9 = vcmp.eq.f32.partialorder %v2443_v5, 8.507059e+37  ;;  %v5577_v54 = vor.u32 %v6166_v26, %v5574_v15  ;;  %v6169_v53 = vld [vmem:[%s9352_s2 + $0x34] sm:$0xf0]  ;;  %v5585_v5 = vor.u32 %v6167_v40, %v5582_v41  ;;  %v5556_v45 = vld [vmem:[%s9352_s2] sm:$0xf]  ;;  %v2446_v18 = vor.u32 1.1754944e-38, %v2445_v1 }
 0x4ed   :  { %v5581_v37 = vor.u32 %v6169_v53, %v5580_v39  ;;  %v5557_v61 = vor.u32 %v6164_v2, %v5556_v45  ;;  %v2465_v30 = vor.u32 1.1754944e-38, %v2464_v32  ;;  %vm2463_vm0 = vcmp.eq.f32.partialorder %v2462_v35, 8.507059e+37  ;;  %v6222_v39 = vld [vmem:[%s9350_s3 + $0x1e4] sm:$0xf]  ;;  %v6223_v40 = vld [vmem:[%s9350_s3 + $0x1ec] sm:$0xf] }
 0x4ee   :  { %v6338_v9 = vpop.eup %6337  ;;  %3124 = vmatpush.bf16.msrb.mxu3 %v5585_v5  ;;  %v5569_v32 = vor.u32 %v6163_v3, %v5566_v4  ;;  %v2826_v35 = vpack.c.bf16 %v7318_v44, %v7110_v43  ;;  %v5830_v43 = vld [vmem:[%s9350_s3 + $0x1f0] sm:$0xf0]  ;;  %v2828_v53 = vpack.c.bf16 %v8142_v34, %v7934_v27  ;;  %v5838_v41 = vld [vmem:[%s9350_s3 + $0x1f8] sm:$0xf0]  ;;  %v6225_v27 = vld [vmem:[%s9350_s3 + $0x1f4] sm:$0xf0] }
 0x4ef   :  { %v8472_v55 = vadd.f32 1.0, %v6338_v9  ;;  %3036 = vmatpush.bf16.msrb.mxu0 %v5589_v7  ;;  %3094 = vmatpush.bf16.msrb.mxu2 %v5597_v12  ;;  %v8605_v44 = vor.u32 %v6222_v39, %v5830_v43  ;;  %v5798_v4 = vld [vmem:[%s9350_s3 + $0x1b0] sm:$0xf0]  ;;  %v6208_v39 = vld [vmem:[%s9350_s3 + $0x16c] sm:$0xf0] }
 0x4f0   :  { %v8480_v60 = vpop.eup %6339  ;;  %3065 = vmatpush.bf16.msra.mxu1 %v5593_v33  ;;  %v6206_v43 = vld [vmem:[%s9350_s3 + $0x164] sm:$0xf] }
 0x4f1   :  { %v8491_v20 = vpop.eup %6341  ;;  %v2435_v50 = vmul.f32 %v8480_v60, %v8437_v22  ;;  %6343 = vrcp.f32 %v8472_v55  ;;  %vm2440_vm10 = vweird.f32 %v8480_v60  ;;  %vm2478_vm2 = vweird.f32 %v8472_v55 }
 0x4f2   :  { %v2454_v58 = vmul.f32 %v8491_v20, %v8439_v52  ;;  %6345 = vtanh.f32 %v2428_v36  ;;  %vm2459_vm11 = vweird.f32 %v8491_v20  ;;  %vm2441_vm14 = vmor %vm2439_vm13, %vm2440_vm10  ;;  %3125 = vmatpush.bf16.msrb.mxu3 %v5569_v32  ;;  %v2482_v12 = vand.u32 2147483647, %v8472_v55  ;;  %v5780_v32 = vld [vmem:[%s9350_s3 + $0x180] sm:$0xf] }
 0x4f3   :  { %v2436_v17 = vsub.f32 1.0, %v2435_v50  ;;  %3037 = vmatpush.bf16.msrb.mxu0 %v5573_v59  ;;  %vm2460_vm15 = vmor %vm2458_vm12, %vm2459_vm11  ;;  %3095 = vmatpush.bf16.msrb.mxu2 %v5581_v37  ;;  %v5561_v50 = vor.u32 %v6162_v31, %v5558_v16  ;;  %v6224_v59 = vld [vmem:[%s9350_s3 + $0x1ec] sm:$0xf0]  ;;  %v158_v37 = vadd.f32 %v6963_v13, %v6841_v8  ;;  %v5814_v8 = vld [vmem:[%s9350_s3 + $0x1d0] sm:$0xf0] }
 0x4f4   :  { %v2455_v28 = vsub.f32 1.0, %v2454_v58  ;;  %3066 = vmatpush.bf16.msra.mxu1 %v5577_v54  ;;  %vm2483_vm4 = vcmp.eq.f32.partialorder %v2482_v12, 8.507059e+37  ;;  %v2827_v54 = vpack.c.bf16 %v7730_v62, %v7522_v21  ;;  %v8619_v21 = vor.u32 %v6223_v40, %v5838_v41  ;;  %v5836_v62 = vld [vmem:[%s9350_s3 + $0x1e8] sm:$0xf]  ;;  %v6219_v13 = vld [vmem:[%s9350_s3 + $0x1cc] sm:$0xf] }
 0x4f5   :  { %v2437_v56 = vmul.f32 %v8480_v60, %v2436_v17  ;;  %v8628_v34 = vor.u32 %v6225_v27, %v5836_v62  ;;  %v5766_v40 = vld [vmem:[%s9350_s3 + $0x170] sm:$0xf0]  ;;  %v6207_v41 = vld [vmem:[%s9350_s3 + $0x16c] sm:$0xf]  ;;  %v5774_v27 = vld [vmem:[%s9350_s3 + $0x178] sm:$0xf0] }
 0x4f6   :  { %v2456_v23 = vmul.f32 %v8491_v20, %v2455_v28 }
 0x4f7   :  { %v6344_v9 = vpop.eup %6343  ;;  %v2438_v36 = vadd.f32 %v8480_v60, %v2437_v56  ;;  %3038 = vmatpush.bf16.msrb.mxu0 %v5557_v61  ;;  %3096 = vmatpush.bf16.msrb.mxu2 %v5565_v10  ;;  %v5822_v61 = vld [vmem:[%s9350_s3 + $0x1d8] sm:$0xf0]  ;;  %v216_v10 = vadd.f32 %v6894_v42, %v6827_v0 }
 0x4f8   :  { %v6346_v47 = vpop.eup %6345  ;;  %v2457_v22 = vadd.f32 %v8491_v20, %v2456_v23  ;;  %v2474_v7 = vmul.f32 %v6344_v9, %v8472_v55  ;;  %3067 = vmatpush.bf16.msra.mxu1 %v5561_v50  ;;  %vm2479_vm1 = vweird.f32 %v6344_v9  ;;  %v129_v23 = vadd.f32 %v6814_v57, %v6803_v51  ;;  %v6218_v51 = vld [vmem:[%s9350_s3 + $0x1c4] sm:$0xf]  ;;  %v5806_v50 = vld [vmem:[%s9350_s3 + $0x1b8] sm:$0xf0] }
 0x4f9   :  { %v2442_v48 = vsel %vm2441_vm14, %v8480_v60, %v2438_v36  ;;  %vm2480_vm3 = vmor %vm2478_vm2, %vm2479_vm1  ;;  %v6220_v36 = vld [vmem:[%s9350_s3 + $0x1cc] sm:$0xf0]  ;;  %v8655_v14 = vor.u32 %v6218_v51, %v5814_v8  ;;  %v5748_v51 = vld [vmem:[%s9350_s3 + $0x140] sm:$0xf] }
 0x4fa   :  { %v2447_v24 = vsel %vm8518_vm9, %v2446_v18, %v2442_v48  ;;  %v2461_v19 = vsel %vm2460_vm15, %v8491_v20, %v2457_v22  ;;  %v2475_v58 = vsub.f32 1.0, %v2474_v7  ;;  %v2484_v20 = vand.u32 2147483648, %v8472_v55  ;;  %v5828_v55 = vld [vmem:[%s9350_s3 + $0x1e0] sm:$0xf]  ;;  %v6216_v22 = vld [vmem:[%s9350_s3 + $0x1ac] sm:$0xf0] }
 0x4fb   :  { %v2466_v1 = vsel %vm2463_vm0, %v2465_v30, %v2461_v19  ;;  %v2489_v11 = vmul.f32 %v6346_v47, %v2447_v24  ;;  %v8600_v56 = vor.u32 %v6224_v59, %v5828_v55  ;;  %v8657_v47 = vor.u32 %v6219_v13, %v5822_v61  ;;  %v5820_v30 = vld [vmem:[%s9350_s3 + $0x1c8] sm:$0xf]  ;;  %v5796_v18 = vld [vmem:[%s9350_s3 + $0x1a0] sm:$0xf]  ;;  %v6214_v7 = vld [vmem:[%s9350_s3 + $0x1a4] sm:$0xf] }
 0x4fc   :  { %v2488_v52 = vmul.f32 %v2466_v1, %v8139_v6  ;;  %v2476_v17 = vmul.f32 %v6344_v9, %v2475_v58  ;;  %v2485_v26 = vor.u32 1.1754944e-38, %v2484_v20  ;;  %v8674_v3 = vor.u32 %v6216_v22, %v5796_v18  ;;  %v6215_v48 = vld [vmem:[%s9350_s3 + $0x1ac] sm:$0xf]  ;;  %v6221_v58 = vld [vmem:[%s9350_s3 + $0x1d4] sm:$0xf0] }
 0x4fd   :  { %v8687_v24 = vor.u32 %v6214_v7, %v5798_v4  ;;  %v8689_v19 = vor.u32 %v6215_v48, %v5806_v50  ;;  %v6212_v1 = vld [vmem:[%s9350_s3 + $0x18c] sm:$0xf0]  ;;  %v8702_v42 = vor.u32 %v6221_v58, %v5820_v30  ;;  %v5764_v59 = vld [vmem:[%s9350_s3 + $0x160] sm:$0xf]  ;;  %v6202_v61 = vld [vmem:[%s9350_s3 + $0x144] sm:$0xf] }
 0x4fe   :  { %v8579_v60 = vadd.f32 %v2489_v11, %v2488_v52  ;;  %v2477_v33 = vadd.f32 %v6344_v9, %v2476_v17  ;;  %v6210_v52 = vld [vmem:[%s9350_s3 + $0x184] sm:$0xf]  ;;  %v5782_v17 = vld [vmem:[%s9350_s3 + $0x190] sm:$0xf0]  ;;  %v6204_v8 = vld [vmem:[%s9350_s3 + $0x14c] sm:$0xf0] }
 0x4ff   :  { %v5758_v22 = vld [vmem:[%s9350_s3 + $0x158] sm:$0xf0]  ;;  %v8795_v7 = vor.u32 %v6204_v8, %v5748_v51  ;;  %v5772_v4 = vld [vmem:[%s9350_s3 + $0x168] sm:$0xf]  ;;  %v6209_v48 = vld [vmem:[%s9350_s3 + $0x174] sm:$0xf0] }
 0x500   :  { %6347 = vtanh.f32 %v8579_v60  ;;  %v2481_v25 = vsel %vm2480_vm3, %v6344_v9, %v2477_v33  ;;  %v5812_v9 = vld [vmem:[%s9350_s3 + $0x1c0] sm:$0xf]  ;;  %v6211_v33 = vld [vmem:[%s9350_s3 + $0x18c] sm:$0xf] }
 0x501   :  { %v2486_v15 = vsel %vm2483_vm4, %v2485_v26, %v2481_v25  ;;  %v8644_v57 = vor.u32 %v6220_v36, %v5812_v9  ;;  %v8714_v26 = vor.u32 %v6212_v1, %v5780_v32  ;;  %v8767_v9 = vor.u32 %v6206_v43, %v5766_v40  ;;  %v5732_v58 = vld [vmem:[%s9350_s3 + $0x120] sm:$0xf]  ;;  %v6200_v32 = vld [vmem:[%s9350_s3 + $0x12c] sm:$0xf0] }
 0x502   :  { %v8769_v36 = vor.u32 %v6207_v41, %v5774_v27  ;;  %v5716_v8 = vld [vmem:[%s9350_s3 + $0x100] sm:$0xf] }
 0x506   :  { %v6348_v6 = vpop.eup %6347 }
 0x507   :  { %v8585_v28 = vmul.f32 %v6348_v6, %v2486_v15  ;;  %v5790_v6 = vld [vmem:[%s9350_s3 + $0x198] sm:$0xf0]  ;;  %v5804_v15 = vld [vmem:[%s9350_s3 + $0x1a8] sm:$0xf] }
 0x508   :  { %v8729_v55 = vor.u32 %v6211_v33, %v5790_v6  ;;  %v5734_v33 = vld [vmem:[%s9350_s3 + $0x130] sm:$0xf0]  ;;  %v8838_v6 = vor.u32 %v6200_v32, %v5732_v58  ;;  %v6195_v32 = vld [vmem:[%s9350_s3 + $0x10c] sm:$0xf] }
 0x509   :  { %v2502_v29 = vpack.c.bf16 %v8585_v28, %v8585_v28 }
 0x50b   :  { %2703 = vmatmul.bf16.vlgmr.msra.gmra.mxu0 %v2502_v29  ;;  %2716 = vmatmul.bf16.vlgmr.msrb.gmra.mxu1 %v2502_v29 }
 0x50c   :  { %2729 = vmatmul.bf16.vlgmr.msra.gmra.mxu2 %v2502_v29  ;;  %2742 = vmatmul.bf16.vlgmr.msra.gmra.mxu3 %v2502_v29  ;;  %v6217_v29 = vld [vmem:[%s9350_s3 + $0x1b4] sm:$0xf0] }
 0x50d   :  { %3376 = vmatpush.bf16.msra.mxu0 %v8600_v56  ;;  %3389 = vmatpush.bf16.msrb.mxu1 %v8605_v44 }
 0x50e   :  { %3415 = vmatpush.bf16.msra.mxu3 %v8619_v21  ;;  %3402 = vmatpush.bf16.msra.mxu2 %v8628_v34 }
 0x511   :  { %3377 = vmatpush.bf16.msra.mxu0 %v8644_v57  ;;  %3390 = vmatpush.bf16.msrb.mxu1 %v8655_v14 }
 0x512   :  { %3416 = vmatpush.bf16.msra.mxu3 %v8657_v47  ;;  %3403 = vmatpush.bf16.msra.mxu2 %v8702_v42 }
 0x515   :  { %3378 = vmatpush.bf16.msra.mxu0 %v8674_v3  ;;  %3391 = vmatpush.bf16.msrb.mxu1 %v8687_v24 }
 0x516   :  { %3417 = vmatpush.bf16.msra.mxu3 %v8689_v19 }
 0x519   :  { %3379 = vmatpush.bf16.msra.mxu0 %v8714_v26 }
 0x51a   :  { %3418 = vmatpush.bf16.msra.mxu3 %v8729_v55 }
 0x51b   :  { %3039 = vmatmul.bf16.vlgmr.msrb.gmra.mxu0 %v2826_v35  ;;  %3068 = vmatmul.bf16.vlgmr.msra.gmra.mxu1 %v2826_v35 }
 0x51c   :  { %3097 = vmatmul.bf16.vlgmr.msrb.gmra.mxu2 %v2826_v35  ;;  %3126 = vmatmul.bf16.vlgmr.msrb.gmra.mxu3 %v2826_v35  ;;  %v8727_v35 = vor.u32 %v6210_v52, %v5782_v17  ;;  %v8818_v52 = vor.u32 %v6209_v48, %v5772_v4  ;;  %v6198_v17 = vld [vmem:[%s9350_s3 + $0x124] sm:$0xf] }
 0x51e   :  { %3392 = vmatpush.bf16.msrb.mxu1 %v8727_v35  ;;  %3419 = vmatpush.bf16.msra.mxu3 %v8769_v36 }
 0x522   :  { %3393 = vmatpush.bf16.msrb.mxu1 %v8767_v9 }
 0x52b   :  { %3044 = vmatmul.bf16.gmra.mxu0 %v2827_v54  ;;  %3073 = vmatmul.bf16.gmra.mxu1 %v2827_v54 }
 0x52c   :  { %3102 = vmatmul.bf16.gmra.mxu2 %v2827_v54  ;;  %3131 = vmatmul.bf16.gmra.mxu3 %v2827_v54 }
 0x53b   :  { %3049 = vmatmul.bf16.gmra.mxu0 %v2828_v53  ;;  %3078 = vmatmul.bf16.gmra.mxu1 %v2828_v53 }
 0x53c   :  { %3107 = vmatmul.bf16.gmra.mxu2 %v2828_v53  ;;  %3136 = vmatmul.bf16.gmra.mxu3 %v2828_v53  ;;  %v8741_v53 = vor.u32 %v6217_v29, %v5804_v15  ;;  %v6199_v15 = vld [vmem:[%s9350_s3 + $0x12c] sm:$0xf]  ;;  %v5742_v29 = vld [vmem:[%s9350_s3 + $0x138] sm:$0xf0] }
 0x53d   :  { %v8862_v27 = vor.u32 %v6199_v15, %v5742_v29 }
 0x53e   :  { %3404 = vmatpush.bf16.msra.mxu2 %v8741_v53 }
 0x588   :  { %v2704_v5 = vpop.f32.mrf.mxu0  ;;  %v2717_v45 = vpop.f32.mrf.mxu1 }
 0x589   :  { %v2747_v2 = vadd.f32 %v2704_v5, %v129_v23  ;;  %v2748_v31 = vadd.f32 %v2717_v45, %v158_v37  ;;  %v5788_v23 = vld [vmem:[%s9350_s3 + $0x188] sm:$0xf]  ;;  %v6213_v37 = vld [vmem:[%s9350_s3 + $0x194] sm:$0xf0] }
 0x58a   :  { %v8779_v13 = vor.u32 %v6213_v37, %v5788_v23  ;;  %v5740_v23 = vld [vmem:[%s9350_s3 + $0x128] sm:$0xf]  ;;  %v6201_v37 = vld [vmem:[%s9350_s3 + $0x134] sm:$0xf0] }
 0x58b   :  { %v5550_v16 = vmul.f32 -1.442695, %v2747_v2  ;;  %v5551_v46 = vmul.f32 -1.442695, %v2748_v31  ;;  %v8761_v2 = vor.u32 %v6208_v39, %v5764_v59  ;;  %v8896_v58 = vor.u32 %v6201_v37, %v5740_v23 }
 0x58c   :  { %3405 = vmatpush.bf16.msra.mxu2 %v8779_v13 }
 0x58d   :  { %6349 = vpow2.f32 %v5550_v16  ;;  %v5750_v16 = vld [vmem:[%s9350_s3 + $0x150] sm:$0xf0]  ;;  %3380 = vmatpush.bf16.msra.mxu0 %v8761_v2 }
 0x58e   :  { %6351 = vpow2.f32 %v5551_v46  ;;  %v6203_v46 = vld [vmem:[%s9350_s3 + $0x14c] sm:$0xf]  ;;  %v8805_v50 = vor.u32 %v6202_v61, %v5750_v16  ;;  %v6196_v61 = vld [vmem:[%s9350_s3 + $0x10c] sm:$0xf0] }
 0x58f   :  { %v8700_v11 = vpop.f32.mrf.mxu2  ;;  %v2743_v0 = vpop.f32.mrf.mxu3  ;;  %v8892_v4 = vor.u32 %v6196_v61, %v5716_v8 }
 0x590   :  { %v2750_v20 = vadd.f32 %v2743_v0, %v216_v10  ;;  %v2706_v12 = vpop.f32.mrf.mxu0  ;;  %v2719_v25 = vpop.f32.mrf.mxu1  ;;  %v8807_v10 = vor.u32 %v6203_v46, %v5758_v22  ;;  %v187_v0 = vadd.f32 %v6883_v38, %v6825_v63  ;;  %v6205_v63 = vld [vmem:[%s9350_s3 + $0x154] sm:$0xf0]  ;;  %3394 = vmatpush.bf16.msrb.mxu1 %v8805_v50  ;;  %3406 = vmatpush.bf16.msra.mxu2 %v8818_v52 }
 0x591   :  { %v5756_v12 = vld [vmem:[%s9350_s3 + $0x148] sm:$0xf]  ;;  %3381 = vmatpush.bf16.msra.mxu0 %v8795_v7 }
 0x592   :  { %v5552_v54 = vmul.f32 -1.442695, %v2750_v20  ;;  %v2749_v25 = vadd.f32 %v8700_v11, %v187_v0  ;;  %3420 = vmatpush.bf16.msra.mxu3 %v8807_v10  ;;  %v8853_v11 = vor.u32 %v6198_v17, %v5734_v33  ;;  %v8859_v40 = vor.u32 %v6205_v63, %v5756_v12  ;;  %v5724_v17 = vld [vmem:[%s9350_s3 + $0x108] sm:$0xf]  ;;  %v6197_v33 = vld [vmem:[%s9350_s3 + $0x114] sm:$0xf0] }
 0x593   :  { %v6350_v62 = vpop.eup %6349  ;;  %v5726_v12 = vld [vmem:[%s9350_s3 + $0x118] sm:$0xf0]  ;;  %v8927_v23 = vor.u32 %v6197_v33, %v5724_v17 }
 0x594   :  { %v6352_v5 = vpop.eup %6351  ;;  %v8758_v45 = vadd.f32 1.0, %v6350_v62  ;;  %6353 = vpow2.f32 %v5552_v54  ;;  %3395 = vmatpush.bf16.msrb.mxu1 %v8853_v11  ;;  %3407 = vmatpush.bf16.msra.mxu2 %v8859_v40 }
 0x595   :  { %v8763_v31 = vadd.f32 1.0, %v6352_v5  ;;  %3382 = vmatpush.bf16.msra.mxu0 %v8838_v6 }
 0x596   :  { %6355 = vrcp.f32 %v8758_v45  ;;  %v2764_v54 = vand.u32 2147483647, %v8758_v45  ;;  %v2766_v62 = vand.u32 2147483648, %v8758_v45  ;;  %3421 = vmatpush.bf16.msra.mxu3 %v8862_v27  ;;  %vm2760_vm8 = vweird.f32 %v8758_v45 }
 0x597   :  { %6357 = vrcp.f32 %v8763_v31  ;;  %v2732_v30 = vpop.f32.mrf.mxu2  ;;  %v2745_v18 = vpop.f32.mrf.mxu3  ;;  %v2785_v51 = vand.u32 2147483648, %v8763_v31  ;;  %v2783_v46 = vand.u32 2147483647, %v8763_v31  ;;  %vm2779_vm7 = vweird.f32 %v8763_v31 }
 0x598   :  { %v6194_v30 = vld [vmem:[%s9350_s3 + $0x104] sm:$0xf]  ;;  %v5718_v18 = vld [vmem:[%s9350_s3 + $0x110] sm:$0xf0]  ;;  %vm2765_vm11 = vcmp.eq.f32.partialorder %v2764_v54, 8.507059e+37  ;;  %3408 = vmatpush.bf16.msra.mxu2 %v8896_v58 }
 0x599   :  { %v8894_v48 = vor.u32 %v6194_v30, %v5718_v18  ;;  %3383 = vmatpush.bf16.msra.mxu0 %v8892_v4  ;;  %v2786_v15 = vor.u32 1.1754944e-38, %v2785_v51  ;;  %vm2784_vm12 = vcmp.eq.f32.partialorder %v2783_v46, 8.507059e+37 }
 0x59a   :  { %v6354_v1 = vpop.eup %6353 }
 0x59b   :  { %v8826_v20 = vadd.f32 1.0, %v6354_v1  ;;  %3396 = vmatpush.bf16.msrb.mxu1 %v8894_v48 }
 0x59c   :  { %v8834_v38 = vpop.eup %6355  ;;  %3409 = vmatpush.bf16.msra.mxu2 %v8927_v23 }
 0x59d   :  { %v8846_v59 = vpop.eup %6357  ;;  %v2756_v39 = vmul.f32 %v8834_v38, %v8758_v45  ;;  %6359 = vrcp.f32 %v8826_v20  ;;  %vm2761_vm6 = vweird.f32 %v8834_v38  ;;  %3500 = vmatpush.bf16.msrb.mxu0 %v8600_v56  ;;  %v2805_v8 = vand.u32 2147483648, %v8826_v20 }
 0x59e   :  { %v2775_v43 = vmul.f32 %v8846_v59, %v8763_v31  ;;  %6361 = vtanh.f32 %v2749_v25  ;;  %vm2780_vm5 = vweird.f32 %v8846_v59  ;;  %vm2762_vm9 = vmor %vm2760_vm8, %vm2761_vm6  ;;  %v2767_v31 = vor.u32 1.1754944e-38, %v2766_v62 }
 0x59f   :  { %v2757_v41 = vsub.f32 1.0, %v2756_v39  ;;  %v8918_v25 = vor.u32 %v6195_v32, %v5726_v12  ;;  %vm2781_vm10 = vmor %vm2779_vm7, %vm2780_vm5  ;;  %3513 = vmatpush.bf16.msra.mxu1 %v8605_v44  ;;  %vm2799_vm14 = vweird.f32 %v8826_v20  ;;  %v3127_v32 = vpop.f32.mrf.mxu3 }
 0x5a0   :  { %v2776_v5 = vsub.f32 1.0, %v2775_v43  ;;  %3526 = vmatpush.bf16.msrb.mxu2 %v8628_v34 }
 0x5a1   :  { %v2758_v16 = vmul.f32 %v8834_v38, %v2757_v41  ;;  %3422 = vmatpush.bf16.msra.mxu3 %v8918_v25  ;;  %3501 = vmatpush.bf16.msrb.mxu0 %v8644_v57 }
 0x5a2   :  { %v2777_v22 = vmul.f32 %v8846_v59, %v2776_v5 }
 0x5a3   :  { %v6360_v1 = vpop.eup %6359  ;;  %v2759_v0 = vadd.f32 %v8834_v38, %v2758_v16  ;;  %3514 = vmatpush.bf16.msra.mxu1 %v8655_v14  ;;  %v2806_v16 = vor.u32 1.1754944e-38, %v2805_v8 }
 0x5a4   :  { %v2778_v63 = vadd.f32 %v8846_v59, %v2777_v22  ;;  %v2795_v45 = vmul.f32 %v6360_v1, %v8826_v20  ;;  %v6362_v39 = vpop.eup %6361  ;;  %vm2800_vm13 = vweird.f32 %v6360_v1  ;;  %3527 = vmatpush.bf16.msrb.mxu2 %v8702_v42  ;;  %v3098_v22 = vpop.f32.mrf.mxu2 }
 0x5a5   :  { %v2763_v29 = vsel %vm2762_vm9, %v8834_v38, %v2759_v0  ;;  %3539 = vmatpush.bf16.msrb.mxu3 %v8619_v21  ;;  %3502 = vmatpush.bf16.msrb.mxu0 %v8674_v3  ;;  %vm2801_vm15 = vmor %vm2799_vm14, %vm2800_vm13 }
 0x5a6   :  { %v2768_v43 = vsel %vm2765_vm11, %v2767_v31, %v2763_v29  ;;  %v2782_v41 = vsel %vm2781_vm10, %v8846_v59, %v2778_v63  ;;  %v2796_v62 = vsub.f32 1.0, %v2795_v45 }
 0x5a7   :  { %v2787_v37 = vsel %vm2784_vm12, %v2786_v15, %v2782_v41  ;;  %v2810_v5 = vmul.f32 %v6362_v39, %v2768_v43  ;;  %3515 = vmatpush.bf16.msra.mxu1 %v8687_v24  ;;  %v9009_v33 = vpop.f32.mrf.mxu3 }
 0x5a8   :  { %v2809_v38 = vmul.f32 %v2787_v37, %v8579_v60  ;;  %v2797_v54 = vmul.f32 %v6360_v1, %v2796_v62  ;;  %v2803_v60 = vand.u32 2147483647, %v8826_v20  ;;  %3528 = vmatpush.bf16.msrb.mxu2 %v8741_v53 }
 0x5a9   :  { %3540 = vmatpush.bf16.msrb.mxu3 %v8657_v47  ;;  %3503 = vmatpush.bf16.msrb.mxu0 %v8714_v26 }
 0x5aa   :  { %v2811_v51 = vadd.f32 %v2810_v5, %v2809_v38  ;;  %v2798_v59 = vadd.f32 %v6360_v1, %v2797_v54  ;;  %vm2804_vm0 = vcmp.eq.f32.partialorder %v2803_v60, 8.507059e+37 }
 0x5ab   :  { %3516 = vmatpush.bf16.msra.mxu1 %v8727_v35 }
 0x5ac   :  { %6363 = vtanh.f32 %v2811_v51  ;;  %v2802_v61 = vsel %vm2801_vm15, %v6360_v1, %v2798_v59  ;;  %3529 = vmatpush.bf16.msrb.mxu2 %v8779_v13  ;;  %v9007_v17 = vpop.f32.mrf.mxu2 }
 0x5ad   :  { %3541 = vmatpush.bf16.msrb.mxu3 %v8689_v19  ;;  %v2807_v30 = vsel %vm2804_vm0, %v2806_v16, %v2802_v61  ;;  %3504 = vmatpush.bf16.msrb.mxu0 %v8761_v2  ;;  %9364 = vst [vmem:[#allocation4_spill] sm:$0xff] %v9007_v17 }
 0x5af   :  { %3517 = vmatpush.bf16.msra.mxu1 %v8767_v9  ;;  %v9017_v45 = vpop.f32.mrf.mxu3 }
 0x5b0   :  { %3530 = vmatpush.bf16.msrb.mxu2 %v8818_v52  ;;  %9368 = vst [vmem:[#allocation8_spill] sm:$0xff] %v9017_v45 }
 0x5b1   :  { %3542 = vmatpush.bf16.msrb.mxu3 %v8729_v55  ;;  %3505 = vmatpush.bf16.msrb.mxu0 %v8795_v7 }
 0x5b2   :  { %v6364_v46 = vpop.eup %6363 }
 0x5b3   :  { %v2813_v18 = vmul.f32 %v6364_v46, %v2807_v30  ;;  %3518 = vmatpush.bf16.msra.mxu1 %v8805_v50  ;;  %v5553_v46 = vld [vmem:[%s9351_s4 + $0x4] sm:$0xf] }
 0x5b4   :  { %3531 = vmatpush.bf16.msrb.mxu2 %v8859_v40  ;;  %v9015_v63 = vpop.f32.mrf.mxu2 }
 0x5b5   :  { %v2829_v20 = vpack.c.bf16 %v2813_v18, %v8585_v28  ;;  %3543 = vmatpush.bf16.msrb.mxu3 %v8769_v36  ;;  %3506 = vmatpush.bf16.msrb.mxu0 %v8838_v6  ;;  %v3069_v28 = vpop.f32.mrf.mxu1  ;;  %9367 = vst [vmem:[#allocation7_spill] sm:$0xff] %v9015_v63 }
 0x5b7   :  { %3054 = vmatmul.bf16.gmra.mxu0 %v2829_v20  ;;  %3083 = vmatmul.bf16.gmra.mxu1 %v2829_v20  ;;  %v9025_v43 = vpop.f32.mrf.mxu3 }
 0x5b8   :  { %3112 = vmatmul.bf16.gmra.mxu2 %v2829_v20  ;;  %3141 = vmatmul.bf16.gmra.mxu3 %v2829_v20  ;;  %9372 = vst [vmem:[#allocation12_spill] sm:$0xff] %v9025_v43  ;;  %v9058_v20 = vperm.slane %v5553_v46, 0 }
 0x5b9   :  { %3544 = vmatpush.bf16.msrb.mxu3 %v8807_v10  ;;  %3519 = vmatpush.bf16.msra.mxu1 %v8853_v11 }
 0x5ba   :  { %3507 = vmatpush.bf16.msrb.mxu0 %v8892_v4  ;;  %3532 = vmatpush.bf16.msrb.mxu2 %v8896_v58 }
 0x5bc   :  { %v9023_v39 = vpop.f32.mrf.mxu2 }
 0x5bd   :  { %3545 = vmatpush.bf16.msrb.mxu3 %v8862_v27  ;;  %3520 = vmatpush.bf16.msra.mxu1 %v8894_v48  ;;  %v9005_v0 = vpop.f32.mrf.mxu1  ;;  %9371 = vst [vmem:[#allocation11_spill] sm:$0xff] %v9023_v39 }
 0x5be   :  { %3533 = vmatpush.bf16.msrb.mxu2 %v8927_v23 }
 0x5bf   :  { %v9033_v5 = vpop.f32.mrf.mxu3 }
 0x5c0   :  { %9376 = vst [vmem:[#allocation16_spill] sm:$0xff] %v9033_v5  ;;  %v9068_v5 = vperm.slane %v5553_v46, 3 }
 0x5c1   :  { %3546 = vmatpush.bf16.msrb.mxu3 %v8918_v25 }
 0x5c4   :  { %v9031_v37 = vpop.f32.mrf.mxu2 }
 0x5c5   :  { %v9013_v31 = vpop.f32.mrf.mxu1  ;;  %9375 = vst [vmem:[#allocation15_spill] sm:$0xff] %v9031_v37 }
 0x5c6   :  { %9366 = vst [vmem:[#allocation6_spill] sm:$0xff] %v9013_v31 }
 0x5c7   :  { %3384 = vmatmul.bf16.vlgmr.msra.gmra.mxu0 %v6493_v49  ;;  %3397 = vmatmul.bf16.vlgmr.msrb.gmra.mxu1 %v6493_v49  ;;  %v9041_v59 = vpop.f32.mrf.mxu3 }
 0x5c8   :  { %3410 = vmatmul.bf16.vlgmr.msra.gmra.mxu2 %v6493_v49  ;;  %3423 = vmatmul.bf16.vlgmr.msra.gmra.mxu3 %v6493_v49  ;;  %v3040_v49 = vpop.f32.mrf.mxu0  ;;  %9380 = vst [vmem:[#allocation20_spill] sm:$0xff] %v9041_v59 }
 0x5c9   :  { %3624 = vmatpush.bf16.msra.mxu0 %v8600_v56  ;;  %3637 = vmatpush.bf16.msrb.mxu1 %v8605_v44 }
 0x5ca   :  { %3650 = vmatpush.bf16.msra.mxu2 %v8628_v34  ;;  %3663 = vmatpush.bf16.msra.mxu3 %v8619_v21 }
 0x5cc   :  { %v9039_v51 = vpop.f32.mrf.mxu2 }
 0x5cd   :  { %3625 = vmatpush.bf16.msra.mxu0 %v8644_v57  ;;  %3638 = vmatpush.bf16.msrb.mxu1 %v8655_v14  ;;  %v9021_v29 = vpop.f32.mrf.mxu1  ;;  %9379 = vst [vmem:[#allocation19_spill] sm:$0xff] %v9039_v51  ;;  %v9060_v51 = vperm.slane %v5553_v46, 1 }
 0x5ce   :  { %3651 = vmatpush.bf16.msra.mxu2 %v8702_v42  ;;  %3664 = vmatpush.bf16.msra.mxu3 %v8657_v47  ;;  %9370 = vst [vmem:[#allocation10_spill] sm:$0xff] %v9021_v29 }
 0x5d0   :  { %v9003_v1 = vpop.f32.mrf.mxu0 }
 0x5d1   :  { %3626 = vmatpush.bf16.msra.mxu0 %v8674_v3  ;;  %3639 = vmatpush.bf16.msrb.mxu1 %v8687_v24 }
 0x5d2   :  { %3652 = vmatpush.bf16.msra.mxu2 %v8741_v53  ;;  %3665 = vmatpush.bf16.msra.mxu3 %v8689_v19 }
 0x5d5   :  { %3627 = vmatpush.bf16.msra.mxu0 %v8714_v26  ;;  %3640 = vmatpush.bf16.msrb.mxu1 %v8727_v35  ;;  %v9029_v62 = vpop.f32.mrf.mxu1 }
 0x5d6   :  { %3653 = vmatpush.bf16.msra.mxu2 %v8779_v13  ;;  %3666 = vmatpush.bf16.msra.mxu3 %v8729_v55  ;;  %9374 = vst [vmem:[#allocation14_spill] sm:$0xff] %v9029_v62  ;;  %v3128_v62 = vadd.f32 %v3127_v32, %v9068_v5 }
 0x5d8   :  { %v9011_v12 = vpop.f32.mrf.mxu0 }
 0x5d9   :  { %3628 = vmatpush.bf16.msra.mxu0 %v8761_v2  ;;  %3641 = vmatpush.bf16.msrb.mxu1 %v8767_v9  ;;  %9365 = vst [vmem:[#allocation5_spill] sm:$0xff] %v9011_v12 }
 0x5da   :  { %3654 = vmatpush.bf16.msra.mxu2 %v8818_v52  ;;  %3667 = vmatpush.bf16.msra.mxu3 %v8769_v36 }
 0x5dd   :  { %3629 = vmatpush.bf16.msra.mxu0 %v8795_v7  ;;  %3642 = vmatpush.bf16.msrb.mxu1 %v8805_v50  ;;  %v9037_v54 = vpop.f32.mrf.mxu1 }
 0x5de   :  { %3655 = vmatpush.bf16.msra.mxu2 %v8859_v40  ;;  %3668 = vmatpush.bf16.msra.mxu3 %v8807_v10  ;;  %9378 = vst [vmem:[#allocation18_spill] sm:$0xff] %v9037_v54 }
 0x5e0   :  { %v9019_v15 = vpop.f32.mrf.mxu0 }
 0x5e1   :  { %3630 = vmatpush.bf16.msra.mxu0 %v8838_v6  ;;  %3643 = vmatpush.bf16.msrb.mxu1 %v8853_v11  ;;  %9369 = vst [vmem:[#allocation9_spill] sm:$0xff] %v9019_v15 }
 0x5e2   :  { %3656 = vmatpush.bf16.msra.mxu2 %v8896_v58  ;;  %3669 = vmatpush.bf16.msra.mxu3 %v8862_v27 }
 0x5e5   :  { %3631 = vmatpush.bf16.msra.mxu0 %v8892_v4  ;;  %3644 = vmatpush.bf16.msrb.mxu1 %v8894_v48 }
 0x5e6   :  { %3657 = vmatpush.bf16.msra.mxu2 %v8927_v23  ;;  %3670 = vmatpush.bf16.msra.mxu3 %v8918_v25 }
 0x5e8   :  { %v9027_v41 = vpop.f32.mrf.mxu0 }
 0x5e9   :  { %9373 = vst [vmem:[#allocation13_spill] sm:$0xff] %v9027_v41 }
 0x5f0   :  { %v9035_v38 = vpop.f32.mrf.mxu0 }
 0x5f1   :  { %9377 = vst [vmem:[#allocation17_spill] sm:$0xff] %v9035_v38 }
 0x634   :  { %v9043_v8 = vpop.f32.mrf.mxu0  ;;  %v9045_v60 = vpop.f32.mrf.mxu1 }
 0x635   :  { %9381 = vst [vmem:[#allocation21_spill] sm:$0xff] %v9043_v8  ;;  %v3041_v8 = vadd.f32 %v3040_v49, %v9058_v20 }
 0x636   :  { %9382 = vst [vmem:[#allocation22_spill] sm:$0xff] %v9045_v60  ;;  %v3070_v60 = vadd.f32 %v3069_v28, %v9060_v51 }
 0x63b   :  { %v9047_v61 = vpop.f32.mrf.mxu2  ;;  %v9049_v16 = vpop.f32.mrf.mxu3 }
 0x63c   :  { %9383 = vst [vmem:[#allocation23_spill] sm:$0xff] %v9047_v61  ;;  %v9054_v30 = vpop.f32.mrf.mxu0  ;;  %v9056_v18 = vpop.f32.mrf.mxu1 }
 0x63d   :  { %9384 = vst [vmem:[#allocation24_spill] sm:$0xff] %v9049_v16 }
 0x63e   :  { %9385 = vst [vmem:[#allocation25_spill] sm:$0xff] %v9054_v30 }
 0x63f   :  { %9386 = vst [vmem:[#allocation26_spill] sm:$0xff] %v9056_v18 }
 0x643   :  { %v9064_v59 = vpop.f32.mrf.mxu2  ;;  %v9066_v61 = vpop.f32.mrf.mxu3 }
 0x644   :  { %9387 = vst [vmem:[#allocation27_spill] sm:$0xff] %v9064_v59  ;;  %v3385_v16 = vpop.f32.mrf.mxu0  ;;  %v3398_v54 = vpop.f32.mrf.mxu1 }
 0x645   :  { %9388 = vst [vmem:[#allocation28_spill] sm:$0xff] %v9066_v61  ;;  %v3428_v38 = vadd.f32 %v3385_v16, %v3041_v8  ;;  %v3429_v37 = vadd.f32 %v3398_v54, %v3070_v60  ;;  %v9071_v54 = vperm.slane %v5553_v46, 2 }
 0x647   :  { %v5842_v30 = vmul.f32 -1.442695, %v3428_v38  ;;  %v5843_v18 = vmul.f32 -1.442695, %v3429_v37  ;;  %9389 = vst [vmem:[#allocation29_spill] sm:$0xff] %v9071_v54  ;;  %v3099_v32 = vadd.f32 %v3098_v22, %v9071_v54 }
 0x649   :  { %6365 = vpow2.f32 %v5842_v30 }
 0x64a   :  { %6367 = vpow2.f32 %v5843_v18 }
 0x64b   :  { %v3411_v41 = vpop.f32.mrf.mxu2  ;;  %v3424_v49 = vpop.f32.mrf.mxu3 }
 0x64c   :  { %v3431_v39 = vadd.f32 %v3424_v49, %v3128_v62  ;;  %v3387_v28 = vpop.f32.mrf.mxu0  ;;  %v3400_v43 = vpop.f32.mrf.mxu1  ;;  %v3430_v62 = vadd.f32 %v3411_v41, %v3099_v32 }
 0x64e   :  { %v5844_v59 = vmul.f32 -1.442695, %v3431_v39 }
 0x64f   :  { %v6366_v29 = vpop.eup %6365 }
 0x650   :  { %v6368_v61 = vpop.eup %6367  ;;  %v3435_v15 = vadd.f32 1.0, %v6366_v29  ;;  %6369 = vpow2.f32 %v5844_v59 }
 0x651   :  { %v3454_v8 = vadd.f32 1.0, %v6368_v61 }
 0x652   :  { %6371 = vrcp.f32 %v3435_v15  ;;  %v3447_v59 = vand.u32 2147483648, %v3435_v15  ;;  %v3445_v28 = vand.u32 2147483647, %v3435_v15  ;;  %vm3441_vm3 = vweird.f32 %v3435_v15 }
 0x653   :  { %6373 = vrcp.f32 %v3454_v8  ;;  %v3426_v37 = vpop.f32.mrf.mxu3  ;;  %v3413_v38 = vpop.f32.mrf.mxu2  ;;  %v3466_v61 = vand.u32 2147483648, %v3454_v8  ;;  %vm3460_vm4 = vweird.f32 %v3454_v8 }
 0x654   :  { %v3464_v38 = vand.u32 2147483647, %v3454_v8  ;;  %v3448_v41 = vor.u32 1.1754944e-38, %v3447_v59  ;;  %vm3446_vm6 = vcmp.eq.f32.partialorder %v3445_v28, 8.507059e+37 }
 0x655   :  { %v3467_v45 = vor.u32 1.1754944e-38, %v3466_v61 }
 0x656   :  { %v6370_v60 = vpop.eup %6369  ;;  %vm3465_vm8 = vcmp.eq.f32.partialorder %v3464_v38, 8.507059e+37 }
 0x657   :  { %v3474_v16 = vadd.f32 1.0, %v6370_v60 }
 0x658   :  { %v6372_v30 = vpop.eup %6371 }
 0x659   :  { %v6374_v18 = vpop.eup %6373  ;;  %v3437_v43 = vmul.f32 %v6372_v30, %v3435_v15  ;;  %6375 = vrcp.f32 %v3474_v16  ;;  %vm3442_vm1 = vweird.f32 %v6372_v30  ;;  %vm3480_vm10 = vweird.f32 %v3474_v16 }
 0x65a   :  { %v3456_v39 = vmul.f32 %v6374_v18, %v3454_v8  ;;  %6377 = vtanh.f32 %v3430_v62  ;;  %vm3461_vm2 = vweird.f32 %v6374_v18  ;;  %vm3443_vm5 = vmor %vm3441_vm3, %vm3442_vm1  ;;  %v3486_v8 = vand.u32 2147483648, %v3474_v16 }
 0x65b   :  { %v3438_v49 = vsub.f32 1.0, %v3437_v43  ;;  %vm3462_vm7 = vmor %vm3460_vm4, %vm3461_vm2 }
 0x65c   :  { %v3457_v29 = vsub.f32 1.0, %v3456_v39  ;;  %v3487_v61 = vor.u32 1.1754944e-38, %v3486_v8 }
 0x65d   :  { %v3439_v46 = vmul.f32 %v6372_v30, %v3438_v49 }
 0x65e   :  { %v3458_v37 = vmul.f32 %v6374_v18, %v3457_v29 }
 0x65f   :  { %v6376_v63 = vpop.eup %6375  ;;  %v3440_v22 = vadd.f32 %v6372_v30, %v3439_v46 }
 0x660   :  { %v3459_v60 = vadd.f32 %v6374_v18, %v3458_v37  ;;  %v3476_v32 = vmul.f32 %v6376_v63, %v3474_v16  ;;  %v6378_v62 = vpop.eup %6377  ;;  %vm3481_vm9 = vweird.f32 %v6376_v63 }
 0x661   :  { %v3444_v43 = vsel %vm3443_vm5, %v6372_v30, %v3440_v22  ;;  %v3484_v30 = vand.u32 2147483647, %v3474_v16  ;;  %vm3482_vm11 = vmor %vm3480_vm10, %vm3481_vm9 }
 0x662   :  { %v3449_v39 = vsel %vm3446_vm6, %v3448_v41, %v3444_v43  ;;  %v3463_v49 = vsel %vm3462_vm7, %v6374_v18, %v3459_v60  ;;  %v3477_v31 = vsub.f32 1.0, %v3476_v32  ;;  %v3130_v41 = vadd.f32 %v9009_v33, %v9068_v5 }
 0x663   :  { %v3468_v29 = vsel %vm3465_vm8, %v3467_v45, %v3463_v49  ;;  %v3491_v12 = vmul.f32 %v6378_v62, %v3449_v39  ;;  %vm3485_vm12 = vcmp.eq.f32.partialorder %v3484_v30, 8.507059e+37 }
 0x664   :  { %v3490_v17 = vmul.f32 0.0, %v3468_v29  ;;  %v3478_v54 = vmul.f32 %v6376_v63, %v3477_v31 }
 0x666   :  { %v9074_v46 = vadd.f32 %v3491_v12, %v3490_v17  ;;  %v3479_v15 = vadd.f32 %v6376_v63, %v3478_v54  ;;  %v3043_v17 = vadd.f32 %v9003_v1, %v9058_v20  ;;  %v3072_v12 = vadd.f32 %v9005_v0, %v9060_v51 }
 0x668   :  { %6379 = vtanh.f32 %v9074_v46  ;;  %v3483_v59 = vsel %vm3482_vm11, %v6376_v63, %v3479_v15 }
 0x669   :  { %v3488_v28 = vsel %vm3485_vm12, %v3487_v61, %v3483_v59  ;;  %v9390_v61 = vld [vmem:[#allocation29_spill] sm:$0xff] }
 0x66e   :  { %v6380_v18 = vpop.eup %6379 }
 0x66f   :  { %v3494_v37 = vmul.f32 %v6380_v18, %v3488_v28  ;;  %v9391_v18 = vld [vmem:[#allocation4_spill] sm:$0xff] }
 0x670   :  { %v3101_v33 = vadd.f32 %v9391_v18, %v9390_v61 }
 0x671   :  { %v3499_v45 = vpack.c.bf16 %v3494_v37, %v3494_v37 }
 0x673   :  { %3508 = vmatmul.bf16.vlgmr.msrb.gmra.mxu0 %v3499_v45  ;;  %3521 = vmatmul.bf16.vlgmr.msra.gmra.mxu1 %v3499_v45 }
 0x674   :  { %3534 = vmatmul.bf16.vlgmr.msrb.gmra.mxu2 %v3499_v45  ;;  %3547 = vmatmul.bf16.vlgmr.msrb.gmra.mxu3 %v3499_v45 }
 0x675   :  { %3748 = vmatpush.bf16.msrb.mxu0 %v8600_v56  ;;  %3761 = vmatpush.bf16.msra.mxu1 %v8605_v44 }
 0x676   :  { %3774 = vmatpush.bf16.msrb.mxu2 %v8628_v34  ;;  %3787 = vmatpush.bf16.msrb.mxu3 %v8619_v21 }
 0x679   :  { %3749 = vmatpush.bf16.msrb.mxu0 %v8644_v57  ;;  %3762 = vmatpush.bf16.msra.mxu1 %v8655_v14 }
 0x67a   :  { %3775 = vmatpush.bf16.msrb.mxu2 %v8702_v42  ;;  %3788 = vmatpush.bf16.msrb.mxu3 %v8657_v47 }
 0x67d   :  { %3750 = vmatpush.bf16.msrb.mxu0 %v8674_v3  ;;  %3763 = vmatpush.bf16.msra.mxu1 %v8687_v24 }
 0x67e   :  { %3776 = vmatpush.bf16.msrb.mxu2 %v8741_v53  ;;  %3789 = vmatpush.bf16.msrb.mxu3 %v8689_v19 }
 0x681   :  { %3751 = vmatpush.bf16.msrb.mxu0 %v8714_v26  ;;  %3764 = vmatpush.bf16.msra.mxu1 %v8727_v35 }
 0x682   :  { %3777 = vmatpush.bf16.msrb.mxu2 %v8779_v13  ;;  %3790 = vmatpush.bf16.msrb.mxu3 %v8729_v55 }
 0x685   :  { %3752 = vmatpush.bf16.msrb.mxu0 %v8761_v2  ;;  %3765 = vmatpush.bf16.msra.mxu1 %v8767_v9 }
 0x686   :  { %3778 = vmatpush.bf16.msrb.mxu2 %v8818_v52  ;;  %3791 = vmatpush.bf16.msrb.mxu3 %v8769_v36 }
 0x689   :  { %3753 = vmatpush.bf16.msrb.mxu0 %v8795_v7  ;;  %3766 = vmatpush.bf16.msra.mxu1 %v8805_v50 }
 0x68a   :  { %3779 = vmatpush.bf16.msrb.mxu2 %v8859_v40  ;;  %3792 = vmatpush.bf16.msrb.mxu3 %v8807_v10 }
 0x68d   :  { %3754 = vmatpush.bf16.msrb.mxu0 %v8838_v6  ;;  %3767 = vmatpush.bf16.msra.mxu1 %v8853_v11 }
 0x68e   :  { %3780 = vmatpush.bf16.msrb.mxu2 %v8896_v58  ;;  %3793 = vmatpush.bf16.msrb.mxu3 %v8862_v27 }
 0x691   :  { %3755 = vmatpush.bf16.msrb.mxu0 %v8892_v4  ;;  %3768 = vmatpush.bf16.msra.mxu1 %v8894_v48 }
 0x692   :  { %3781 = vmatpush.bf16.msrb.mxu2 %v8927_v23  ;;  %3794 = vmatpush.bf16.msrb.mxu3 %v8918_v25 }
 0x6f0   :  { %v3509_v31 = vpop.f32.mrf.mxu0  ;;  %v3522_v63 = vpop.f32.mrf.mxu1 }
 0x6f1   :  { %v3552_v54 = vadd.f32 %v3509_v31, %v3043_v17  ;;  %v3553_v16 = vadd.f32 %v3522_v63, %v3072_v12 }
 0x6f3   :  { %v5845_v38 = vmul.f32 -1.442695, %v3552_v54  ;;  %v5846_v22 = vmul.f32 -1.442695, %v3553_v16 }
 0x6f5   :  { %6381 = vpow2.f32 %v5845_v38 }
 0x6f6   :  { %6383 = vpow2.f32 %v5846_v22 }
 0x6f7   :  { %v3535_v60 = vpop.f32.mrf.mxu2  ;;  %v3548_v32 = vpop.f32.mrf.mxu3 }
 0x6f8   :  { %v3555_v43 = vadd.f32 %v3548_v32, %v3130_v41  ;;  %v3511_v62 = vpop.f32.mrf.mxu0  ;;  %v3524_v39 = vpop.f32.mrf.mxu1  ;;  %v3554_v45 = vadd.f32 %v3535_v60, %v3101_v33 }
 0x6fa   :  { %v5847_v1 = vmul.f32 -1.442695, %v3555_v43 }
 0x6fb   :  { %v6382_v49 = vpop.eup %6381 }
 0x6fc   :  { %v6384_v29 = vpop.eup %6383  ;;  %v3559_v0 = vadd.f32 1.0, %v6382_v49  ;;  %6385 = vpow2.f32 %v5847_v1 }
 0x6fd   :  { %v3578_v15 = vadd.f32 1.0, %v6384_v29 }
 0x6fe   :  { %6387 = vrcp.f32 %v3559_v0  ;;  %v3571_v16 = vand.u32 2147483648, %v3559_v0  ;;  %v3569_v41 = vand.u32 2147483647, %v3559_v0  ;;  %vm3565_vm15 = vweird.f32 %v3559_v0 }
 0x6ff   :  { %6389 = vrcp.f32 %v3578_v15  ;;  %v3537_v8 = vpop.f32.mrf.mxu2  ;;  %v3550_v30 = vpop.f32.mrf.mxu3  ;;  %v3590_v38 = vand.u32 2147483648, %v3578_v15  ;;  %v3588_v43 = vand.u32 2147483647, %v3578_v15  ;;  %vm3584_vm0 = vweird.f32 %v3578_v15 }
 0x700   :  { %v3572_v60 = vor.u32 1.1754944e-38, %v3571_v16  ;;  %vm3570_vm3 = vcmp.eq.f32.partialorder %v3569_v41, 8.507059e+37 }
 0x701   :  { %v3591_v29 = vor.u32 1.1754944e-38, %v3590_v38  ;;  %vm3589_vm4 = vcmp.eq.f32.partialorder %v3588_v43, 8.507059e+37  ;;  %v9393_v43 = vld [vmem:[#allocation6_spill] sm:$0xff] }
 0x702   :  { %v6386_v59 = vpop.eup %6385 }
 0x703   :  { %v3598_v28 = vadd.f32 1.0, %v6386_v59 }
 0x704   :  { %v6388_v37 = vpop.eup %6387 }
 0x705   :  { %v6390_v17 = vpop.eup %6389  ;;  %v3561_v12 = vmul.f32 %v6388_v37, %v3559_v0  ;;  %6391 = vrcp.f32 %v3598_v28  ;;  %vm3566_vm13 = vweird.f32 %v6388_v37  ;;  %vm3604_vm6 = vweird.f32 %v3598_v28 }
 0x706   :  { %v3580_v31 = vmul.f32 %v6390_v17, %v3578_v15  ;;  %6393 = vtanh.f32 %v3554_v45  ;;  %vm3585_vm14 = vweird.f32 %v6390_v17  ;;  %vm3567_vm1 = vmor %vm3565_vm15, %vm3566_vm13 }
 0x707   :  { %v3562_v63 = vsub.f32 1.0, %v3561_v12  ;;  %vm3586_vm2 = vmor %vm3584_vm0, %vm3585_vm14 }
 0x708   :  { %v3581_v54 = vsub.f32 1.0, %v3580_v31 }
 0x709   :  { %v3563_v22 = vmul.f32 %v6388_v37, %v3562_v63 }
 0x70a   :  { %v3582_v32 = vmul.f32 %v6390_v17, %v3581_v54  ;;  %v3610_v54 = vand.u32 2147483648, %v3598_v28 }
 0x70b   :  { %v6392_v62 = vpop.eup %6391  ;;  %v3564_v39 = vadd.f32 %v6388_v37, %v3563_v22 }
 0x70c   :  { %v3583_v1 = vadd.f32 %v6390_v17, %v3582_v32  ;;  %v3600_v49 = vmul.f32 %v6392_v62, %v3598_v28  ;;  %v6394_v30 = vpop.eup %6393  ;;  %vm3605_vm5 = vweird.f32 %v6392_v62  ;;  %v3611_v38 = vor.u32 1.1754944e-38, %v3610_v54 }
 0x70d   :  { %v3568_v8 = vsel %vm3567_vm1, %v6388_v37, %v3564_v39  ;;  %v3608_v37 = vand.u32 2147483647, %v3598_v28  ;;  %vm3606_vm7 = vmor %vm3604_vm6, %vm3605_vm5 }
 0x70e   :  { %v3573_v59 = vsel %vm3570_vm3, %v3572_v60, %v3568_v8  ;;  %v3587_v18 = vsel %vm3586_vm2, %v6390_v17, %v3583_v1  ;;  %v3601_v33 = vsub.f32 1.0, %v3600_v49 }
 0x70f   :  { %v3592_v45 = vsel %vm3589_vm4, %v3591_v29, %v3587_v18  ;;  %v3615_v12 = vmul.f32 %v6394_v30, %v3573_v59  ;;  %vm3609_vm8 = vcmp.eq.f32.partialorder %v3608_v37, 8.507059e+37  ;;  %v9394_v30 = vld [vmem:[#allocation8_spill] sm:$0xff] }
 0x710   :  { %v3614_v31 = vmul.f32 %v3592_v45, %v9074_v46  ;;  %v3602_v63 = vmul.f32 %v6392_v62, %v3601_v33  ;;  %v9392_v46 = vld [vmem:[#allocation5_spill] sm:$0xff]  ;;  %v3133_v59 = vadd.f32 %v9394_v30, %v9068_v5 }
 0x711   :  { %v3046_v28 = vadd.f32 %v9392_v46, %v9058_v20 }
 0x712   :  { %v9118_v0 = vadd.f32 %v3615_v12, %v3614_v31  ;;  %v3603_v15 = vadd.f32 %v6392_v62, %v3602_v63 }
 0x714   :  { %6395 = vtanh.f32 %v9118_v0  ;;  %v3607_v16 = vsel %vm3606_vm7, %v6392_v62, %v3603_v15  ;;  %v3075_v62 = vadd.f32 %v9393_v43, %v9060_v51 }
 0x715   :  { %v3612_v22 = vsel %vm3609_vm8, %v3611_v38, %v3607_v16 }
 0x71a   :  { %v6396_v17 = vpop.eup %6395 }
 0x71b   :  { %v3618_v41 = vmul.f32 %v6396_v17, %v3612_v22 }
 0x71d   :  { %v3623_v32 = vpack.c.bf16 %v3618_v41, %v3618_v41  ;;  %v9395_v41 = vld [vmem:[#allocation7_spill] sm:$0xff] }
 0x71f   :  { %3632 = vmatmul.bf16.vlgmr.msra.gmra.mxu0 %v3623_v32  ;;  %3645 = vmatmul.bf16.vlgmr.msrb.gmra.mxu1 %v3623_v32 }
 0x720   :  { %3658 = vmatmul.bf16.vlgmr.msra.gmra.mxu2 %v3623_v32  ;;  %3671 = vmatmul.bf16.vlgmr.msra.gmra.mxu3 %v3623_v32  ;;  %v3104_v32 = vadd.f32 %v9395_v41, %v9390_v61 }
 0x721   :  { %3872 = vmatpush.bf16.msra.mxu0 %v8600_v56  ;;  %3885 = vmatpush.bf16.msrb.mxu1 %v8605_v44 }
 0x722   :  { %3898 = vmatpush.bf16.msra.mxu2 %v8628_v34  ;;  %3911 = vmatpush.bf16.msra.mxu3 %v8619_v21 }
 0x725   :  { %3873 = vmatpush.bf16.msra.mxu0 %v8644_v57  ;;  %3886 = vmatpush.bf16.msrb.mxu1 %v8655_v14 }
 0x726   :  { %3899 = vmatpush.bf16.msra.mxu2 %v8702_v42  ;;  %3912 = vmatpush.bf16.msra.mxu3 %v8657_v47 }
 0x729   :  { %3874 = vmatpush.bf16.msra.mxu0 %v8674_v3  ;;  %3887 = vmatpush.bf16.msrb.mxu1 %v8687_v24 }
 0x72a   :  { %3900 = vmatpush.bf16.msra.mxu2 %v8741_v53  ;;  %3913 = vmatpush.bf16.msra.mxu3 %v8689_v19 }
 0x72d   :  { %3875 = vmatpush.bf16.msra.mxu0 %v8714_v26  ;;  %3888 = vmatpush.bf16.msrb.mxu1 %v8727_v35 }
 0x72e   :  { %3901 = vmatpush.bf16.msra.mxu2 %v8779_v13  ;;  %3914 = vmatpush.bf16.msra.mxu3 %v8729_v55 }
 0x731   :  { %3876 = vmatpush.bf16.msra.mxu0 %v8761_v2  ;;  %3889 = vmatpush.bf16.msrb.mxu1 %v8767_v9 }
 0x732   :  { %3902 = vmatpush.bf16.msra.mxu2 %v8818_v52  ;;  %3915 = vmatpush.bf16.msra.mxu3 %v8769_v36 }
 0x735   :  { %3877 = vmatpush.bf16.msra.mxu0 %v8795_v7  ;;  %3890 = vmatpush.bf16.msrb.mxu1 %v8805_v50 }
 0x736   :  { %3903 = vmatpush.bf16.msra.mxu2 %v8859_v40  ;;  %3916 = vmatpush.bf16.msra.mxu3 %v8807_v10 }
 0x739   :  { %3878 = vmatpush.bf16.msra.mxu0 %v8838_v6  ;;  %3891 = vmatpush.bf16.msrb.mxu1 %v8853_v11 }
 0x73a   :  { %3904 = vmatpush.bf16.msra.mxu2 %v8896_v58  ;;  %3917 = vmatpush.bf16.msra.mxu3 %v8862_v27 }
 0x73d   :  { %3879 = vmatpush.bf16.msra.mxu0 %v8892_v4  ;;  %3892 = vmatpush.bf16.msrb.mxu1 %v8894_v48 }
 0x73e   :  { %3905 = vmatpush.bf16.msra.mxu2 %v8927_v23  ;;  %3918 = vmatpush.bf16.msra.mxu3 %v8918_v25 }
 0x79c   :  { %v3633_v39 = vpop.f32.mrf.mxu0  ;;  %v3646_v60 = vpop.f32.mrf.mxu1 }
 0x79d   :  { %v3676_v1 = vadd.f32 %v3633_v39, %v3046_v28  ;;  %v3677_v49 = vadd.f32 %v3646_v60, %v3075_v62 }
 0x79f   :  { %v5848_v29 = vmul.f32 -1.442695, %v3676_v1  ;;  %v5849_v8 = vmul.f32 -1.442695, %v3677_v49 }
 0x7a1   :  { %6397 = vpow2.f32 %v5848_v29 }
 0x7a2   :  { %6399 = vpow2.f32 %v5849_v8 }
 0x7a3   :  { %v3659_v18 = vpop.f32.mrf.mxu2  ;;  %v3672_v33 = vpop.f32.mrf.mxu3 }
 0x7a4   :  { %v3679_v45 = vadd.f32 %v3672_v33, %v3133_v59  ;;  %v3635_v12 = vpop.f32.mrf.mxu0  ;;  %v3648_v31 = vpop.f32.mrf.mxu1  ;;  %v3678_v43 = vadd.f32 %v3659_v18, %v3104_v32 }
 0x7a6   :  { %v5850_v63 = vmul.f32 -1.442695, %v3679_v45 }
 0x7a7   :  { %v6398_v15 = vpop.eup %6397 }
 0x7a8   :  { %v6400_v54 = vpop.eup %6399  ;;  %v3683_v37 = vadd.f32 1.0, %v6398_v15  ;;  %6401 = vpow2.f32 %v5850_v63 }
 0x7a9   :  { %v3702_v16 = vadd.f32 1.0, %v6400_v54 }
 0x7aa   :  { %6403 = vrcp.f32 %v3683_v37  ;;  %v3695_v29 = vand.u32 2147483648, %v3683_v37  ;;  %v3693_v59 = vand.u32 2147483647, %v3683_v37  ;;  %vm3689_vm11 = vweird.f32 %v3683_v37 }
 0x7ab   :  { %6405 = vrcp.f32 %v3702_v16  ;;  %v3661_v38 = vpop.f32.mrf.mxu2  ;;  %v3674_v17 = vpop.f32.mrf.mxu3  ;;  %v3714_v8 = vand.u32 2147483648, %v3702_v16  ;;  %v3712_v45 = vand.u32 2147483647, %v3702_v16  ;;  %vm3708_vm12 = vweird.f32 %v3702_v16 }
 0x7ac   :  { %v3696_v18 = vor.u32 1.1754944e-38, %v3695_v29  ;;  %vm3694_vm15 = vcmp.eq.f32.partialorder %v3693_v59, 8.507059e+37 }
 0x7ad   :  { %v3715_v54 = vor.u32 1.1754944e-38, %v3714_v8  ;;  %vm3713_vm0 = vcmp.eq.f32.partialorder %v3712_v45, 8.507059e+37  ;;  %v9397_v45 = vld [vmem:[#allocation10_spill] sm:$0xff] }
 0x7ae   :  { %v6402_v22 = vpop.eup %6401 }
 0x7af   :  { %v3722_v46 = vadd.f32 1.0, %v6402_v22 }
 0x7b0   :  { %v6404_v28 = vpop.eup %6403 }
 0x7b1   :  { %v6406_v62 = vpop.eup %6405  ;;  %v3685_v39 = vmul.f32 %v6404_v28, %v3683_v37  ;;  %6407 = vrcp.f32 %v3722_v46  ;;  %vm3690_vm9 = vweird.f32 %v6404_v28  ;;  %vm3728_vm2 = vweird.f32 %v3722_v46 }
 0x7b2   :  { %v3704_v60 = vmul.f32 %v6406_v62, %v3702_v16  ;;  %6409 = vtanh.f32 %v3678_v43  ;;  %vm3709_vm10 = vweird.f32 %v6406_v62  ;;  %vm3691_vm13 = vmor %vm3689_vm11, %vm3690_vm9 }
 0x7b3   :  { %v3686_v1 = vsub.f32 1.0, %v3685_v39  ;;  %vm3710_vm14 = vmor %vm3708_vm12, %vm3709_vm10 }
 0x7b4   :  { %v3705_v49 = vsub.f32 1.0, %v3704_v60 }
 0x7b5   :  { %v3687_v30 = vmul.f32 %v6404_v28, %v3686_v1 }
 0x7b6   :  { %v3706_v33 = vmul.f32 %v6406_v62, %v3705_v49  ;;  %v3734_v49 = vand.u32 2147483648, %v3722_v46 }
 0x7b7   :  { %v6408_v12 = vpop.eup %6407  ;;  %v3688_v31 = vadd.f32 %v6404_v28, %v3687_v30 }
 0x7b8   :  { %v3707_v63 = vadd.f32 %v6406_v62, %v3706_v33  ;;  %v3724_v15 = vmul.f32 %v6408_v12, %v3722_v46  ;;  %v6410_v17 = vpop.eup %6409  ;;  %vm3729_vm1 = vweird.f32 %v6408_v12  ;;  %v3735_v8 = vor.u32 1.1754944e-38, %v3734_v49 }
 0x7b9   :  { %v3692_v38 = vsel %vm3691_vm13, %v6404_v28, %v3688_v31  ;;  %v3732_v28 = vand.u32 2147483647, %v3722_v46  ;;  %vm3730_vm3 = vmor %vm3728_vm2, %vm3729_vm1 }
 0x7ba   :  { %v3697_v22 = vsel %vm3694_vm15, %v3696_v18, %v3692_v38  ;;  %v3711_v41 = vsel %vm3710_vm14, %v6406_v62, %v3707_v63  ;;  %v3725_v32 = vsub.f32 1.0, %v3724_v15 }
 0x7bb   :  { %v3716_v43 = vsel %vm3713_vm0, %v3715_v54, %v3711_v41  ;;  %v3739_v39 = vmul.f32 %v6410_v17, %v3697_v22  ;;  %vm3733_vm4 = vcmp.eq.f32.partialorder %v3732_v28, 8.507059e+37  ;;  %v9398_v17 = vld [vmem:[#allocation12_spill] sm:$0xff] }
 0x7bc   :  { %v3738_v60 = vmul.f32 %v3716_v43, %v9118_v0  ;;  %v3726_v1 = vmul.f32 %v6408_v12, %v3725_v32  ;;  %v9396_v0 = vld [vmem:[#allocation9_spill] sm:$0xff]  ;;  %v3135_v22 = vadd.f32 %v9398_v17, %v9068_v5 }
 0x7bd   :  { %v3048_v46 = vadd.f32 %v9396_v0, %v9058_v20 }
 0x7be   :  { %v9162_v37 = vadd.f32 %v3739_v39, %v3738_v60  ;;  %v3727_v16 = vadd.f32 %v6408_v12, %v3726_v1 }
 0x7c0   :  { %6411 = vtanh.f32 %v9162_v37  ;;  %v3731_v29 = vsel %vm3730_vm3, %v6408_v12, %v3727_v16  ;;  %v3077_v12 = vadd.f32 %v9397_v45, %v9060_v51 }
 0x7c1   :  { %v3736_v30 = vsel %vm3733_vm4, %v3735_v8, %v3731_v29 }
 0x7c6   :  { %v6412_v62 = vpop.eup %6411 }
 0x7c7   :  { %v3742_v59 = vmul.f32 %v6412_v62, %v3736_v30 }
 0x7c9   :  { %v3747_v33 = vpack.c.bf16 %v3742_v59, %v3742_v59  ;;  %v9399_v59 = vld [vmem:[#allocation11_spill] sm:$0xff] }
 0x7cb   :  { %3756 = vmatmul.bf16.vlgmr.msrb.gmra.mxu0 %v3747_v33  ;;  %3769 = vmatmul.bf16.vlgmr.msra.gmra.mxu1 %v3747_v33 }
 0x7cc   :  { %3782 = vmatmul.bf16.vlgmr.msrb.gmra.mxu2 %v3747_v33  ;;  %3795 = vmatmul.bf16.vlgmr.msrb.gmra.mxu3 %v3747_v33  ;;  %v3106_v33 = vadd.f32 %v9399_v59, %v9390_v61 }
 0x7cd   :  { %3996 = vmatpush.bf16.msrb.mxu0 %v8600_v56  ;;  %4009 = vmatpush.bf16.msra.mxu1 %v8605_v44 }
 0x7ce   :  { %4022 = vmatpush.bf16.msrb.mxu2 %v8628_v34  ;;  %4035 = vmatpush.bf16.msrb.mxu3 %v8619_v21 }
 0x7d1   :  { %3997 = vmatpush.bf16.msrb.mxu0 %v8644_v57  ;;  %4010 = vmatpush.bf16.msra.mxu1 %v8655_v14 }
 0x7d2   :  { %4023 = vmatpush.bf16.msrb.mxu2 %v8702_v42  ;;  %4036 = vmatpush.bf16.msrb.mxu3 %v8657_v47 }
 0x7d5   :  { %3998 = vmatpush.bf16.msrb.mxu0 %v8674_v3  ;;  %4011 = vmatpush.bf16.msra.mxu1 %v8687_v24 }
 0x7d6   :  { %4024 = vmatpush.bf16.msrb.mxu2 %v8741_v53  ;;  %4037 = vmatpush.bf16.msrb.mxu3 %v8689_v19 }
 0x7d9   :  { %3999 = vmatpush.bf16.msrb.mxu0 %v8714_v26  ;;  %4012 = vmatpush.bf16.msra.mxu1 %v8727_v35 }
 0x7da   :  { %4025 = vmatpush.bf16.msrb.mxu2 %v8779_v13  ;;  %4038 = vmatpush.bf16.msrb.mxu3 %v8729_v55 }
 0x7dd   :  { %4000 = vmatpush.bf16.msrb.mxu0 %v8761_v2  ;;  %4013 = vmatpush.bf16.msra.mxu1 %v8767_v9 }
 0x7de   :  { %4026 = vmatpush.bf16.msrb.mxu2 %v8818_v52  ;;  %4039 = vmatpush.bf16.msrb.mxu3 %v8769_v36 }
 0x7e1   :  { %4001 = vmatpush.bf16.msrb.mxu0 %v8795_v7  ;;  %4014 = vmatpush.bf16.msra.mxu1 %v8805_v50 }
 0x7e2   :  { %4027 = vmatpush.bf16.msrb.mxu2 %v8859_v40  ;;  %4040 = vmatpush.bf16.msrb.mxu3 %v8807_v10 }
 0x7e5   :  { %4002 = vmatpush.bf16.msrb.mxu0 %v8838_v6  ;;  %4015 = vmatpush.bf16.msra.mxu1 %v8853_v11 }
 0x7e6   :  { %4028 = vmatpush.bf16.msrb.mxu2 %v8896_v58  ;;  %4041 = vmatpush.bf16.msrb.mxu3 %v8862_v27 }
 0x7e9   :  { %4003 = vmatpush.bf16.msrb.mxu0 %v8892_v4  ;;  %4016 = vmatpush.bf16.msra.mxu1 %v8894_v48 }
 0x7ea   :  { %4029 = vmatpush.bf16.msrb.mxu2 %v8927_v23  ;;  %4042 = vmatpush.bf16.msrb.mxu3 %v8918_v25 }
 0x848   :  { %v3757_v31 = vpop.f32.mrf.mxu0  ;;  %v3770_v18 = vpop.f32.mrf.mxu1 }
 0x849   :  { %v3800_v63 = vadd.f32 %v3757_v31, %v3048_v46  ;;  %v3801_v15 = vadd.f32 %v3770_v18, %v3077_v12 }
 0x84b   :  { %v5851_v54 = vmul.f32 -1.442695, %v3800_v63  ;;  %v5852_v38 = vmul.f32 -1.442695, %v3801_v15 }
 0x84d   :  { %6413 = vpow2.f32 %v5851_v54 }
 0x84e   :  { %6415 = vpow2.f32 %v5852_v38 }
 0x84f   :  { %v3783_v41 = vpop.f32.mrf.mxu2  ;;  %v3796_v32 = vpop.f32.mrf.mxu3 }
 0x850   :  { %v3803_v43 = vadd.f32 %v3796_v32, %v3135_v22  ;;  %v3759_v39 = vpop.f32.mrf.mxu0  ;;  %v3772_v60 = vpop.f32.mrf.mxu1  ;;  %v3802_v45 = vadd.f32 %v3783_v41, %v3106_v33 }
 0x852   :  { %v5853_v1 = vmul.f32 -1.442695, %v3803_v43 }
 0x853   :  { %v6414_v16 = vpop.eup %6413 }
 0x854   :  { %v6416_v49 = vpop.eup %6415  ;;  %v3807_v28 = vadd.f32 1.0, %v6414_v16  ;;  %6417 = vpow2.f32 %v5853_v1 }
 0x855   :  { %v3826_v29 = vadd.f32 1.0, %v6416_v49 }
 0x856   :  { %6419 = vrcp.f32 %v3807_v28  ;;  %v3819_v54 = vand.u32 2147483648, %v3807_v28  ;;  %v3817_v22 = vand.u32 2147483647, %v3807_v28  ;;  %vm3813_vm7 = vweird.f32 %v3807_v28 }
 0x857   :  { %6421 = vrcp.f32 %v3826_v29  ;;  %v3785_v8 = vpop.f32.mrf.mxu2  ;;  %v3798_v62 = vpop.f32.mrf.mxu3  ;;  %v3838_v38 = vand.u32 2147483648, %v3826_v29  ;;  %v3836_v43 = vand.u32 2147483647, %v3826_v29  ;;  %vm3832_vm8 = vweird.f32 %v3826_v29 }
 0x858   :  { %v3820_v41 = vor.u32 1.1754944e-38, %v3819_v54  ;;  %vm3818_vm11 = vcmp.eq.f32.partialorder %v3817_v22, 8.507059e+37 }
 0x859   :  { %v3839_v49 = vor.u32 1.1754944e-38, %v3838_v38  ;;  %vm3837_vm12 = vcmp.eq.f32.partialorder %v3836_v43, 8.507059e+37  ;;  %v9401_v43 = vld [vmem:[#allocation14_spill] sm:$0xff] }
 0x85a   :  { %v6418_v30 = vpop.eup %6417 }
 0x85b   :  { %v3846_v0 = vadd.f32 1.0, %v6418_v30 }
 0x85c   :  { %v6420_v46 = vpop.eup %6419 }
 0x85d   :  { %v6422_v12 = vpop.eup %6421  ;;  %v3809_v31 = vmul.f32 %v6420_v46, %v3807_v28  ;;  %6423 = vrcp.f32 %v3846_v0  ;;  %vm3814_vm5 = vweird.f32 %v6420_v46  ;;  %vm3852_vm14 = vweird.f32 %v3846_v0 }
 0x85e   :  { %v3828_v18 = vmul.f32 %v6422_v12, %v3826_v29  ;;  %6425 = vtanh.f32 %v3802_v45  ;;  %vm3833_vm6 = vweird.f32 %v6422_v12  ;;  %vm3815_vm9 = vmor %vm3813_vm7, %vm3814_vm5 }
 0x85f   :  { %v3810_v63 = vsub.f32 1.0, %v3809_v31  ;;  %vm3834_vm10 = vmor %vm3832_vm8, %vm3833_vm6 }
 0x860   :  { %v3829_v15 = vsub.f32 1.0, %v3828_v18 }
 0x861   :  { %v3811_v17 = vmul.f32 %v6420_v46, %v3810_v63 }
 0x862   :  { %v3830_v32 = vmul.f32 %v6422_v12, %v3829_v15  ;;  %v3858_v15 = vand.u32 2147483648, %v3846_v0 }
 0x863   :  { %v6424_v39 = vpop.eup %6423  ;;  %v3812_v60 = vadd.f32 %v6420_v46, %v3811_v17 }
 0x864   :  { %v3831_v1 = vadd.f32 %v6422_v12, %v3830_v32  ;;  %v3848_v16 = vmul.f32 %v6424_v39, %v3846_v0  ;;  %v6426_v62 = vpop.eup %6425  ;;  %vm3853_vm13 = vweird.f32 %v6424_v39  ;;  %v3859_v38 = vor.u32 1.1754944e-38, %v3858_v15 }
 0x865   :  { %v3816_v8 = vsel %vm3815_vm9, %v6420_v46, %v3812_v60  ;;  %v3856_v46 = vand.u32 2147483647, %v3846_v0  ;;  %vm3854_vm15 = vmor %vm3852_vm14, %vm3853_vm13 }
 0x866   :  { %v3821_v30 = vsel %vm3818_vm11, %v3820_v41, %v3816_v8  ;;  %v3835_v59 = vsel %vm3834_vm10, %v6422_v12, %v3831_v1  ;;  %v3849_v33 = vsub.f32 1.0, %v3848_v16 }
 0x867   :  { %v3840_v45 = vsel %vm3837_vm12, %v3839_v49, %v3835_v59  ;;  %v3863_v31 = vmul.f32 %v6426_v62, %v3821_v30  ;;  %vm3857_vm0 = vcmp.eq.f32.partialorder %v3856_v46, 8.507059e+37  ;;  %v9402_v62 = vld [vmem:[#allocation16_spill] sm:$0xff] }
 0x868   :  { %v3862_v18 = vmul.f32 %v3840_v45, %v9162_v37  ;;  %v3850_v63 = vmul.f32 %v6424_v39, %v3849_v33  ;;  %v9400_v37 = vld [vmem:[#allocation13_spill] sm:$0xff]  ;;  %v3138_v30 = vadd.f32 %v9402_v62, %v9068_v5 }
 0x869   :  { %v3051_v0 = vadd.f32 %v9400_v37, %v9058_v20 }
 0x86a   :  { %v9206_v28 = vadd.f32 %v3863_v31, %v3862_v18  ;;  %v3851_v29 = vadd.f32 %v6424_v39, %v3850_v63 }
 0x86c   :  { %6427 = vtanh.f32 %v9206_v28  ;;  %v3855_v54 = vsel %vm3854_vm15, %v6424_v39, %v3851_v29  ;;  %v3080_v39 = vadd.f32 %v9401_v43, %v9060_v51 }
 0x86d   :  { %v3860_v17 = vsel %vm3857_vm0, %v3859_v38, %v3855_v54 }
 0x872   :  { %v6428_v12 = vpop.eup %6427 }
 0x873   :  { %v3866_v22 = vmul.f32 %v6428_v12, %v3860_v17 }
 0x875   :  { %v3871_v32 = vpack.c.bf16 %v3866_v22, %v3866_v22  ;;  %v9403_v22 = vld [vmem:[#allocation15_spill] sm:$0xff] }
 0x877   :  { %3880 = vmatmul.bf16.vlgmr.msra.gmra.mxu0 %v3871_v32  ;;  %3893 = vmatmul.bf16.vlgmr.msrb.gmra.mxu1 %v3871_v32 }
 0x878   :  { %3906 = vmatmul.bf16.vlgmr.msra.gmra.mxu2 %v3871_v32  ;;  %3919 = vmatmul.bf16.vlgmr.msra.gmra.mxu3 %v3871_v32  ;;  %v3109_v32 = vadd.f32 %v9403_v22, %v9390_v61 }
 0x879   :  { %4120 = vmatpush.bf16.msra.mxu0 %v8600_v56  ;;  %4133 = vmatpush.bf16.msrb.mxu1 %v8605_v44 }
 0x87a   :  { %4146 = vmatpush.bf16.msra.mxu2 %v8628_v34  ;;  %4159 = vmatpush.bf16.msra.mxu3 %v8619_v21 }
 0x87d   :  { %4121 = vmatpush.bf16.msra.mxu0 %v8644_v57  ;;  %4134 = vmatpush.bf16.msrb.mxu1 %v8655_v14 }
 0x87e   :  { %4147 = vmatpush.bf16.msra.mxu2 %v8702_v42  ;;  %4160 = vmatpush.bf16.msra.mxu3 %v8657_v47 }
 0x881   :  { %4122 = vmatpush.bf16.msra.mxu0 %v8674_v3  ;;  %4135 = vmatpush.bf16.msrb.mxu1 %v8687_v24 }
 0x882   :  { %4148 = vmatpush.bf16.msra.mxu2 %v8741_v53  ;;  %4161 = vmatpush.bf16.msra.mxu3 %v8689_v19 }
 0x885   :  { %4123 = vmatpush.bf16.msra.mxu0 %v8714_v26  ;;  %4136 = vmatpush.bf16.msrb.mxu1 %v8727_v35 }
 0x886   :  { %4149 = vmatpush.bf16.msra.mxu2 %v8779_v13  ;;  %4162 = vmatpush.bf16.msra.mxu3 %v8729_v55 }
 0x889   :  { %4124 = vmatpush.bf16.msra.mxu0 %v8761_v2  ;;  %4137 = vmatpush.bf16.msrb.mxu1 %v8767_v9 }
 0x88a   :  { %4150 = vmatpush.bf16.msra.mxu2 %v8818_v52  ;;  %4163 = vmatpush.bf16.msra.mxu3 %v8769_v36 }
 0x88d   :  { %4125 = vmatpush.bf16.msra.mxu0 %v8795_v7  ;;  %4138 = vmatpush.bf16.msrb.mxu1 %v8805_v50 }
 0x88e   :  { %4151 = vmatpush.bf16.msra.mxu2 %v8859_v40  ;;  %4164 = vmatpush.bf16.msra.mxu3 %v8807_v10 }
 0x891   :  { %4126 = vmatpush.bf16.msra.mxu0 %v8838_v6  ;;  %4139 = vmatpush.bf16.msrb.mxu1 %v8853_v11 }
 0x892   :  { %4152 = vmatpush.bf16.msra.mxu2 %v8896_v58  ;;  %4165 = vmatpush.bf16.msra.mxu3 %v8862_v27 }
 0x895   :  { %4127 = vmatpush.bf16.msra.mxu0 %v8892_v4  ;;  %4140 = vmatpush.bf16.msrb.mxu1 %v8894_v48 }
 0x896   :  { %4153 = vmatpush.bf16.msra.mxu2 %v8927_v23  ;;  %4166 = vmatpush.bf16.msra.mxu3 %v8918_v25 }
 0x8f4   :  { %v3881_v60 = vpop.f32.mrf.mxu0  ;;  %v3894_v41 = vpop.f32.mrf.mxu1 }
 0x8f5   :  { %v3924_v1 = vadd.f32 %v3881_v60, %v3051_v0  ;;  %v3925_v16 = vadd.f32 %v3894_v41, %v3080_v39 }
 0x8f7   :  { %v5854_v49 = vmul.f32 -1.442695, %v3924_v1  ;;  %v5855_v8 = vmul.f32 -1.442695, %v3925_v16 }
 0x8f9   :  { %6429 = vpow2.f32 %v5854_v49 }
 0x8fa   :  { %6431 = vpow2.f32 %v5855_v8 }
 0x8fb   :  { %v3907_v59 = vpop.f32.mrf.mxu2  ;;  %v3920_v33 = vpop.f32.mrf.mxu3 }
 0x8fc   :  { %v3927_v45 = vadd.f32 %v3920_v33, %v3138_v30  ;;  %v3883_v31 = vpop.f32.mrf.mxu0  ;;  %v3896_v18 = vpop.f32.mrf.mxu1  ;;  %v3926_v43 = vadd.f32 %v3907_v59, %v3109_v32 }
 0x8fe   :  { %v5856_v63 = vmul.f32 -1.442695, %v3927_v45 }
 0x8ff   :  { %v6430_v29 = vpop.eup %6429 }
 0x900   :  { %v6432_v15 = vpop.eup %6431  ;;  %v3931_v46 = vadd.f32 1.0, %v6430_v29  ;;  %6433 = vpow2.f32 %v5856_v63 }
 0x901   :  { %v3950_v54 = vadd.f32 1.0, %v6432_v15 }
 0x902   :  { %6435 = vrcp.f32 %v3931_v46  ;;  %v3943_v49 = vand.u32 2147483648, %v3931_v46  ;;  %v3941_v30 = vand.u32 2147483647, %v3931_v46  ;;  %vm3937_vm3 = vweird.f32 %v3931_v46 }
 0x903   :  { %6437 = vrcp.f32 %v3950_v54  ;;  %v3909_v38 = vpop.f32.mrf.mxu2  ;;  %v3922_v12 = vpop.f32.mrf.mxu3  ;;  %v3962_v8 = vand.u32 2147483648, %v3950_v54  ;;  %v3960_v45 = vand.u32 2147483647, %v3950_v54  ;;  %vm3956_vm4 = vweird.f32 %v3950_v54 }
 0x904   :  { %v3944_v59 = vor.u32 1.1754944e-38, %v3943_v49  ;;  %vm3942_vm7 = vcmp.eq.f32.partialorder %v3941_v30, 8.507059e+37 }
 0x905   :  { %v3963_v15 = vor.u32 1.1754944e-38, %v3962_v8  ;;  %vm3961_vm8 = vcmp.eq.f32.partialorder %v3960_v45, 8.507059e+37 }
 0x906   :  { %v6434_v17 = vpop.eup %6433 }
 0x907   :  { %v3970_v37 = vadd.f32 1.0, %v6434_v17 }
 0x908   :  { %v6436_v0 = vpop.eup %6435 }
 0x909   :  { %v6438_v39 = vpop.eup %6437  ;;  %v3933_v60 = vmul.f32 %v6436_v0, %v3931_v46  ;;  %6439 = vrcp.f32 %v3970_v37  ;;  %vm3938_vm1 = vweird.f32 %v6436_v0  ;;  %vm3976_vm10 = vweird.f32 %v3970_v37 }
 0x90a   :  { %v3952_v41 = vmul.f32 %v6438_v39, %v3950_v54  ;;  %6441 = vtanh.f32 %v3926_v43  ;;  %vm3957_vm2 = vweird.f32 %v6438_v39  ;;  %vm3939_vm5 = vmor %vm3937_vm3, %vm3938_vm1 }
 0x90b   :  { %v3934_v1 = vsub.f32 1.0, %v3933_v60  ;;  %vm3958_vm6 = vmor %vm3956_vm4, %vm3957_vm2 }
 0x90c   :  { %v3953_v16 = vsub.f32 1.0, %v3952_v41 }
 0x90d   :  { %v3935_v62 = vmul.f32 %v6436_v0, %v3934_v1 }
 0x90e   :  { %v3954_v33 = vmul.f32 %v6438_v39, %v3953_v16  ;;  %v3982_v16 = vand.u32 2147483648, %v3970_v37 }
 0x90f   :  { %v6440_v31 = vpop.eup %6439  ;;  %v3936_v18 = vadd.f32 %v6436_v0, %v3935_v62 }
 0x910   :  { %v3955_v63 = vadd.f32 %v6438_v39, %v3954_v33  ;;  %v3972_v29 = vmul.f32 %v6440_v31, %v3970_v37  ;;  %v6442_v12 = vpop.eup %6441  ;;  %vm3977_vm9 = vweird.f32 %v6440_v31  ;;  %v3983_v8 = vor.u32 1.1754944e-38, %v3982_v16 }
 0x911   :  { %v3940_v38 = vsel %vm3939_vm5, %v6436_v0, %v3936_v18  ;;  %v3980_v0 = vand.u32 2147483647, %v3970_v37  ;;  %vm3978_vm11 = vmor %vm3976_vm10, %vm3977_vm9 }
 0x912   :  { %v3945_v17 = vsel %vm3942_vm7, %v3944_v59, %v3940_v38  ;;  %v3959_v22 = vsel %vm3958_vm6, %v6438_v39, %v3955_v63  ;;  %v3973_v32 = vsub.f32 1.0, %v3972_v29 }
 0x913   :  { %v3964_v43 = vsel %vm3961_vm8, %v3963_v15, %v3959_v22  ;;  %v3987_v60 = vmul.f32 %v6442_v12, %v3945_v17  ;;  %vm3981_vm12 = vcmp.eq.f32.partialorder %v3980_v0, 8.507059e+37 }
 0x914   :  { %v3986_v41 = vmul.f32 %v3964_v43, %v9206_v28  ;;  %v3974_v1 = vmul.f32 %v6440_v31, %v3973_v32 }
 0x916   :  { %v9250_v46 = vadd.f32 %v3987_v60, %v3986_v41  ;;  %v3975_v54 = vadd.f32 %v6440_v31, %v3974_v1 }
 0x918   :  { %6443 = vtanh.f32 %v9250_v46  ;;  %v3979_v49 = vsel %vm3978_vm11, %v6440_v31, %v3975_v54 }
 0x919   :  { %v3984_v62 = vsel %vm3981_vm12, %v3983_v8, %v3979_v49 }
 0x91e   :  { %v6444_v39 = vpop.eup %6443 }
 0x91f   :  { %v3990_v30 = vmul.f32 %v6444_v39, %v3984_v62 }
 0x921   :  { %v3995_v33 = vpack.c.bf16 %v3990_v30, %v3990_v30 }
 0x923   :  { %4004 = vmatmul.bf16.vlgmr.msrb.gmra.mxu0 %v3995_v33  ;;  %4017 = vmatmul.bf16.vlgmr.msra.gmra.mxu1 %v3995_v33 }
 0x924   :  { %4030 = vmatmul.bf16.vlgmr.msrb.gmra.mxu2 %v3995_v33  ;;  %4043 = vmatmul.bf16.vlgmr.msrb.gmra.mxu3 %v3995_v33 }
 0x925   :  { %4244 = vmatpush.bf16.msrb.mxu0 %v8600_v56  ;;  %4257 = vmatpush.bf16.msra.mxu1 %v8605_v44  ;;  %v9404_v56 = vld [vmem:[#allocation17_spill] sm:$0xff] }
 0x926   :  { %4270 = vmatpush.bf16.msrb.mxu2 %v8628_v34  ;;  %4283 = vmatpush.bf16.msrb.mxu3 %v8619_v21  ;;  %v3053_v44 = vadd.f32 %v9404_v56, %v9058_v20  ;;  %v9405_v21 = vld [vmem:[#allocation18_spill] sm:$0xff] }
 0x927   :  { %v3082_v34 = vadd.f32 %v9405_v21, %v9060_v51 }
 0x929   :  { %4245 = vmatpush.bf16.msrb.mxu0 %v8644_v57  ;;  %4258 = vmatpush.bf16.msra.mxu1 %v8655_v14 }
 0x92a   :  { %4271 = vmatpush.bf16.msrb.mxu2 %v8702_v42  ;;  %4284 = vmatpush.bf16.msrb.mxu3 %v8657_v47  ;;  %v9406_v42 = vld [vmem:[#allocation20_spill] sm:$0xff] }
 0x92d   :  { %4246 = vmatpush.bf16.msrb.mxu0 %v8674_v3  ;;  %4259 = vmatpush.bf16.msra.mxu1 %v8687_v24 }
 0x92e   :  { %4272 = vmatpush.bf16.msrb.mxu2 %v8741_v53  ;;  %4285 = vmatpush.bf16.msrb.mxu3 %v8689_v19 }
 0x931   :  { %4247 = vmatpush.bf16.msrb.mxu0 %v8714_v26  ;;  %4260 = vmatpush.bf16.msra.mxu1 %v8727_v35  ;;  %v3140_v26 = vadd.f32 %v9406_v42, %v9068_v5 }
 0x932   :  { %4273 = vmatpush.bf16.msrb.mxu2 %v8779_v13  ;;  %4286 = vmatpush.bf16.msrb.mxu3 %v8729_v55 }
 0x935   :  { %4248 = vmatpush.bf16.msrb.mxu0 %v8761_v2  ;;  %4261 = vmatpush.bf16.msra.mxu1 %v8767_v9 }
 0x936   :  { %4274 = vmatpush.bf16.msrb.mxu2 %v8818_v52  ;;  %4287 = vmatpush.bf16.msrb.mxu3 %v8769_v36 }
 0x939   :  { %4249 = vmatpush.bf16.msrb.mxu0 %v8795_v7  ;;  %4262 = vmatpush.bf16.msra.mxu1 %v8805_v50 }
 0x93a   :  { %4275 = vmatpush.bf16.msrb.mxu2 %v8859_v40  ;;  %4288 = vmatpush.bf16.msrb.mxu3 %v8807_v10  ;;  %v9407_v40 = vld [vmem:[#allocation19_spill] sm:$0xff] }
 0x93d   :  { %4250 = vmatpush.bf16.msrb.mxu0 %v8838_v6  ;;  %4263 = vmatpush.bf16.msra.mxu1 %v8853_v11 }
 0x93e   :  { %4276 = vmatpush.bf16.msrb.mxu2 %v8896_v58  ;;  %4289 = vmatpush.bf16.msrb.mxu3 %v8862_v27  ;;  %v3111_v27 = vadd.f32 %v9407_v40, %v9390_v61 }
 0x941   :  { %4251 = vmatpush.bf16.msrb.mxu0 %v8892_v4  ;;  %4264 = vmatpush.bf16.msra.mxu1 %v8894_v48 }
 0x942   :  { %4277 = vmatpush.bf16.msrb.mxu2 %v8927_v23  ;;  %4290 = vmatpush.bf16.msrb.mxu3 %v8918_v25 }
 0x9a0   :  { %v4005_v57 = vpop.f32.mrf.mxu0  ;;  %v4018_v14 = vpop.f32.mrf.mxu1 }
 0x9a1   :  { %v4048_v47 = vadd.f32 %v4005_v57, %v3053_v44  ;;  %v4049_v3 = vadd.f32 %v4018_v14, %v3082_v34 }
 0x9a3   :  { %v5857_v24 = vmul.f32 -1.442695, %v4048_v47  ;;  %v5858_v19 = vmul.f32 -1.442695, %v4049_v3 }
 0x9a5   :  { %6445 = vpow2.f32 %v5857_v24  ;;  %v9409_v24 = vld [vmem:[#allocation22_spill] sm:$0xff] }
 0x9a6   :  { %6447 = vpow2.f32 %v5858_v19  ;;  %v3085_v19 = vadd.f32 %v9409_v24, %v9060_v51 }
 0x9a7   :  { %v4031_v35 = vpop.f32.mrf.mxu2  ;;  %v4044_v55 = vpop.f32.mrf.mxu3 }
 0x9a8   :  { %v4051_v53 = vadd.f32 %v4044_v55, %v3140_v26  ;;  %v4007_v2 = vpop.f32.mrf.mxu0  ;;  %v4020_v9 = vpop.f32.mrf.mxu1  ;;  %v4050_v58 = vadd.f32 %v4031_v35, %v3111_v27 }
 0x9a9   :  { %v9410_v9 = vld [vmem:[#allocation24_spill] sm:$0xff] }
 0x9aa   :  { %v5859_v36 = vmul.f32 -1.442695, %v4051_v53 }
 0x9ab   :  { %v6446_v13 = vpop.eup %6445 }
 0x9ac   :  { %v6448_v7 = vpop.eup %6447  ;;  %v4055_v50 = vadd.f32 1.0, %v6446_v13  ;;  %6449 = vpow2.f32 %v5859_v36  ;;  %v3143_v36 = vadd.f32 %v9410_v9, %v9068_v5  ;;  %v9412_v9 = vld [vmem:[#allocation25_spill] sm:$0xff] }
 0x9ad   :  { %v4074_v10 = vadd.f32 1.0, %v6448_v7 }
 0x9ae   :  { %6451 = vrcp.f32 %v4055_v50  ;;  %v4067_v31 = vand.u32 2147483648, %v4055_v50  ;;  %v4065_v63 = vand.u32 2147483647, %v4055_v50  ;;  %vm4061_vm15 = vweird.f32 %v4055_v50 }
 0x9af   :  { %6453 = vrcp.f32 %v4074_v10  ;;  %v4033_v52 = vpop.f32.mrf.mxu2  ;;  %v4046_v6 = vpop.f32.mrf.mxu3  ;;  %v4086_v18 = vand.u32 2147483648, %v4074_v10  ;;  %v4084_v15 = vand.u32 2147483647, %v4074_v10  ;;  %vm4080_vm0 = vweird.f32 %v4074_v10 }
 0x9b0   :  { %v4068_v17 = vor.u32 1.1754944e-38, %v4067_v31  ;;  %vm4066_vm3 = vcmp.eq.f32.partialorder %v4065_v63, 8.507059e+37 }
 0x9b1   :  { %v4087_v43 = vor.u32 1.1754944e-38, %v4086_v18  ;;  %vm4085_vm4 = vcmp.eq.f32.partialorder %v4084_v15, 8.507059e+37 }
 0x9b2   :  { %v6450_v11 = vpop.eup %6449 }
 0x9b3   :  { %v4094_v4 = vadd.f32 1.0, %v6450_v11 }
 0x9b4   :  { %v6452_v48 = vpop.eup %6451 }
 0x9b5   :  { %v6454_v25 = vpop.eup %6453  ;;  %v4057_v23 = vmul.f32 %v6452_v48, %v4055_v50  ;;  %6455 = vrcp.f32 %v4094_v4  ;;  %vm4062_vm13 = vweird.f32 %v6452_v48  ;;  %v4106_v33 = vand.u32 2147483648, %v4094_v4 }
 0x9b6   :  { %v4076_v28 = vmul.f32 %v6454_v25, %v4074_v10  ;;  %6457 = vtanh.f32 %v4050_v58  ;;  %vm4081_vm14 = vweird.f32 %v6454_v25  ;;  %vm4063_vm1 = vmor %vm4061_vm15, %vm4062_vm13  ;;  %vm4100_vm6 = vweird.f32 %v4094_v4 }
 0x9b7   :  { %v4058_v37 = vsub.f32 1.0, %v4057_v23  ;;  %vm4082_vm2 = vmor %vm4080_vm0, %vm4081_vm14  ;;  %v4104_v56 = vand.u32 2147483647, %v4094_v4  ;;  %v4107_v21 = vor.u32 1.1754944e-38, %v4106_v33  ;;  %v9411_v23 = vld [vmem:[#allocation23_spill] sm:$0xff] }
 0x9b8   :  { %v4077_v45 = vsub.f32 1.0, %v4076_v28  ;;  %v3114_v28 = vadd.f32 %v9411_v23, %v9390_v61 }
 0x9b9   :  { %v4059_v59 = vmul.f32 %v6452_v48, %v4058_v37  ;;  %vm4105_vm8 = vcmp.eq.f32.partialorder %v4104_v56, 8.507059e+37 }
 0x9ba   :  { %v4078_v29 = vmul.f32 %v6454_v25, %v4077_v45 }
 0x9bb   :  { %v6456_v38 = vpop.eup %6455  ;;  %v4060_v12 = vadd.f32 %v6452_v48, %v4059_v59 }
 0x9bc   :  { %v4079_v22 = vadd.f32 %v6454_v25, %v4078_v29  ;;  %v4096_v32 = vmul.f32 %v6456_v38, %v4094_v4  ;;  %v6458_v41 = vpop.eup %6457  ;;  %vm4101_vm5 = vweird.f32 %v6456_v38 }
 0x9bd   :  { %v4064_v60 = vsel %vm4063_vm1, %v6452_v48, %v4060_v12  ;;  %vm4102_vm7 = vmor %vm4100_vm6, %vm4101_vm5 }
 0x9be   :  { %v4069_v1 = vsel %vm4066_vm3, %v4068_v17, %v4064_v60  ;;  %v4083_v54 = vsel %vm4082_vm2, %v6454_v25, %v4079_v22  ;;  %v4097_v16 = vsub.f32 1.0, %v4096_v32 }
 0x9bf   :  { %v4088_v0 = vsel %vm4085_vm4, %v4087_v43, %v4083_v54  ;;  %v4111_v49 = vmul.f32 %v6458_v41, %v4069_v1 }
 0x9c0   :  { %v4110_v8 = vmul.f32 %v4088_v0, %v9250_v46  ;;  %v4098_v39 = vmul.f32 %v6456_v38, %v4097_v16  ;;  %v9408_v46 = vld [vmem:[#allocation21_spill] sm:$0xff] }
 0x9c1   :  { %v3056_v3 = vadd.f32 %v9408_v46, %v9058_v20 }
 0x9c2   :  { %v9294_v62 = vadd.f32 %v4111_v49, %v4110_v8  ;;  %v4099_v30 = vadd.f32 %v6456_v38, %v4098_v39 }
 0x9c4   :  { %6459 = vtanh.f32 %v9294_v62  ;;  %v4103_v44 = vsel %vm4102_vm7, %v6456_v38, %v4099_v30 }
 0x9c5   :  { %v4108_v57 = vsel %vm4105_vm8, %v4107_v21, %v4103_v44 }
 0x9ca   :  { %v6460_v34 = vpop.eup %6459 }
 0x9cb   :  { %v4114_v14 = vmul.f32 %v6460_v34, %v4108_v57 }
 0x9cd   :  { %v4119_v47 = vpack.c.bf16 %v4114_v14, %v4114_v14 }
 0x9cf   :  { %4128 = vmatmul.bf16.vlgmr.msra.gmra.mxu0 %v4119_v47  ;;  %4141 = vmatmul.bf16.vlgmr.msrb.gmra.mxu1 %v4119_v47 }
 0x9d0   :  { %4154 = vmatmul.bf16.vlgmr.msra.gmra.mxu2 %v4119_v47  ;;  %4167 = vmatmul.bf16.vlgmr.msra.gmra.mxu3 %v4119_v47 }
 0xa4c   :  { %v4129_v42 = vpop.f32.mrf.mxu0  ;;  %v4142_v26 = vpop.f32.mrf.mxu1 }
 0xa4d   :  { %v4172_v35 = vadd.f32 %v4129_v42, %v3056_v3  ;;  %v4173_v55 = vadd.f32 %v4142_v26, %v3085_v19 }
 0xa4f   :  { %v5860_v53 = vmul.f32 -1.442695, %v4172_v35  ;;  %v5861_v2 = vmul.f32 -1.442695, %v4173_v55  ;;  %v6232_v55 = vld [vmem:[%s9354_s5 + $0x30] sm:$0xff] }
 0xa51   :  { %6461 = vpow2.f32 %v5860_v53  ;;  %v6231_v53 = vld [vmem:[%s9354_s5 + $0x28] sm:$0xff] }
 0xa52   :  { %6463 = vpow2.f32 %v5861_v2  ;;  %v6230_v2 = vld [vmem:[%s9354_s5 + $0x20] sm:$0xff] }
 0xa53   :  { %v4155_v13 = vpop.f32.mrf.mxu2  ;;  %v4168_v7 = vpop.f32.mrf.mxu3 }
 0xa54   :  { %v4175_v50 = vadd.f32 %v4168_v7, %v3143_v36  ;;  %v4131_v10 = vpop.f32.mrf.mxu0  ;;  %v4144_v52 = vpop.f32.mrf.mxu1  ;;  %v4174_v31 = vadd.f32 %v4155_v13, %v3114_v28  ;;  %v3058_v36 = vadd.f32 %v9412_v9, %v9058_v20  ;;  %v9413_v13 = vld [vmem:[#allocation26_spill] sm:$0xff]  ;;  %v9414_v20 = vld [vmem:[#allocation28_spill] sm:$0xff] }
 0xa55   :  { %v3087_v7 = vadd.f32 %v9413_v13, %v9060_v51  ;;  %v6227_v51 = vld [vmem:[%s9354_s5 + $0x8] sm:$0xff] }
 0xa56   :  { %v5862_v6 = vmul.f32 -1.442695, %v4175_v50  ;;  %v6229_v50 = vld [vmem:[%s9354_s5 + $0x18] sm:$0xff] }
 0xa57   :  { %v6462_v11 = vpop.eup %6461 }
 0xa58   :  { %v6464_v40 = vpop.eup %6463  ;;  %v4179_v27 = vadd.f32 1.0, %v6462_v11  ;;  %6465 = vpow2.f32 %v5862_v6 }
 0xa59   :  { %v4198_v4 = vadd.f32 1.0, %v6464_v40 }
 0xa5a   :  { %6467 = vrcp.f32 %v4179_v27  ;;  %v4191_v38 = vand.u32 2147483648, %v4179_v27  ;;  %v4189_v22 = vand.u32 2147483647, %v4179_v27  ;;  %vm4185_vm11 = vweird.f32 %v4179_v27 }
 0xa5b   :  { %6469 = vrcp.f32 %v4198_v4  ;;  %v4157_v48 = vpop.f32.mrf.mxu2  ;;  %v4170_v58 = vpop.f32.mrf.mxu3  ;;  %v4210_v12 = vand.u32 2147483648, %v4198_v4  ;;  %v4208_v43 = vand.u32 2147483647, %v4198_v4  ;;  %vm4204_vm12 = vweird.f32 %v4198_v4 }
 0xa5c   :  { %v4192_v1 = vor.u32 1.1754944e-38, %v4191_v38  ;;  %vm4190_vm15 = vcmp.eq.f32.partialorder %v4189_v22, 8.507059e+37  ;;  %v3145_v48 = vadd.f32 %v9414_v20, %v9068_v5 }
 0xa5d   :  { %v4211_v0 = vor.u32 1.1754944e-38, %v4210_v12  ;;  %vm4209_vm0 = vcmp.eq.f32.partialorder %v4208_v43, 8.507059e+37  ;;  %v9415_v12 = vld [vmem:[#allocation27_spill] sm:$0xff] }
 0xa5e   :  { %v6466_v25 = vpop.eup %6465 }
 0xa5f   :  { %v4218_v37 = vadd.f32 1.0, %v6466_v25 }
 0xa60   :  { %v6468_v45 = vpop.eup %6467 }
 0xa61   :  { %v6470_v18 = vpop.eup %6469  ;;  %v4181_v59 = vmul.f32 %v6468_v45, %v4179_v27  ;;  %6471 = vrcp.f32 %v4218_v37  ;;  %vm4186_vm9 = vweird.f32 %v6468_v45  ;;  %v4230_v47 = vand.u32 2147483648, %v4218_v37 }
 0xa62   :  { %v4200_v63 = vmul.f32 %v6470_v18, %v4198_v4  ;;  %6473 = vtanh.f32 %v4174_v31  ;;  %vm4205_vm10 = vweird.f32 %v6470_v18  ;;  %vm4187_vm13 = vmor %vm4185_vm11, %vm4186_vm9  ;;  %vm4224_vm2 = vweird.f32 %v4218_v37  ;;  %v6228_v4 = vld [vmem:[%s9354_s5 + $0x10] sm:$0xff] }
 0xa63   :  { %v4182_v29 = vsub.f32 1.0, %v4181_v59  ;;  %vm4206_vm14 = vmor %vm4204_vm12, %vm4205_vm10  ;;  %v4228_v46 = vand.u32 2147483647, %v4218_v37  ;;  %v4231_v24 = vor.u32 1.1754944e-38, %v4230_v47 }
 0xa64   :  { %v4201_v15 = vsub.f32 1.0, %v4200_v63 }
 0xa65   :  { %v4183_v17 = vmul.f32 %v6468_v45, %v4182_v29  ;;  %vm4229_vm4 = vcmp.eq.f32.partialorder %v4228_v46, 8.507059e+37 }
 0xa66   :  { %v4202_v32 = vmul.f32 %v6470_v18, %v4201_v15 }
 0xa67   :  { %v6472_v60 = vpop.eup %6471  ;;  %v4184_v41 = vadd.f32 %v6468_v45, %v4183_v17  ;;  %v3116_v17 = vadd.f32 %v9415_v12, %v9390_v61 }
 0xa68   :  { %v4203_v54 = vadd.f32 %v6470_v18, %v4202_v32  ;;  %v4220_v16 = vmul.f32 %v6472_v60, %v4218_v37  ;;  %v6474_v8 = vpop.eup %6473  ;;  %vm4225_vm1 = vweird.f32 %v6472_v60 }
 0xa69   :  { %v4188_v49 = vsel %vm4187_vm13, %v6468_v45, %v4184_v41  ;;  %vm4226_vm3 = vmor %vm4224_vm2, %vm4225_vm1  ;;  %v6226_v45 = vld [vmem:[%s9354_s5] sm:$0xff] }
 0xa6a   :  { %v4193_v39 = vsel %vm4190_vm15, %v4192_v1, %v4188_v49  ;;  %v4207_v30 = vsel %vm4206_vm14, %v6470_v18, %v4203_v54  ;;  %v4221_v33 = vsub.f32 1.0, %v4220_v16 }
 0xa6b   :  { %v4212_v56 = vsel %vm4209_vm0, %v4211_v0, %v4207_v30  ;;  %v4235_v44 = vmul.f32 %v6474_v8, %v4193_v39 }
 0xa6c   :  { %v4234_v21 = vmul.f32 %v4212_v56, %v9294_v62  ;;  %v4222_v34 = vmul.f32 %v6472_v60, %v4221_v33  ;;  %v6233_v62 = vld [vmem:[%s9354_s5 + $0x38] sm:$0xff] }
 0xa6d   :  { %4432 = vmatpush.bf16.msra.mxu0 %v6233_v62 }
 0xa6e   :  { %v9306_v57 = vadd.f32 %v4235_v44, %v4234_v21  ;;  %v4223_v14 = vadd.f32 %v6472_v60, %v4222_v34 }
 0xa70   :  { %6475 = vtanh.f32 %v9306_v57  ;;  %v4227_v3 = vsel %vm4226_vm3, %v6472_v60, %v4223_v14 }
 0xa71   :  { %v4232_v42 = vsel %vm4229_vm4, %v4231_v24, %v4227_v3  ;;  %4433 = vmatpush.bf16.msra.mxu0 %v6232_v55 }
 0xa75   :  { %4434 = vmatpush.bf16.msra.mxu0 %v6231_v53 }
 0xa76   :  { %v6476_v19 = vpop.eup %6475 }
 0xa77   :  { %v4238_v26 = vmul.f32 %v6476_v19, %v4232_v42 }
 0xa79   :  { %v4243_v35 = vpack.c.bf16 %v4238_v26, %v4238_v26  ;;  %4435 = vmatpush.bf16.msra.mxu0 %v6230_v2 }
 0xa7b   :  { %4252 = vmatmul.bf16.vlgmr.msrb.gmra.mxu0 %v4243_v35  ;;  %4265 = vmatmul.bf16.vlgmr.msra.gmra.mxu1 %v4243_v35 }
 0xa7c   :  { %4278 = vmatmul.bf16.vlgmr.msrb.gmra.mxu2 %v4243_v35  ;;  %4291 = vmatmul.bf16.vlgmr.msrb.gmra.mxu3 %v4243_v35 }
 0xa7d   :  { %4436 = vmatpush.bf16.msra.mxu0 %v6229_v50 }
 0xa81   :  { %4437 = vmatpush.bf16.msra.mxu0 %v6228_v4 }
 0xa85   :  { %4438 = vmatpush.bf16.msra.mxu0 %v6227_v51 }
 0xa89   :  { %4439 = vmatpush.bf16.msra.mxu0 %v6226_v45 }
 0xaf8   :  { %v4253_v10 = vpop.f32.mrf.mxu0  ;;  %v4266_v52 = vpop.f32.mrf.mxu1 }
 0xaf9   :  { %v4296_v6 = vadd.f32 %v4253_v10, %v3058_v36  ;;  %v4297_v11 = vadd.f32 %v4266_v52, %v3087_v7 }
 0xafb   :  { %v5863_v40 = vmul.f32 -1.442695, %v4296_v6  ;;  %v5864_v27 = vmul.f32 -1.442695, %v4297_v11 }
 0xafd   :  { %6477 = vpow2.f32 %v5863_v40 }
 0xafe   :  { %6479 = vpow2.f32 %v5864_v27 }
 0xaff   :  { %v4279_v58 = vpop.f32.mrf.mxu2  ;;  %v4292_v25 = vpop.f32.mrf.mxu3 }
 0xb00   :  { %v4299_v23 = vadd.f32 %v4292_v25, %v3145_v48  ;;  %v4255_v28 = vpop.f32.mrf.mxu0  ;;  %v4268_v37 = vpop.f32.mrf.mxu1  ;;  %v4298_v43 = vadd.f32 %v4279_v58, %v3116_v17 }
 0xb02   :  { %v5865_v31 = vmul.f32 -1.442695, %v4299_v23 }
 0xb03   :  { %v6478_v18 = vpop.eup %6477 }
 0xb04   :  { %v6480_v59 = vpop.eup %6479  ;;  %v4303_v63 = vadd.f32 1.0, %v6478_v18  ;;  %6481 = vpow2.f32 %v5865_v31 }
 0xb05   :  { %v4322_v29 = vadd.f32 1.0, %v6480_v59 }
 0xb06   :  { %6483 = vrcp.f32 %v4303_v63  ;;  %v4315_v0 = vand.u32 2147483648, %v4303_v63  ;;  %v4313_v39 = vand.u32 2147483647, %v4303_v63  ;;  %vm4309_vm7 = vweird.f32 %v4303_v63 }
 0xb07   :  { %6485 = vrcp.f32 %v4322_v29  ;;  %v4281_v5 = vpop.f32.mrf.mxu2  ;;  %v4294_v15 = vpop.f32.mrf.mxu3  ;;  %v4334_v49 = vand.u32 2147483648, %v4322_v29  ;;  %v4332_v33 = vand.u32 2147483647, %v4322_v29  ;;  %vm4328_vm8 = vweird.f32 %v4322_v29 }
 0xb08   :  { %v4316_v44 = vor.u32 1.1754944e-38, %v4315_v0  ;;  %vm4314_vm11 = vcmp.eq.f32.partialorder %v4313_v39, 8.507059e+37 }
 0xb09   :  { %v4335_v14 = vor.u32 1.1754944e-38, %v4334_v49  ;;  %vm4333_vm12 = vcmp.eq.f32.partialorder %v4332_v33, 8.507059e+37 }
 0xb0a   :  { %v6482_v38 = vpop.eup %6481 }
 0xb0b   :  { %v4342_v22 = vadd.f32 1.0, %v6482_v38 }
 0xb0c   :  { %v6484_v32 = vpop.eup %6483 }
 0xb0d   :  { %v6486_v60 = vpop.eup %6485  ;;  %v4305_v41 = vmul.f32 %v6484_v32, %v4303_v63  ;;  %6487 = vrcp.f32 %v4342_v22  ;;  %vm4310_vm5 = vweird.f32 %v6484_v32  ;;  %v4354_v2 = vand.u32 2147483648, %v4342_v22 }
 0xb0e   :  { %v4324_v1 = vmul.f32 %v6486_v60, %v4322_v29  ;;  %6489 = vtanh.f32 %v4298_v43  ;;  %vm4329_vm6 = vweird.f32 %v6486_v60  ;;  %vm4311_vm9 = vmor %vm4309_vm7, %vm4310_vm5  ;;  %vm4348_vm14 = vweird.f32 %v4342_v22 }
 0xb0f   :  { %v4306_v54 = vsub.f32 1.0, %v4305_v41  ;;  %vm4330_vm10 = vmor %vm4328_vm8, %vm4329_vm6  ;;  %v4352_v9 = vand.u32 2147483647, %v4342_v22  ;;  %v4355_v13 = vor.u32 1.1754944e-38, %v4354_v2 }
 0xb10   :  { %v4325_v16 = vsub.f32 1.0, %v4324_v1 }
 0xb11   :  { %v4307_v8 = vmul.f32 %v6484_v32, %v4306_v54  ;;  %vm4353_vm0 = vcmp.eq.f32.partialorder %v4352_v9, 8.507059e+37 }
 0xb12   :  { %v4326_v30 = vmul.f32 %v6486_v60, %v4325_v16 }
 0xb13   :  { %v6488_v56 = vpop.eup %6487  ;;  %v4308_v61 = vadd.f32 %v6484_v32, %v4307_v8 }
 0xb14   :  { %v4327_v21 = vadd.f32 %v6486_v60, %v4326_v30  ;;  %v4344_v34 = vmul.f32 %v6488_v56, %v4342_v22  ;;  %v6490_v46 = vpop.eup %6489  ;;  %vm4349_vm13 = vweird.f32 %v6488_v56 }
 0xb15   :  { %v4312_v47 = vsel %vm4311_vm9, %v6484_v32, %v4308_v61  ;;  %vm4350_vm15 = vmor %vm4348_vm14, %vm4349_vm13 }
 0xb16   :  { %v4317_v3 = vsel %vm4314_vm11, %v4316_v44, %v4312_v47  ;;  %v4331_v24 = vsel %vm4330_vm10, %v6486_v60, %v4327_v21  ;;  %v4345_v19 = vsub.f32 1.0, %v4344_v34 }
 0xb17   :  { %v4336_v42 = vsel %vm4333_vm12, %v4335_v14, %v4331_v24  ;;  %v4359_v26 = vmul.f32 %v6490_v46, %v4317_v3 }
 0xb18   :  { %v4358_v35 = vmul.f32 %v4336_v42, %v9306_v57  ;;  %v4346_v62 = vmul.f32 %v6488_v56, %v4345_v19  ;;  %v6236_v57 = vld [vmem:[%s9353_s6] ss:$0 sm:$0xff] }
 0xb1a   :  { %v4360_v55 = vadd.f32 %v4359_v26, %v4358_v35  ;;  %v4347_v53 = vadd.f32 %v6488_v56, %v4346_v62 }
 0xb1c   :  { %6491 = vtanh.f32 %v4360_v55  ;;  %v4351_v36 = vsel %vm4350_vm15, %v6488_v56, %v4347_v53 }
 0xb1d   :  { %v4356_v50 = vsel %vm4353_vm0, %v4355_v13, %v4351_v36 }
 0xb22   :  { %v6492_v7 = vpop.eup %6491 }
 0xb23   :  { %v4362_v10 = vmul.f32 %v6492_v7, %v4356_v50 }
 0xb25   :  { %v4363_v52 = vpack.c.bf16 %v4362_v10, %v4362_v10 }
 0xb27   :  { %4440 = vmatmul.bf16.vlgmr.msra.gmra.mxu0 %v4363_v52 }
 0xba4   :  { %v4441_v6 = vpop.f32.mrf.mxu0 }
 0xba5   :  { %v4442_v11 = vadd.f32 %v6236_v57, %v4441_v6 }
 0xba7   :  { %4445 = vst [vmem:[%s9355_s7] sm:$0xff] %v4442_v11 }
 0xbac   :  { %v4443_v40 = vpop.f32.mrf.mxu0 }

</bundles_post_ra>
